<compile_context>
chip_gen: v6e
topology: v6e:2x2x1
jax: 0.10.0
libtpu: 0.0.40
codegen_flags: <defaults>
</compile_context>

<pallas_src>
import functools

import jax
import jax.numpy as jnp
from jax import lax
from jax.experimental import pallas as pl
from jax.experimental.pallas import tpu as pltpu

LANE = 128


# ---------------------------------------------------------------------------
# Kernel 1: fused conv stack (conv1..conv5 + tanh + ZeroPad2d tops)
# ---------------------------------------------------------------------------
def _dcnn_conv_kernel(x_ref, w1_ref, b1_ref, w2_ref, b2_ref, w3_ref, b3_ref,
                      w4_ref, b4_ref, w5_ref, b5_ref, out_ref, *, L, W, C, K):
    f32 = jnp.float32
    xs = x_ref[0]                                   # (L, W, 1)

    # conv1 (in_channels = 1) + tanh
    h1 = L - K + 1
    acc = jnp.zeros((h1, W, C), f32)
    for dk in range(K):
        acc = acc + xs[dk:dk + h1] * w1_ref[dk][None, None, :]
    a = jnp.tanh(acc + b1_ref[...])                 # (h1, W, C)

    def pad_top(t, p):                              # ZeroPad2d((0,0,p,0))
        return jnp.concatenate(
            [jnp.zeros((p,) + t.shape[1:], f32), t], axis=0)

    def conv_tanh(t, w_ref, b_ref):                 # (Hin, W, C) -> (Hout, W, C)
        hin = t.shape[0]
        hout = hin - K + 1
        acc2 = jnp.zeros((hout * W, C), f32)
        for dk in range(K):
            lhs = t[dk:dk + hout].reshape(hout * W, C)
            acc2 = acc2 + jnp.dot(lhs, w_ref[dk],
                                  preferred_element_type=f32)
        return jnp.tanh(acc2 + b_ref[...]).reshape(hout, W, C)

    a = conv_tanh(pad_top(a, 10), w2_ref, b2_ref)
    a = conv_tanh(pad_top(a, 10), w3_ref, b3_ref)
    a = conv_tanh(pad_top(a, 10), w4_ref, b4_ref)
    a = pad_top(a, 10)

    # conv5 (out_channels = 1, kernel 3) + tanh
    hin = a.shape[0]
    h5 = hin - 3 + 1
    acc5 = jnp.zeros((h5, W, 1), f32)
    for dk in range(3):
        acc5 = acc5 + jnp.sum(a[dk:dk + h5] * w5_ref[dk][None, None, :],
                              axis=-1, keepdims=True)
    a5 = jnp.tanh(acc5 + b5_ref[0, 0])              # (h5, W, 1)

    # pad2 (top); dropout is eval-mode identity.
    # TODO(synk): training-mode nn.Dropout masking would use
    # pltpu.prng_seed / pltpu.prng_random_bits; forward here is eval-mode.
    out_ref[0] = pad_top(a5, 2)                     # (h5 + 2, W, 1)


# ---------------------------------------------------------------------------
# Kernel 2: MLP head (fc1 + tanh + fc2)
# ---------------------------------------------------------------------------
def _mlp_head_kernel(x_ref, w1_ref, b1_ref, w2_ref, b2_ref, out_ref):
    h = jnp.tanh(jnp.dot(x_ref[...], w1_ref[...],
                         preferred_element_type=jnp.float32) + b1_ref[...])
    out_ref[...] = (jnp.sum(h * w2_ref[...], axis=-1, keepdims=True)
                    + b2_ref[...])


def _final_height(seq_length, kernel_length):
    h = seq_length - kernel_length + 1              # conv1
    for _ in range(3):                              # conv2..conv4 (after pad10)
        h = (h + 10) - kernel_length + 1
    h = (h + 10) - 3 + 1                            # conv5 (after pad10)
    return h + 2                                    # pad2


def dcnn_forward(x, params, *, num_sensors, seq_length, kernel_length,
                 hidden_size):
    """Pallas equivalent of Model.forward (eval mode)."""
    B = x.shape[0]
    L, W, C, K = seq_length, num_sensors, hidden_size, kernel_length
    Hf = _final_height(L, K)

    # Wrapper-side layout plumbing (plain XLA): squeeze channel, trailing
    # size-1 lane dim so the kernel lane-broadcasts it to C; weights go to
    # (K, Cin, Cout) so each tap is a direct (Cin, Cout) matmul operand.
    x4 = x[:, 0][..., None].astype(jnp.float32)                 # (B, L, W, 1)
    w1k = jnp.transpose(params["w1"][:, 0, :, 0], (1, 0))       # (K, C)
    w2k = jnp.transpose(params["w2"][:, :, :, 0], (2, 1, 0))    # (K, Ci, Co)
    w3k = jnp.transpose(params["w3"][:, :, :, 0], (2, 1, 0))
    w4k = jnp.transpose(params["w4"][:, :, :, 0], (2, 1, 0))
    w5k = jnp.transpose(params["w5"][0, :, :, 0], (1, 0))       # (3, C)
    b1k, b2k, b3k, b4k = (params[k][None, :]
                          for k in ("b1", "b2", "b3", "b4"))    # (1, C)
    b5k = params["b5"].reshape(1, 1)

    wspec2 = pl.BlockSpec((K, C), lambda b: (0, 0))
    wspec3 = pl.BlockSpec((K, C, C), lambda b: (0, 0, 0))
    bspec = pl.BlockSpec((1, C), lambda b: (0, 0))

    conv_out = pl.pallas_call(
        functools.partial(_dcnn_conv_kernel, L=L, W=W, C=C, K=K),
        out_shape=jax.ShapeDtypeStruct((B, Hf, W, 1), jnp.float32),
        grid=(B,),
        in_specs=[
            pl.BlockSpec((1, L, W, 1), lambda b: (b, 0, 0, 0)),
            wspec2, bspec,
            wspec3, bspec,
            wspec3, bspec,
            wspec3, bspec,
            pl.BlockSpec((3, C), lambda b: (0, 0)),
            pl.BlockSpec((1, 1), lambda b: (0, 0)),
        ],
        out_specs=pl.BlockSpec((1, Hf, W, 1), lambda b: (b, 0, 0, 0)),
        compiler_params=pltpu.CompilerParams(
            dimension_semantics=("parallel",)),
    )(x4, w1k, b1k, w2k, b2k, w3k, b3k, w4k, b4k, w5k, b5k)

    # squeeze(1) + view(-1, seq_length * num_sensors)  (torch semantics)
    flat = conv_out[..., 0].reshape(-1, L * W)

    out = pl.pallas_call(
        _mlp_head_kernel,
        out_shape=jax.ShapeDtypeStruct((flat.shape[0], 1), jnp.float32),
    )(flat, jnp.transpose(params["fc1_w"]), params["fc1_b"][None, :],
      params["fc2_w"], params["fc2_b"].reshape(1, 1))
    return out


# ---------------------------------------------------------------------------
# RMSE criterion kernel (improved per performance review)
# ---------------------------------------------------------------------------
def _rmse_kernel(pred_ref, act_ref, out_ref, acc_ref, *, total_rows, total_n,
                 block_rows):
    i = pl.program_id(0)

    @pl.when(i == 0)
    def _():
        acc_ref[...] = jnp.zeros_like(acc_ref)

    d = pred_ref[...].astype(jnp.float32) - act_ref[...].astype(jnp.float32)
    dd = d * d
    # Mask rows beyond the real array (ragged tail of the last block).
    row = i * block_rows + lax.broadcasted_iota(jnp.int32, dd.shape, 0)
    dd = jnp.where(row < total_rows, dd, 0.0)
    acc_ref[...] += dd                 # VMEM vector accumulator (VPU only)

    @pl.when(i == pl.num_programs(0) - 1)
    def _():
        # Single cross-lane reduce + sqrt, once per kernel.
        out_ref[0, 0] = jnp.sqrt(jnp.sum(acc_ref[...]) / jnp.float32(total_n))


def rmse_loss(pred, actual, *, block_rows=2048):
    """sqrt(mean((pred - actual)**2)) — torch.sqrt(nn.MSELoss()(pred, actual))."""
    assert pred.shape == actual.shape
    total_n = pred.size

    p = pred.reshape(-1).astype(jnp.float32)
    a = actual.reshape(-1).astype(jnp.float32)
    padded = pl.cdiv(total_n, LANE) * LANE
    if padded != total_n:              # lane tail zero-padded (contributes 0)
        p = jnp.pad(p, (0, padded - total_n))
        a = jnp.pad(a, (0, padded - total_n))
    rows = padded // LANE
    br = min(block_rows, ((rows + 7) // 8) * 8)
    grid = (pl.cdiv(rows, br),)

    out = pl.pallas_call(
        functools.partial(_rmse_kernel, total_rows=rows, total_n=total_n,
                          block_rows=br),
        out_shape=jax.ShapeDtypeStruct((1, 1), jnp.float32),
        grid_spec=pltpu.PrefetchScalarGridSpec(
            num_scalar_prefetch=0,
            grid=grid,
            in_specs=[
                pl.BlockSpec((br, LANE), lambda i: (i, 0)),
                pl.BlockSpec((br, LANE), lambda i: (i, 0)),
            ],
            out_specs=pl.BlockSpec((1, 1), lambda i: (0, 0),
                                   memory_space=pltpu.SMEM),
            scratch_shapes=[pltpu.VMEM((br, LANE), jnp.float32)]),
        compiler_params=pltpu.CompilerParams(
            dimension_semantics=("arbitrary",)),
    )(p.reshape(rows, LANE), a.reshape(rows, LANE))
    return out[0, 0]


# ---------------------------------------------------------------------------
# Pure-JAX reference (mirrors the PyTorch module)
# ---------------------------------------------------------------------------
def model_forward_ref(x, params, *, num_sensors, seq_length):
    def conv(y, w, b):
        out = lax.conv_general_dilated(
            y, w, window_strides=(1, 1), padding="VALID",
            dimension_numbers=("NCHW", "OIHW", "NCHW"))
        return out + b[None, :, None, None]

    def pad_top(y, p):
        return jnp.pad(y, ((0, 0), (0, 0), (p, 0), (0, 0)))

    y = jnp.tanh(conv(x, params["w1"], params["b1"]))
    y = pad_top(y, 10)
    y = jnp.tanh(conv(y, params["w2"], params["b2"]))
    y = pad_top(y, 10)
    y = jnp.tanh(conv(y, params["w3"], params["b3"]))
    y = pad_top(y, 10)
    y = jnp.tanh(conv(y, params["w4"], params["b4"]))
    y = pad_top(y, 10)
    y = jnp.tanh(conv(y, params["w5"], params["b5"]))
    y = pad_top(y, 2)
    y = y[:, 0].reshape(-1, seq_length * num_sensors)
    h = jnp.tanh(y @ params["fc1_w"].T + params["fc1_b"])
    return h @ params["fc2_w"].T + params["fc2_b"]


if __name__ == "__main__":
    B, NUM_SENSORS, SEQ_LEN, KERNEL_LEN, HIDDEN = 2, 8, 16, 11, 32

    key = jax.random.PRNGKey(0)
    ks = jax.random.split(key, 18)
    s = 0.25

    def rnd(i, shape):
        return s * jax.random.normal(ks[i], shape, jnp.float32)

    params = {
        "w1": rnd(0, (HIDDEN, 1, KERNEL_LEN, 1)),
        "b1": rnd(1, (HIDDEN,)),
        "w2": rnd(2, (HIDDEN, HIDDEN, KERNEL_LEN, 1)),
        "b2": rnd(3, (HIDDEN,)),
        "w3": rnd(4, (HIDDEN, HIDDEN, KERNEL_LEN, 1)),
        "b3": rnd(5, (HIDDEN,)),
        "w4": rnd(6, (HIDDEN, HIDDEN, KERNEL_LEN, 1)),
        "b4": rnd(7, (HIDDEN,)),
        "w5": rnd(8, (1, HIDDEN, 3, 1)),
        "b5": rnd(9, (1,)),
        "fc1_w": rnd(10, (100, SEQ_LEN * NUM_SENSORS)),
        "fc1_b": rnd(11, (100,)),
        "fc2_w": rnd(12, (1, 100)),
        "fc2_b": rnd(13, (1,)),
    }
    x = jax.random.normal(ks[14], (B, 1, SEQ_LEN, NUM_SENSORS), jnp.float32)

    out = dcnn_forward(x, params, num_sensors=NUM_SENSORS, seq_length=SEQ_LEN,
                       kernel_length=KERNEL_LEN, hidden_size=HIDDEN)
    out = jax.block_until_ready(out)

    ref = model_forward_ref(x, params, num_sensors=NUM_SENSORS,
                            seq_length=SEQ_LEN)
    assert out.shape == ref.shape, (out.shape, ref.shape)
    assert jnp.allclose(out, ref, rtol=1e-4, atol=1e-4), (out, ref)

    # RMSE criterion kernel: small check on the model output ...
    target = jax.random.normal(ks[15], out.shape, jnp.float32)
    loss = jax.block_until_ready(rmse_loss(out, target))
    loss_ref = jnp.sqrt(jnp.mean((out - target) ** 2))
    assert jnp.allclose(loss, loss_ref, rtol=1e-5, atol=1e-6), (loss, loss_ref)

    # ... and a larger, ragged-sized check exercising multi-step accumulation
    # (grid of 3 blocks of 2048x128) plus the masked tail.
    big_p = jax.random.normal(ks[16], (600, 1001), jnp.float32)
    big_t = jax.random.normal(ks[17], (600, 1001), jnp.float32)
    big = jax.block_until_ready(rmse_loss(big_p, big_t))
    big_ref = jnp.sqrt(jnp.mean((big_p - big_t) ** 2))
    assert jnp.allclose(big, big_ref, rtol=1e-5, atol=1e-6), (big, big_ref)

    print("KERNEL_OK")
</pallas_src>

<mosaic_0001>
module attributes {stable_mosaic.version = 11 : i64} {
  func.func @_dcnn_conv_kernel(%arg0: i32, %arg1: memref<1x16x8x1xf32, #tpu.memory_space<vmem>>, %arg2: memref<11x32xf32, #tpu.memory_space<vmem>>, %arg3: memref<1x32xf32, #tpu.memory_space<vmem>>, %arg4: memref<11x32x32xf32, #tpu.memory_space<vmem>>, %arg5: memref<1x32xf32, #tpu.memory_space<vmem>>, %arg6: memref<11x32x32xf32, #tpu.memory_space<vmem>>, %arg7: memref<1x32xf32, #tpu.memory_space<vmem>>, %arg8: memref<11x32x32xf32, #tpu.memory_space<vmem>>, %arg9: memref<1x32xf32, #tpu.memory_space<vmem>>, %arg10: memref<3x32xf32, #tpu.memory_space<vmem>>, %arg11: memref<1x1xf32, #tpu.memory_space<vmem>>, %arg12: memref<1x16x8x1xf32, #tpu.memory_space<vmem>>) attributes {dimension_semantics = [#tpu.dimension_semantics<parallel>], iteration_bounds = array<i64: 2>, scalar_prefetch = 0 : i64, scratch_operands = 0 : i64, tpu.core_type = #tpu.core_type<tc>, window_params = [{transform_indices = @transform_0, window_bounds = array<i64: 1, 16, 8, 1>}, {pipeline_mode = #tpu.pipeline_mode<synchronous>, transform_indices = @transform_1, window_bounds = array<i64: 11, 32>}, {pipeline_mode = #tpu.pipeline_mode<synchronous>, transform_indices = @transform_2, window_bounds = array<i64: 1, 32>}, {pipeline_mode = #tpu.pipeline_mode<synchronous>, transform_indices = @transform_3, window_bounds = array<i64: 11, 32, 32>}, {pipeline_mode = #tpu.pipeline_mode<synchronous>, transform_indices = @transform_4, window_bounds = array<i64: 1, 32>}, {pipeline_mode = #tpu.pipeline_mode<synchronous>, transform_indices = @transform_5, window_bounds = array<i64: 11, 32, 32>}, {pipeline_mode = #tpu.pipeline_mode<synchronous>, transform_indices = @transform_6, window_bounds = array<i64: 1, 32>}, {pipeline_mode = #tpu.pipeline_mode<synchronous>, transform_indices = @transform_7, window_bounds = array<i64: 11, 32, 32>}, {pipeline_mode = #tpu.pipeline_mode<synchronous>, transform_indices = @transform_8, window_bounds = array<i64: 1, 32>}, {pipeline_mode = #tpu.pipeline_mode<synchronous>, transform_indices = @transform_9, window_bounds = array<i64: 3, 32>}, {pipeline_mode = #tpu.pipeline_mode<synchronous>, transform_indices = @transform_10, window_bounds = array<i64: 1, 1>}, {transform_indices = @transform_11, window_bounds = array<i64: 1, 16, 8, 1>}]} {
    %c0 = arith.constant 0 : index
    %c0_0 = arith.constant 0 : index
    %c0_1 = arith.constant 0 : index
    %c0_2 = arith.constant 0 : index
    %0 = vector.load %arg1[%c0, %c0_0, %c0_1, %c0_2] : memref<1x16x8x1xf32, #tpu.memory_space<vmem>>, vector<1x16x8x1xf32>
    %1 = vector.shape_cast %0 : vector<1x16x8x1xf32> to vector<16x8x1xf32>
    %cst = arith.constant 0.000000e+00 : f32
    %2 = vector.broadcast %cst : f32 to vector<6x8x32xf32>
    %3 = vector.extract_strided_slice %1 {offsets = [0, 0, 0], sizes = [6, 8, 1], strides = [1, 1, 1]} : vector<16x8x1xf32> to vector<6x8x1xf32>
    %c0_3 = arith.constant 0 : index
    %c0_4 = arith.constant 0 : index
    %4 = vector.load %arg2[%c0_3, %c0_4] : memref<11x32xf32, #tpu.memory_space<vmem>>, vector<1x32xf32>
    %5 = vector.shape_cast %4 : vector<1x32xf32> to vector<32xf32>
    %6 = vector.shape_cast %5 : vector<32xf32> to vector<1x1x32xf32>
    %7 = vector.broadcast %3 : vector<6x8x1xf32> to vector<6x8x32xf32>
    %8 = vector.broadcast %6 : vector<1x1x32xf32> to vector<6x8x32xf32>
    %9 = arith.mulf %7, %8 : vector<6x8x32xf32>
    %10 = arith.addf %2, %9 : vector<6x8x32xf32>
    %11 = vector.extract_strided_slice %1 {offsets = [1, 0, 0], sizes = [6, 8, 1], strides = [1, 1, 1]} : vector<16x8x1xf32> to vector<6x8x1xf32>
    %c1 = arith.constant 1 : index
    %c0_5 = arith.constant 0 : index
    %12 = vector.load %arg2[%c1, %c0_5] : memref<11x32xf32, #tpu.memory_space<vmem>>, vector<1x32xf32>
    %13 = vector.shape_cast %12 : vector<1x32xf32> to vector<32xf32>
    %14 = vector.shape_cast %13 : vector<32xf32> to vector<1x1x32xf32>
    %15 = vector.broadcast %11 : vector<6x8x1xf32> to vector<6x8x32xf32>
    %16 = vector.broadcast %14 : vector<1x1x32xf32> to vector<6x8x32xf32>
    %17 = arith.mulf %15, %16 : vector<6x8x32xf32>
    %18 = arith.addf %10, %17 : vector<6x8x32xf32>
    %19 = vector.extract_strided_slice %1 {offsets = [2, 0, 0], sizes = [6, 8, 1], strides = [1, 1, 1]} : vector<16x8x1xf32> to vector<6x8x1xf32>
    %c2 = arith.constant 2 : index
    %c0_6 = arith.constant 0 : index
    %20 = vector.load %arg2[%c2, %c0_6] : memref<11x32xf32, #tpu.memory_space<vmem>>, vector<1x32xf32>
    %21 = vector.shape_cast %20 : vector<1x32xf32> to vector<32xf32>
    %22 = vector.shape_cast %21 : vector<32xf32> to vector<1x1x32xf32>
    %23 = vector.broadcast %19 : vector<6x8x1xf32> to vector<6x8x32xf32>
    %24 = vector.broadcast %22 : vector<1x1x32xf32> to vector<6x8x32xf32>
    %25 = arith.mulf %23, %24 : vector<6x8x32xf32>
    %26 = arith.addf %18, %25 : vector<6x8x32xf32>
    %27 = vector.extract_strided_slice %1 {offsets = [3, 0, 0], sizes = [6, 8, 1], strides = [1, 1, 1]} : vector<16x8x1xf32> to vector<6x8x1xf32>
    %c3 = arith.constant 3 : index
    %c0_7 = arith.constant 0 : index
    %28 = vector.load %arg2[%c3, %c0_7] : memref<11x32xf32, #tpu.memory_space<vmem>>, vector<1x32xf32>
    %29 = vector.shape_cast %28 : vector<1x32xf32> to vector<32xf32>
    %30 = vector.shape_cast %29 : vector<32xf32> to vector<1x1x32xf32>
    %31 = vector.broadcast %27 : vector<6x8x1xf32> to vector<6x8x32xf32>
    %32 = vector.broadcast %30 : vector<1x1x32xf32> to vector<6x8x32xf32>
    %33 = arith.mulf %31, %32 : vector<6x8x32xf32>
    %34 = arith.addf %26, %33 : vector<6x8x32xf32>
    %35 = vector.extract_strided_slice %1 {offsets = [4, 0, 0], sizes = [6, 8, 1], strides = [1, 1, 1]} : vector<16x8x1xf32> to vector<6x8x1xf32>
    %c4 = arith.constant 4 : index
    %c0_8 = arith.constant 0 : index
    %36 = vector.load %arg2[%c4, %c0_8] : memref<11x32xf32, #tpu.memory_space<vmem>>, vector<1x32xf32>
    %37 = vector.shape_cast %36 : vector<1x32xf32> to vector<32xf32>
    %38 = vector.shape_cast %37 : vector<32xf32> to vector<1x1x32xf32>
    %39 = vector.broadcast %35 : vector<6x8x1xf32> to vector<6x8x32xf32>
    %40 = vector.broadcast %38 : vector<1x1x32xf32> to vector<6x8x32xf32>
    %41 = arith.mulf %39, %40 : vector<6x8x32xf32>
    %42 = arith.addf %34, %41 : vector<6x8x32xf32>
    %43 = vector.extract_strided_slice %1 {offsets = [5, 0, 0], sizes = [6, 8, 1], strides = [1, 1, 1]} : vector<16x8x1xf32> to vector<6x8x1xf32>
    %c5 = arith.constant 5 : index
    %c0_9 = arith.constant 0 : index
    %44 = vector.load %arg2[%c5, %c0_9] : memref<11x32xf32, #tpu.memory_space<vmem>>, vector<1x32xf32>
    %45 = vector.shape_cast %44 : vector<1x32xf32> to vector<32xf32>
    %46 = vector.shape_cast %45 : vector<32xf32> to vector<1x1x32xf32>
    %47 = vector.broadcast %43 : vector<6x8x1xf32> to vector<6x8x32xf32>
    %48 = vector.broadcast %46 : vector<1x1x32xf32> to vector<6x8x32xf32>
    %49 = arith.mulf %47, %48 : vector<6x8x32xf32>
    %50 = arith.addf %42, %49 : vector<6x8x32xf32>
    %51 = vector.extract_strided_slice %1 {offsets = [6, 0, 0], sizes = [6, 8, 1], strides = [1, 1, 1]} : vector<16x8x1xf32> to vector<6x8x1xf32>
    %c6 = arith.constant 6 : index
    %c0_10 = arith.constant 0 : index
    %52 = vector.load %arg2[%c6, %c0_10] : memref<11x32xf32, #tpu.memory_space<vmem>>, vector<1x32xf32>
    %53 = vector.shape_cast %52 : vector<1x32xf32> to vector<32xf32>
    %54 = vector.shape_cast %53 : vector<32xf32> to vector<1x1x32xf32>
    %55 = vector.broadcast %51 : vector<6x8x1xf32> to vector<6x8x32xf32>
    %56 = vector.broadcast %54 : vector<1x1x32xf32> to vector<6x8x32xf32>
    %57 = arith.mulf %55, %56 : vector<6x8x32xf32>
    %58 = arith.addf %50, %57 : vector<6x8x32xf32>
    %59 = vector.extract_strided_slice %1 {offsets = [7, 0, 0], sizes = [6, 8, 1], strides = [1, 1, 1]} : vector<16x8x1xf32> to vector<6x8x1xf32>
    %c7 = arith.constant 7 : index
    %c0_11 = arith.constant 0 : index
    %60 = vector.load %arg2[%c7, %c0_11] : memref<11x32xf32, #tpu.memory_space<vmem>>, vector<1x32xf32>
    %61 = vector.shape_cast %60 : vector<1x32xf32> to vector<32xf32>
    %62 = vector.shape_cast %61 : vector<32xf32> to vector<1x1x32xf32>
    %63 = vector.broadcast %59 : vector<6x8x1xf32> to vector<6x8x32xf32>
    %64 = vector.broadcast %62 : vector<1x1x32xf32> to vector<6x8x32xf32>
    %65 = arith.mulf %63, %64 : vector<6x8x32xf32>
    %66 = arith.addf %58, %65 : vector<6x8x32xf32>
    %67 = vector.extract_strided_slice %1 {offsets = [8, 0, 0], sizes = [6, 8, 1], strides = [1, 1, 1]} : vector<16x8x1xf32> to vector<6x8x1xf32>
    %c8 = arith.constant 8 : index
    %c0_12 = arith.constant 0 : index
    %68 = vector.load %arg2[%c8, %c0_12] : memref<11x32xf32, #tpu.memory_space<vmem>>, vector<1x32xf32>
    %69 = vector.shape_cast %68 : vector<1x32xf32> to vector<32xf32>
    %70 = vector.shape_cast %69 : vector<32xf32> to vector<1x1x32xf32>
    %71 = vector.broadcast %67 : vector<6x8x1xf32> to vector<6x8x32xf32>
    %72 = vector.broadcast %70 : vector<1x1x32xf32> to vector<6x8x32xf32>
    %73 = arith.mulf %71, %72 : vector<6x8x32xf32>
    %74 = arith.addf %66, %73 : vector<6x8x32xf32>
    %75 = vector.extract_strided_slice %1 {offsets = [9, 0, 0], sizes = [6, 8, 1], strides = [1, 1, 1]} : vector<16x8x1xf32> to vector<6x8x1xf32>
    %c9 = arith.constant 9 : index
    %c0_13 = arith.constant 0 : index
    %76 = vector.load %arg2[%c9, %c0_13] : memref<11x32xf32, #tpu.memory_space<vmem>>, vector<1x32xf32>
    %77 = vector.shape_cast %76 : vector<1x32xf32> to vector<32xf32>
    %78 = vector.shape_cast %77 : vector<32xf32> to vector<1x1x32xf32>
    %79 = vector.broadcast %75 : vector<6x8x1xf32> to vector<6x8x32xf32>
    %80 = vector.broadcast %78 : vector<1x1x32xf32> to vector<6x8x32xf32>
    %81 = arith.mulf %79, %80 : vector<6x8x32xf32>
    %82 = arith.addf %74, %81 : vector<6x8x32xf32>
    %83 = vector.extract_strided_slice %1 {offsets = [10, 0, 0], sizes = [6, 8, 1], strides = [1, 1, 1]} : vector<16x8x1xf32> to vector<6x8x1xf32>
    %c10 = arith.constant 10 : index
    %c0_14 = arith.constant 0 : index
    %84 = vector.load %arg2[%c10, %c0_14] : memref<11x32xf32, #tpu.memory_space<vmem>>, vector<1x32xf32>
    %85 = vector.shape_cast %84 : vector<1x32xf32> to vector<32xf32>
    %86 = vector.shape_cast %85 : vector<32xf32> to vector<1x1x32xf32>
    %87 = vector.broadcast %83 : vector<6x8x1xf32> to vector<6x8x32xf32>
    %88 = vector.broadcast %86 : vector<1x1x32xf32> to vector<6x8x32xf32>
    %89 = arith.mulf %87, %88 : vector<6x8x32xf32>
    %90 = arith.addf %82, %89 : vector<6x8x32xf32>
    %c0_15 = arith.constant 0 : index
    %c0_16 = arith.constant 0 : index
    %91 = vector.load %arg3[%c0_15, %c0_16] : memref<1x32xf32, #tpu.memory_space<vmem>>, vector<1x32xf32>
    %92 = vector.shape_cast %91 : vector<1x32xf32> to vector<1x1x32xf32>
    %93 = vector.broadcast %92 : vector<1x1x32xf32> to vector<6x8x32xf32>
    %94 = arith.addf %90, %93 : vector<6x8x32xf32>
    %95 = math.tanh %94 : vector<6x8x32xf32>
    %cst_17 = arith.constant 0.000000e+00 : f32
    %96 = vector.broadcast %cst_17 : f32 to vector<10x8x32xf32>
    %97 = tpu.concatenate %96, %95 in 0 : vector<10x8x32xf32>, vector<6x8x32xf32> -> vector<16x8x32xf32>
    %cst_18 = arith.constant 0.000000e+00 : f32
    %98 = vector.broadcast %cst_18 : f32 to vector<48x32xf32>
    %99 = vector.extract_strided_slice %97 {offsets = [0, 0, 0], sizes = [6, 8, 32], strides = [1, 1, 1]} : vector<16x8x32xf32> to vector<6x8x32xf32>
    %100 = vector.shape_cast %99 : vector<6x8x32xf32> to vector<48x32xf32>
    %c0_19 = arith.constant 0 : index
    %c0_20 = arith.constant 0 : index
    %c0_21 = arith.constant 0 : index
    %101 = vector.load %arg4[%c0_19, %c0_20, %c0_21] : memref<11x32x32xf32, #tpu.memory_space<vmem>>, vector<1x32x32xf32>
    %102 = vector.shape_cast %101 : vector<1x32x32xf32> to vector<32x32xf32>
    %cst_22 = arith.constant dense<0.000000e+00> : vector<48x32xf32>
    %103 = tpu.matmul %100, %102, %cst_22 {dimension_numbers = #tpu.dot_dimension_numbers<[1], [0], [0], [1], [0, 0, 1, 1], [], []>} : vector<48x32xf32>, vector<32x32xf32>, vector<48x32xf32> -> vector<48x32xf32>
    %104 = arith.addf %98, %103 : vector<48x32xf32>
    %105 = vector.extract_strided_slice %97 {offsets = [1, 0, 0], sizes = [6, 8, 32], strides = [1, 1, 1]} : vector<16x8x32xf32> to vector<6x8x32xf32>
    %106 = vector.shape_cast %105 : vector<6x8x32xf32> to vector<48x32xf32>
    %c1_23 = arith.constant 1 : index
    %c0_24 = arith.constant 0 : index
    %c0_25 = arith.constant 0 : index
    %107 = vector.load %arg4[%c1_23, %c0_24, %c0_25] : memref<11x32x32xf32, #tpu.memory_space<vmem>>, vector<1x32x32xf32>
    %108 = vector.shape_cast %107 : vector<1x32x32xf32> to vector<32x32xf32>
    %cst_26 = arith.constant dense<0.000000e+00> : vector<48x32xf32>
    %109 = tpu.matmul %106, %108, %cst_26 {dimension_numbers = #tpu.dot_dimension_numbers<[1], [0], [0], [1], [0, 0, 1, 1], [], []>} : vector<48x32xf32>, vector<32x32xf32>, vector<48x32xf32> -> vector<48x32xf32>
    %110 = arith.addf %104, %109 : vector<48x32xf32>
    %111 = vector.extract_strided_slice %97 {offsets = [2, 0, 0], sizes = [6, 8, 32], strides = [1, 1, 1]} : vector<16x8x32xf32> to vector<6x8x32xf32>
    %112 = vector.shape_cast %111 : vector<6x8x32xf32> to vector<48x32xf32>
    %c2_27 = arith.constant 2 : index
    %c0_28 = arith.constant 0 : index
    %c0_29 = arith.constant 0 : index
    %113 = vector.load %arg4[%c2_27, %c0_28, %c0_29] : memref<11x32x32xf32, #tpu.memory_space<vmem>>, vector<1x32x32xf32>
    %114 = vector.shape_cast %113 : vector<1x32x32xf32> to vector<32x32xf32>
    %cst_30 = arith.constant dense<0.000000e+00> : vector<48x32xf32>
    %115 = tpu.matmul %112, %114, %cst_30 {dimension_numbers = #tpu.dot_dimension_numbers<[1], [0], [0], [1], [0, 0, 1, 1], [], []>} : vector<48x32xf32>, vector<32x32xf32>, vector<48x32xf32> -> vector<48x32xf32>
    %116 = arith.addf %110, %115 : vector<48x32xf32>
    %117 = vector.extract_strided_slice %97 {offsets = [3, 0, 0], sizes = [6, 8, 32], strides = [1, 1, 1]} : vector<16x8x32xf32> to vector<6x8x32xf32>
    %118 = vector.shape_cast %117 : vector<6x8x32xf32> to vector<48x32xf32>
    %c3_31 = arith.constant 3 : index
    %c0_32 = arith.constant 0 : index
    %c0_33 = arith.constant 0 : index
    %119 = vector.load %arg4[%c3_31, %c0_32, %c0_33] : memref<11x32x32xf32, #tpu.memory_space<vmem>>, vector<1x32x32xf32>
    %120 = vector.shape_cast %119 : vector<1x32x32xf32> to vector<32x32xf32>
    %cst_34 = arith.constant dense<0.000000e+00> : vector<48x32xf32>
    %121 = tpu.matmul %118, %120, %cst_34 {dimension_numbers = #tpu.dot_dimension_numbers<[1], [0], [0], [1], [0, 0, 1, 1], [], []>} : vector<48x32xf32>, vector<32x32xf32>, vector<48x32xf32> -> vector<48x32xf32>
    %122 = arith.addf %116, %121 : vector<48x32xf32>
    %123 = vector.extract_strided_slice %97 {offsets = [4, 0, 0], sizes = [6, 8, 32], strides = [1, 1, 1]} : vector<16x8x32xf32> to vector<6x8x32xf32>
    %124 = vector.shape_cast %123 : vector<6x8x32xf32> to vector<48x32xf32>
    %c4_35 = arith.constant 4 : index
    %c0_36 = arith.constant 0 : index
    %c0_37 = arith.constant 0 : index
    %125 = vector.load %arg4[%c4_35, %c0_36, %c0_37] : memref<11x32x32xf32, #tpu.memory_space<vmem>>, vector<1x32x32xf32>
    %126 = vector.shape_cast %125 : vector<1x32x32xf32> to vector<32x32xf32>
    %cst_38 = arith.constant dense<0.000000e+00> : vector<48x32xf32>
    %127 = tpu.matmul %124, %126, %cst_38 {dimension_numbers = #tpu.dot_dimension_numbers<[1], [0], [0], [1], [0, 0, 1, 1], [], []>} : vector<48x32xf32>, vector<32x32xf32>, vector<48x32xf32> -> vector<48x32xf32>
    %128 = arith.addf %122, %127 : vector<48x32xf32>
    %129 = vector.extract_strided_slice %97 {offsets = [5, 0, 0], sizes = [6, 8, 32], strides = [1, 1, 1]} : vector<16x8x32xf32> to vector<6x8x32xf32>
    %130 = vector.shape_cast %129 : vector<6x8x32xf32> to vector<48x32xf32>
    %c5_39 = arith.constant 5 : index
    %c0_40 = arith.constant 0 : index
    %c0_41 = arith.constant 0 : index
    %131 = vector.load %arg4[%c5_39, %c0_40, %c0_41] : memref<11x32x32xf32, #tpu.memory_space<vmem>>, vector<1x32x32xf32>
    %132 = vector.shape_cast %131 : vector<1x32x32xf32> to vector<32x32xf32>
    %cst_42 = arith.constant dense<0.000000e+00> : vector<48x32xf32>
    %133 = tpu.matmul %130, %132, %cst_42 {dimension_numbers = #tpu.dot_dimension_numbers<[1], [0], [0], [1], [0, 0, 1, 1], [], []>} : vector<48x32xf32>, vector<32x32xf32>, vector<48x32xf32> -> vector<48x32xf32>
    %134 = arith.addf %128, %133 : vector<48x32xf32>
    %135 = vector.extract_strided_slice %97 {offsets = [6, 0, 0], sizes = [6, 8, 32], strides = [1, 1, 1]} : vector<16x8x32xf32> to vector<6x8x32xf32>
    %136 = vector.shape_cast %135 : vector<6x8x32xf32> to vector<48x32xf32>
    %c6_43 = arith.constant 6 : index
    %c0_44 = arith.constant 0 : index
    %c0_45 = arith.constant 0 : index
    %137 = vector.load %arg4[%c6_43, %c0_44, %c0_45] : memref<11x32x32xf32, #tpu.memory_space<vmem>>, vector<1x32x32xf32>
    %138 = vector.shape_cast %137 : vector<1x32x32xf32> to vector<32x32xf32>
    %cst_46 = arith.constant dense<0.000000e+00> : vector<48x32xf32>
    %139 = tpu.matmul %136, %138, %cst_46 {dimension_numbers = #tpu.dot_dimension_numbers<[1], [0], [0], [1], [0, 0, 1, 1], [], []>} : vector<48x32xf32>, vector<32x32xf32>, vector<48x32xf32> -> vector<48x32xf32>
    %140 = arith.addf %134, %139 : vector<48x32xf32>
    %141 = vector.extract_strided_slice %97 {offsets = [7, 0, 0], sizes = [6, 8, 32], strides = [1, 1, 1]} : vector<16x8x32xf32> to vector<6x8x32xf32>
    %142 = vector.shape_cast %141 : vector<6x8x32xf32> to vector<48x32xf32>
    %c7_47 = arith.constant 7 : index
    %c0_48 = arith.constant 0 : index
    %c0_49 = arith.constant 0 : index
    %143 = vector.load %arg4[%c7_47, %c0_48, %c0_49] : memref<11x32x32xf32, #tpu.memory_space<vmem>>, vector<1x32x32xf32>
    %144 = vector.shape_cast %143 : vector<1x32x32xf32> to vector<32x32xf32>
    %cst_50 = arith.constant dense<0.000000e+00> : vector<48x32xf32>
    %145 = tpu.matmul %142, %144, %cst_50 {dimension_numbers = #tpu.dot_dimension_numbers<[1], [0], [0], [1], [0, 0, 1, 1], [], []>} : vector<48x32xf32>, vector<32x32xf32>, vector<48x32xf32> -> vector<48x32xf32>
    %146 = arith.addf %140, %145 : vector<48x32xf32>
    %147 = vector.extract_strided_slice %97 {offsets = [8, 0, 0], sizes = [6, 8, 32], strides = [1, 1, 1]} : vector<16x8x32xf32> to vector<6x8x32xf32>
    %148 = vector.shape_cast %147 : vector<6x8x32xf32> to vector<48x32xf32>
    %c8_51 = arith.constant 8 : index
    %c0_52 = arith.constant 0 : index
    %c0_53 = arith.constant 0 : index
    %149 = vector.load %arg4[%c8_51, %c0_52, %c0_53] : memref<11x32x32xf32, #tpu.memory_space<vmem>>, vector<1x32x32xf32>
    %150 = vector.shape_cast %149 : vector<1x32x32xf32> to vector<32x32xf32>
    %cst_54 = arith.constant dense<0.000000e+00> : vector<48x32xf32>
    %151 = tpu.matmul %148, %150, %cst_54 {dimension_numbers = #tpu.dot_dimension_numbers<[1], [0], [0], [1], [0, 0, 1, 1], [], []>} : vector<48x32xf32>, vector<32x32xf32>, vector<48x32xf32> -> vector<48x32xf32>
    %152 = arith.addf %146, %151 : vector<48x32xf32>
    %153 = vector.extract_strided_slice %97 {offsets = [9, 0, 0], sizes = [6, 8, 32], strides = [1, 1, 1]} : vector<16x8x32xf32> to vector<6x8x32xf32>
    %154 = vector.shape_cast %153 : vector<6x8x32xf32> to vector<48x32xf32>
    %c9_55 = arith.constant 9 : index
    %c0_56 = arith.constant 0 : index
    %c0_57 = arith.constant 0 : index
    %155 = vector.load %arg4[%c9_55, %c0_56, %c0_57] : memref<11x32x32xf32, #tpu.memory_space<vmem>>, vector<1x32x32xf32>
    %156 = vector.shape_cast %155 : vector<1x32x32xf32> to vector<32x32xf32>
    %cst_58 = arith.constant dense<0.000000e+00> : vector<48x32xf32>
    %157 = tpu.matmul %154, %156, %cst_58 {dimension_numbers = #tpu.dot_dimension_numbers<[1], [0], [0], [1], [0, 0, 1, 1], [], []>} : vector<48x32xf32>, vector<32x32xf32>, vector<48x32xf32> -> vector<48x32xf32>
    %158 = arith.addf %152, %157 : vector<48x32xf32>
    %159 = vector.extract_strided_slice %97 {offsets = [10, 0, 0], sizes = [6, 8, 32], strides = [1, 1, 1]} : vector<16x8x32xf32> to vector<6x8x32xf32>
    %160 = vector.shape_cast %159 : vector<6x8x32xf32> to vector<48x32xf32>
    %c10_59 = arith.constant 10 : index
    %c0_60 = arith.constant 0 : index
    %c0_61 = arith.constant 0 : index
    %161 = vector.load %arg4[%c10_59, %c0_60, %c0_61] : memref<11x32x32xf32, #tpu.memory_space<vmem>>, vector<1x32x32xf32>
    %162 = vector.shape_cast %161 : vector<1x32x32xf32> to vector<32x32xf32>
    %cst_62 = arith.constant dense<0.000000e+00> : vector<48x32xf32>
    %163 = tpu.matmul %160, %162, %cst_62 {dimension_numbers = #tpu.dot_dimension_numbers<[1], [0], [0], [1], [0, 0, 1, 1], [], []>} : vector<48x32xf32>, vector<32x32xf32>, vector<48x32xf32> -> vector<48x32xf32>
    %164 = arith.addf %158, %163 : vector<48x32xf32>
    %c0_63 = arith.constant 0 : index
    %c0_64 = arith.constant 0 : index
    %165 = vector.load %arg5[%c0_63, %c0_64] : memref<1x32xf32, #tpu.memory_space<vmem>>, vector<1x32xf32>
    %166 = vector.broadcast %165 : vector<1x32xf32> to vector<48x32xf32>
    %167 = arith.addf %164, %166 : vector<48x32xf32>
    %168 = math.tanh %167 : vector<48x32xf32>
    %169 = vector.shape_cast %168 : vector<48x32xf32> to vector<6x8x32xf32>
    %cst_65 = arith.constant 0.000000e+00 : f32
    %170 = vector.broadcast %cst_65 : f32 to vector<10x8x32xf32>
    %171 = tpu.concatenate %170, %169 in 0 : vector<10x8x32xf32>, vector<6x8x32xf32> -> vector<16x8x32xf32>
    %cst_66 = arith.constant 0.000000e+00 : f32
    %172 = vector.broadcast %cst_66 : f32 to vector<48x32xf32>
    %173 = vector.extract_strided_slice %171 {offsets = [0, 0, 0], sizes = [6, 8, 32], strides = [1, 1, 1]} : vector<16x8x32xf32> to vector<6x8x32xf32>
    %174 = vector.shape_cast %173 : vector<6x8x32xf32> to vector<48x32xf32>
    %c0_67 = arith.constant 0 : index
    %c0_68 = arith.constant 0 : index
    %c0_69 = arith.constant 0 : index
    %175 = vector.load %arg6[%c0_67, %c0_68, %c0_69] : memref<11x32x32xf32, #tpu.memory_space<vmem>>, vector<1x32x32xf32>
    %176 = vector.shape_cast %175 : vector<1x32x32xf32> to vector<32x32xf32>
    %cst_70 = arith.constant dense<0.000000e+00> : vector<48x32xf32>
    %177 = tpu.matmul %174, %176, %cst_70 {dimension_numbers = #tpu.dot_dimension_numbers<[1], [0], [0], [1], [0, 0, 1, 1], [], []>} : vector<48x32xf32>, vector<32x32xf32>, vector<48x32xf32> -> vector<48x32xf32>
    %178 = arith.addf %172, %177 : vector<48x32xf32>
    %179 = vector.extract_strided_slice %171 {offsets = [1, 0, 0], sizes = [6, 8, 32], strides = [1, 1, 1]} : vector<16x8x32xf32> to vector<6x8x32xf32>
    %180 = vector.shape_cast %179 : vector<6x8x32xf32> to vector<48x32xf32>
    %c1_71 = arith.constant 1 : index
    %c0_72 = arith.constant 0 : index
    %c0_73 = arith.constant 0 : index
    %181 = vector.load %arg6[%c1_71, %c0_72, %c0_73] : memref<11x32x32xf32, #tpu.memory_space<vmem>>, vector<1x32x32xf32>
    %182 = vector.shape_cast %181 : vector<1x32x32xf32> to vector<32x32xf32>
    %cst_74 = arith.constant dense<0.000000e+00> : vector<48x32xf32>
    %183 = tpu.matmul %180, %182, %cst_74 {dimension_numbers = #tpu.dot_dimension_numbers<[1], [0], [0], [1], [0, 0, 1, 1], [], []>} : vector<48x32xf32>, vector<32x32xf32>, vector<48x32xf32> -> vector<48x32xf32>
    %184 = arith.addf %178, %183 : vector<48x32xf32>
    %185 = vector.extract_strided_slice %171 {offsets = [2, 0, 0], sizes = [6, 8, 32], strides = [1, 1, 1]} : vector<16x8x32xf32> to vector<6x8x32xf32>
    %186 = vector.shape_cast %185 : vector<6x8x32xf32> to vector<48x32xf32>
    %c2_75 = arith.constant 2 : index
    %c0_76 = arith.constant 0 : index
    %c0_77 = arith.constant 0 : index
    %187 = vector.load %arg6[%c2_75, %c0_76, %c0_77] : memref<11x32x32xf32, #tpu.memory_space<vmem>>, vector<1x32x32xf32>
    %188 = vector.shape_cast %187 : vector<1x32x32xf32> to vector<32x32xf32>
    %cst_78 = arith.constant dense<0.000000e+00> : vector<48x32xf32>
    %189 = tpu.matmul %186, %188, %cst_78 {dimension_numbers = #tpu.dot_dimension_numbers<[1], [0], [0], [1], [0, 0, 1, 1], [], []>} : vector<48x32xf32>, vector<32x32xf32>, vector<48x32xf32> -> vector<48x32xf32>
    %190 = arith.addf %184, %189 : vector<48x32xf32>
    %191 = vector.extract_strided_slice %171 {offsets = [3, 0, 0], sizes = [6, 8, 32], strides = [1, 1, 1]} : vector<16x8x32xf32> to vector<6x8x32xf32>
    %192 = vector.shape_cast %191 : vector<6x8x32xf32> to vector<48x32xf32>
    %c3_79 = arith.constant 3 : index
    %c0_80 = arith.constant 0 : index
    %c0_81 = arith.constant 0 : index
    %193 = vector.load %arg6[%c3_79, %c0_80, %c0_81] : memref<11x32x32xf32, #tpu.memory_space<vmem>>, vector<1x32x32xf32>
    %194 = vector.shape_cast %193 : vector<1x32x32xf32> to vector<32x32xf32>
    %cst_82 = arith.constant dense<0.000000e+00> : vector<48x32xf32>
    %195 = tpu.matmul %192, %194, %cst_82 {dimension_numbers = #tpu.dot_dimension_numbers<[1], [0], [0], [1], [0, 0, 1, 1], [], []>} : vector<48x32xf32>, vector<32x32xf32>, vector<48x32xf32> -> vector<48x32xf32>
    %196 = arith.addf %190, %195 : vector<48x32xf32>
    %197 = vector.extract_strided_slice %171 {offsets = [4, 0, 0], sizes = [6, 8, 32], strides = [1, 1, 1]} : vector<16x8x32xf32> to vector<6x8x32xf32>
    %198 = vector.shape_cast %197 : vector<6x8x32xf32> to vector<48x32xf32>
    %c4_83 = arith.constant 4 : index
    %c0_84 = arith.constant 0 : index
    %c0_85 = arith.constant 0 : index
    %199 = vector.load %arg6[%c4_83, %c0_84, %c0_85] : memref<11x32x32xf32, #tpu.memory_space<vmem>>, vector<1x32x32xf32>
    %200 = vector.shape_cast %199 : vector<1x32x32xf32> to vector<32x32xf32>
    %cst_86 = arith.constant dense<0.000000e+00> : vector<48x32xf32>
    %201 = tpu.matmul %198, %200, %cst_86 {dimension_numbers = #tpu.dot_dimension_numbers<[1], [0], [0], [1], [0, 0, 1, 1], [], []>} : vector<48x32xf32>, vector<32x32xf32>, vector<48x32xf32> -> vector<48x32xf32>
    %202 = arith.addf %196, %201 : vector<48x32xf32>
    %203 = vector.extract_strided_slice %171 {offsets = [5, 0, 0], sizes = [6, 8, 32], strides = [1, 1, 1]} : vector<16x8x32xf32> to vector<6x8x32xf32>
    %204 = vector.shape_cast %203 : vector<6x8x32xf32> to vector<48x32xf32>
    %c5_87 = arith.constant 5 : index
    %c0_88 = arith.constant 0 : index
    %c0_89 = arith.constant 0 : index
    %205 = vector.load %arg6[%c5_87, %c0_88, %c0_89] : memref<11x32x32xf32, #tpu.memory_space<vmem>>, vector<1x32x32xf32>
    %206 = vector.shape_cast %205 : vector<1x32x32xf32> to vector<32x32xf32>
    %cst_90 = arith.constant dense<0.000000e+00> : vector<48x32xf32>
    %207 = tpu.matmul %204, %206, %cst_90 {dimension_numbers = #tpu.dot_dimension_numbers<[1], [0], [0], [1], [0, 0, 1, 1], [], []>} : vector<48x32xf32>, vector<32x32xf32>, vector<48x32xf32> -> vector<48x32xf32>
    %208 = arith.addf %202, %207 : vector<48x32xf32>
    %209 = vector.extract_strided_slice %171 {offsets = [6, 0, 0], sizes = [6, 8, 32], strides = [1, 1, 1]} : vector<16x8x32xf32> to vector<6x8x32xf32>
    %210 = vector.shape_cast %209 : vector<6x8x32xf32> to vector<48x32xf32>
    %c6_91 = arith.constant 6 : index
    %c0_92 = arith.constant 0 : index
    %c0_93 = arith.constant 0 : index
    %211 = vector.load %arg6[%c6_91, %c0_92, %c0_93] : memref<11x32x32xf32, #tpu.memory_space<vmem>>, vector<1x32x32xf32>
    %212 = vector.shape_cast %211 : vector<1x32x32xf32> to vector<32x32xf32>
    %cst_94 = arith.constant dense<0.000000e+00> : vector<48x32xf32>
    %213 = tpu.matmul %210, %212, %cst_94 {dimension_numbers = #tpu.dot_dimension_numbers<[1], [0], [0], [1], [0, 0, 1, 1], [], []>} : vector<48x32xf32>, vector<32x32xf32>, vector<48x32xf32> -> vector<48x32xf32>
    %214 = arith.addf %208, %213 : vector<48x32xf32>
    %215 = vector.extract_strided_slice %171 {offsets = [7, 0, 0], sizes = [6, 8, 32], strides = [1, 1, 1]} : vector<16x8x32xf32> to vector<6x8x32xf32>
    %216 = vector.shape_cast %215 : vector<6x8x32xf32> to vector<48x32xf32>
    %c7_95 = arith.constant 7 : index
    %c0_96 = arith.constant 0 : index
    %c0_97 = arith.constant 0 : index
    %217 = vector.load %arg6[%c7_95, %c0_96, %c0_97] : memref<11x32x32xf32, #tpu.memory_space<vmem>>, vector<1x32x32xf32>
    %218 = vector.shape_cast %217 : vector<1x32x32xf32> to vector<32x32xf32>
    %cst_98 = arith.constant dense<0.000000e+00> : vector<48x32xf32>
    %219 = tpu.matmul %216, %218, %cst_98 {dimension_numbers = #tpu.dot_dimension_numbers<[1], [0], [0], [1], [0, 0, 1, 1], [], []>} : vector<48x32xf32>, vector<32x32xf32>, vector<48x32xf32> -> vector<48x32xf32>
    %220 = arith.addf %214, %219 : vector<48x32xf32>
    %221 = vector.extract_strided_slice %171 {offsets = [8, 0, 0], sizes = [6, 8, 32], strides = [1, 1, 1]} : vector<16x8x32xf32> to vector<6x8x32xf32>
    %222 = vector.shape_cast %221 : vector<6x8x32xf32> to vector<48x32xf32>
    %c8_99 = arith.constant 8 : index
    %c0_100 = arith.constant 0 : index
    %c0_101 = arith.constant 0 : index
    %223 = vector.load %arg6[%c8_99, %c0_100, %c0_101] : memref<11x32x32xf32, #tpu.memory_space<vmem>>, vector<1x32x32xf32>
    %224 = vector.shape_cast %223 : vector<1x32x32xf32> to vector<32x32xf32>
    %cst_102 = arith.constant dense<0.000000e+00> : vector<48x32xf32>
    %225 = tpu.matmul %222, %224, %cst_102 {dimension_numbers = #tpu.dot_dimension_numbers<[1], [0], [0], [1], [0, 0, 1, 1], [], []>} : vector<48x32xf32>, vector<32x32xf32>, vector<48x32xf32> -> vector<48x32xf32>
    %226 = arith.addf %220, %225 : vector<48x32xf32>
    %227 = vector.extract_strided_slice %171 {offsets = [9, 0, 0], sizes = [6, 8, 32], strides = [1, 1, 1]} : vector<16x8x32xf32> to vector<6x8x32xf32>
    %228 = vector.shape_cast %227 : vector<6x8x32xf32> to vector<48x32xf32>
    %c9_103 = arith.constant 9 : index
    %c0_104 = arith.constant 0 : index
    %c0_105 = arith.constant 0 : index
    %229 = vector.load %arg6[%c9_103, %c0_104, %c0_105] : memref<11x32x32xf32, #tpu.memory_space<vmem>>, vector<1x32x32xf32>
    %230 = vector.shape_cast %229 : vector<1x32x32xf32> to vector<32x32xf32>
    %cst_106 = arith.constant dense<0.000000e+00> : vector<48x32xf32>
    %231 = tpu.matmul %228, %230, %cst_106 {dimension_numbers = #tpu.dot_dimension_numbers<[1], [0], [0], [1], [0, 0, 1, 1], [], []>} : vector<48x32xf32>, vector<32x32xf32>, vector<48x32xf32> -> vector<48x32xf32>
    %232 = arith.addf %226, %231 : vector<48x32xf32>
    %233 = vector.extract_strided_slice %171 {offsets = [10, 0, 0], sizes = [6, 8, 32], strides = [1, 1, 1]} : vector<16x8x32xf32> to vector<6x8x32xf32>
    %234 = vector.shape_cast %233 : vector<6x8x32xf32> to vector<48x32xf32>
    %c10_107 = arith.constant 10 : index
    %c0_108 = arith.constant 0 : index
    %c0_109 = arith.constant 0 : index
    %235 = vector.load %arg6[%c10_107, %c0_108, %c0_109] : memref<11x32x32xf32, #tpu.memory_space<vmem>>, vector<1x32x32xf32>
    %236 = vector.shape_cast %235 : vector<1x32x32xf32> to vector<32x32xf32>
    %cst_110 = arith.constant dense<0.000000e+00> : vector<48x32xf32>
    %237 = tpu.matmul %234, %236, %cst_110 {dimension_numbers = #tpu.dot_dimension_numbers<[1], [0], [0], [1], [0, 0, 1, 1], [], []>} : vector<48x32xf32>, vector<32x32xf32>, vector<48x32xf32> -> vector<48x32xf32>
    %238 = arith.addf %232, %237 : vector<48x32xf32>
    %c0_111 = arith.constant 0 : index
    %c0_112 = arith.constant 0 : index
    %239 = vector.load %arg7[%c0_111, %c0_112] : memref<1x32xf32, #tpu.memory_space<vmem>>, vector<1x32xf32>
    %240 = vector.broadcast %239 : vector<1x32xf32> to vector<48x32xf32>
    %241 = arith.addf %238, %240 : vector<48x32xf32>
    %242 = math.tanh %241 : vector<48x32xf32>
    %243 = vector.shape_cast %242 : vector<48x32xf32> to vector<6x8x32xf32>
    %cst_113 = arith.constant 0.000000e+00 : f32
    %244 = vector.broadcast %cst_113 : f32 to vector<10x8x32xf32>
    %245 = tpu.concatenate %244, %243 in 0 : vector<10x8x32xf32>, vector<6x8x32xf32> -> vector<16x8x32xf32>
    %cst_114 = arith.constant 0.000000e+00 : f32
    %246 = vector.broadcast %cst_114 : f32 to vector<48x32xf32>
    %247 = vector.extract_strided_slice %245 {offsets = [0, 0, 0], sizes = [6, 8, 32], strides = [1, 1, 1]} : vector<16x8x32xf32> to vector<6x8x32xf32>
    %248 = vector.shape_cast %247 : vector<6x8x32xf32> to vector<48x32xf32>
    %c0_115 = arith.constant 0 : index
    %c0_116 = arith.constant 0 : index
    %c0_117 = arith.constant 0 : index
    %249 = vector.load %arg8[%c0_115, %c0_116, %c0_117] : memref<11x32x32xf32, #tpu.memory_space<vmem>>, vector<1x32x32xf32>
    %250 = vector.shape_cast %249 : vector<1x32x32xf32> to vector<32x32xf32>
    %cst_118 = arith.constant dense<0.000000e+00> : vector<48x32xf32>
    %251 = tpu.matmul %248, %250, %cst_118 {dimension_numbers = #tpu.dot_dimension_numbers<[1], [0], [0], [1], [0, 0, 1, 1], [], []>} : vector<48x32xf32>, vector<32x32xf32>, vector<48x32xf32> -> vector<48x32xf32>
    %252 = arith.addf %246, %251 : vector<48x32xf32>
    %253 = vector.extract_strided_slice %245 {offsets = [1, 0, 0], sizes = [6, 8, 32], strides = [1, 1, 1]} : vector<16x8x32xf32> to vector<6x8x32xf32>
    %254 = vector.shape_cast %253 : vector<6x8x32xf32> to vector<48x32xf32>
    %c1_119 = arith.constant 1 : index
    %c0_120 = arith.constant 0 : index
    %c0_121 = arith.constant 0 : index
    %255 = vector.load %arg8[%c1_119, %c0_120, %c0_121] : memref<11x32x32xf32, #tpu.memory_space<vmem>>, vector<1x32x32xf32>
    %256 = vector.shape_cast %255 : vector<1x32x32xf32> to vector<32x32xf32>
    %cst_122 = arith.constant dense<0.000000e+00> : vector<48x32xf32>
    %257 = tpu.matmul %254, %256, %cst_122 {dimension_numbers = #tpu.dot_dimension_numbers<[1], [0], [0], [1], [0, 0, 1, 1], [], []>} : vector<48x32xf32>, vector<32x32xf32>, vector<48x32xf32> -> vector<48x32xf32>
    %258 = arith.addf %252, %257 : vector<48x32xf32>
    %259 = vector.extract_strided_slice %245 {offsets = [2, 0, 0], sizes = [6, 8, 32], strides = [1, 1, 1]} : vector<16x8x32xf32> to vector<6x8x32xf32>
    %260 = vector.shape_cast %259 : vector<6x8x32xf32> to vector<48x32xf32>
    %c2_123 = arith.constant 2 : index
    %c0_124 = arith.constant 0 : index
    %c0_125 = arith.constant 0 : index
    %261 = vector.load %arg8[%c2_123, %c0_124, %c0_125] : memref<11x32x32xf32, #tpu.memory_space<vmem>>, vector<1x32x32xf32>
    %262 = vector.shape_cast %261 : vector<1x32x32xf32> to vector<32x32xf32>
    %cst_126 = arith.constant dense<0.000000e+00> : vector<48x32xf32>
    %263 = tpu.matmul %260, %262, %cst_126 {dimension_numbers = #tpu.dot_dimension_numbers<[1], [0], [0], [1], [0, 0, 1, 1], [], []>} : vector<48x32xf32>, vector<32x32xf32>, vector<48x32xf32> -> vector<48x32xf32>
    %264 = arith.addf %258, %263 : vector<48x32xf32>
    %265 = vector.extract_strided_slice %245 {offsets = [3, 0, 0], sizes = [6, 8, 32], strides = [1, 1, 1]} : vector<16x8x32xf32> to vector<6x8x32xf32>
    %266 = vector.shape_cast %265 : vector<6x8x32xf32> to vector<48x32xf32>
    %c3_127 = arith.constant 3 : index
    %c0_128 = arith.constant 0 : index
    %c0_129 = arith.constant 0 : index
    %267 = vector.load %arg8[%c3_127, %c0_128, %c0_129] : memref<11x32x32xf32, #tpu.memory_space<vmem>>, vector<1x32x32xf32>
    %268 = vector.shape_cast %267 : vector<1x32x32xf32> to vector<32x32xf32>
    %cst_130 = arith.constant dense<0.000000e+00> : vector<48x32xf32>
    %269 = tpu.matmul %266, %268, %cst_130 {dimension_numbers = #tpu.dot_dimension_numbers<[1], [0], [0], [1], [0, 0, 1, 1], [], []>} : vector<48x32xf32>, vector<32x32xf32>, vector<48x32xf32> -> vector<48x32xf32>
    %270 = arith.addf %264, %269 : vector<48x32xf32>
    %271 = vector.extract_strided_slice %245 {offsets = [4, 0, 0], sizes = [6, 8, 32], strides = [1, 1, 1]} : vector<16x8x32xf32> to vector<6x8x32xf32>
    %272 = vector.shape_cast %271 : vector<6x8x32xf32> to vector<48x32xf32>
    %c4_131 = arith.constant 4 : index
    %c0_132 = arith.constant 0 : index
    %c0_133 = arith.constant 0 : index
    %273 = vector.load %arg8[%c4_131, %c0_132, %c0_133] : memref<11x32x32xf32, #tpu.memory_space<vmem>>, vector<1x32x32xf32>
    %274 = vector.shape_cast %273 : vector<1x32x32xf32> to vector<32x32xf32>
    %cst_134 = arith.constant dense<0.000000e+00> : vector<48x32xf32>
    %275 = tpu.matmul %272, %274, %cst_134 {dimension_numbers = #tpu.dot_dimension_numbers<[1], [0], [0], [1], [0, 0, 1, 1], [], []>} : vector<48x32xf32>, vector<32x32xf32>, vector<48x32xf32> -> vector<48x32xf32>
    %276 = arith.addf %270, %275 : vector<48x32xf32>
    %277 = vector.extract_strided_slice %245 {offsets = [5, 0, 0], sizes = [6, 8, 32], strides = [1, 1, 1]} : vector<16x8x32xf32> to vector<6x8x32xf32>
    %278 = vector.shape_cast %277 : vector<6x8x32xf32> to vector<48x32xf32>
    %c5_135 = arith.constant 5 : index
    %c0_136 = arith.constant 0 : index
    %c0_137 = arith.constant 0 : index
    %279 = vector.load %arg8[%c5_135, %c0_136, %c0_137] : memref<11x32x32xf32, #tpu.memory_space<vmem>>, vector<1x32x32xf32>
    %280 = vector.shape_cast %279 : vector<1x32x32xf32> to vector<32x32xf32>
    %cst_138 = arith.constant dense<0.000000e+00> : vector<48x32xf32>
    %281 = tpu.matmul %278, %280, %cst_138 {dimension_numbers = #tpu.dot_dimension_numbers<[1], [0], [0], [1], [0, 0, 1, 1], [], []>} : vector<48x32xf32>, vector<32x32xf32>, vector<48x32xf32> -> vector<48x32xf32>
    %282 = arith.addf %276, %281 : vector<48x32xf32>
    %283 = vector.extract_strided_slice %245 {offsets = [6, 0, 0], sizes = [6, 8, 32], strides = [1, 1, 1]} : vector<16x8x32xf32> to vector<6x8x32xf32>
    %284 = vector.shape_cast %283 : vector<6x8x32xf32> to vector<48x32xf32>
    %c6_139 = arith.constant 6 : index
    %c0_140 = arith.constant 0 : index
    %c0_141 = arith.constant 0 : index
    %285 = vector.load %arg8[%c6_139, %c0_140, %c0_141] : memref<11x32x32xf32, #tpu.memory_space<vmem>>, vector<1x32x32xf32>
    %286 = vector.shape_cast %285 : vector<1x32x32xf32> to vector<32x32xf32>
    %cst_142 = arith.constant dense<0.000000e+00> : vector<48x32xf32>
    %287 = tpu.matmul %284, %286, %cst_142 {dimension_numbers = #tpu.dot_dimension_numbers<[1], [0], [0], [1], [0, 0, 1, 1], [], []>} : vector<48x32xf32>, vector<32x32xf32>, vector<48x32xf32> -> vector<48x32xf32>
    %288 = arith.addf %282, %287 : vector<48x32xf32>
    %289 = vector.extract_strided_slice %245 {offsets = [7, 0, 0], sizes = [6, 8, 32], strides = [1, 1, 1]} : vector<16x8x32xf32> to vector<6x8x32xf32>
    %290 = vector.shape_cast %289 : vector<6x8x32xf32> to vector<48x32xf32>
    %c7_143 = arith.constant 7 : index
    %c0_144 = arith.constant 0 : index
    %c0_145 = arith.constant 0 : index
    %291 = vector.load %arg8[%c7_143, %c0_144, %c0_145] : memref<11x32x32xf32, #tpu.memory_space<vmem>>, vector<1x32x32xf32>
    %292 = vector.shape_cast %291 : vector<1x32x32xf32> to vector<32x32xf32>
    %cst_146 = arith.constant dense<0.000000e+00> : vector<48x32xf32>
    %293 = tpu.matmul %290, %292, %cst_146 {dimension_numbers = #tpu.dot_dimension_numbers<[1], [0], [0], [1], [0, 0, 1, 1], [], []>} : vector<48x32xf32>, vector<32x32xf32>, vector<48x32xf32> -> vector<48x32xf32>
    %294 = arith.addf %288, %293 : vector<48x32xf32>
    %295 = vector.extract_strided_slice %245 {offsets = [8, 0, 0], sizes = [6, 8, 32], strides = [1, 1, 1]} : vector<16x8x32xf32> to vector<6x8x32xf32>
    %296 = vector.shape_cast %295 : vector<6x8x32xf32> to vector<48x32xf32>
    %c8_147 = arith.constant 8 : index
    %c0_148 = arith.constant 0 : index
    %c0_149 = arith.constant 0 : index
    %297 = vector.load %arg8[%c8_147, %c0_148, %c0_149] : memref<11x32x32xf32, #tpu.memory_space<vmem>>, vector<1x32x32xf32>
    %298 = vector.shape_cast %297 : vector<1x32x32xf32> to vector<32x32xf32>
    %cst_150 = arith.constant dense<0.000000e+00> : vector<48x32xf32>
    %299 = tpu.matmul %296, %298, %cst_150 {dimension_numbers = #tpu.dot_dimension_numbers<[1], [0], [0], [1], [0, 0, 1, 1], [], []>} : vector<48x32xf32>, vector<32x32xf32>, vector<48x32xf32> -> vector<48x32xf32>
    %300 = arith.addf %294, %299 : vector<48x32xf32>
    %301 = vector.extract_strided_slice %245 {offsets = [9, 0, 0], sizes = [6, 8, 32], strides = [1, 1, 1]} : vector<16x8x32xf32> to vector<6x8x32xf32>
    %302 = vector.shape_cast %301 : vector<6x8x32xf32> to vector<48x32xf32>
    %c9_151 = arith.constant 9 : index
    %c0_152 = arith.constant 0 : index
    %c0_153 = arith.constant 0 : index
    %303 = vector.load %arg8[%c9_151, %c0_152, %c0_153] : memref<11x32x32xf32, #tpu.memory_space<vmem>>, vector<1x32x32xf32>
    %304 = vector.shape_cast %303 : vector<1x32x32xf32> to vector<32x32xf32>
    %cst_154 = arith.constant dense<0.000000e+00> : vector<48x32xf32>
    %305 = tpu.matmul %302, %304, %cst_154 {dimension_numbers = #tpu.dot_dimension_numbers<[1], [0], [0], [1], [0, 0, 1, 1], [], []>} : vector<48x32xf32>, vector<32x32xf32>, vector<48x32xf32> -> vector<48x32xf32>
    %306 = arith.addf %300, %305 : vector<48x32xf32>
    %307 = vector.extract_strided_slice %245 {offsets = [10, 0, 0], sizes = [6, 8, 32], strides = [1, 1, 1]} : vector<16x8x32xf32> to vector<6x8x32xf32>
    %308 = vector.shape_cast %307 : vector<6x8x32xf32> to vector<48x32xf32>
    %c10_155 = arith.constant 10 : index
    %c0_156 = arith.constant 0 : index
    %c0_157 = arith.constant 0 : index
    %309 = vector.load %arg8[%c10_155, %c0_156, %c0_157] : memref<11x32x32xf32, #tpu.memory_space<vmem>>, vector<1x32x32xf32>
    %310 = vector.shape_cast %309 : vector<1x32x32xf32> to vector<32x32xf32>
    %cst_158 = arith.constant dense<0.000000e+00> : vector<48x32xf32>
    %311 = tpu.matmul %308, %310, %cst_158 {dimension_numbers = #tpu.dot_dimension_numbers<[1], [0], [0], [1], [0, 0, 1, 1], [], []>} : vector<48x32xf32>, vector<32x32xf32>, vector<48x32xf32> -> vector<48x32xf32>
    %312 = arith.addf %306, %311 : vector<48x32xf32>
    %c0_159 = arith.constant 0 : index
    %c0_160 = arith.constant 0 : index
    %313 = vector.load %arg9[%c0_159, %c0_160] : memref<1x32xf32, #tpu.memory_space<vmem>>, vector<1x32xf32>
    %314 = vector.broadcast %313 : vector<1x32xf32> to vector<48x32xf32>
    %315 = arith.addf %312, %314 : vector<48x32xf32>
    %316 = math.tanh %315 : vector<48x32xf32>
    %317 = vector.shape_cast %316 : vector<48x32xf32> to vector<6x8x32xf32>
    %cst_161 = arith.constant 0.000000e+00 : f32
    %318 = vector.broadcast %cst_161 : f32 to vector<10x8x32xf32>
    %319 = tpu.concatenate %318, %317 in 0 : vector<10x8x32xf32>, vector<6x8x32xf32> -> vector<16x8x32xf32>
    %cst_162 = arith.constant 0.000000e+00 : f32
    %320 = vector.broadcast %cst_162 : f32 to vector<14x8x1xf32>
    %321 = vector.extract_strided_slice %319 {offsets = [0, 0, 0], sizes = [14, 8, 32], strides = [1, 1, 1]} : vector<16x8x32xf32> to vector<14x8x32xf32>
    %c0_163 = arith.constant 0 : index
    %c0_164 = arith.constant 0 : index
    %322 = vector.load %arg10[%c0_163, %c0_164] : memref<3x32xf32, #tpu.memory_space<vmem>>, vector<1x32xf32>
    %323 = vector.shape_cast %322 : vector<1x32xf32> to vector<32xf32>
    %324 = vector.shape_cast %323 : vector<32xf32> to vector<1x1x32xf32>
    %325 = vector.broadcast %324 : vector<1x1x32xf32> to vector<14x8x32xf32>
    %326 = arith.mulf %321, %325 : vector<14x8x32xf32>
    %cst_165 = arith.constant dense<0.000000e+00> : vector<14x8xf32>
    %327 = vector.multi_reduction <add>, %326, %cst_165 [2] : vector<14x8x32xf32> to vector<14x8xf32>
    %328 = vector.shape_cast %327 : vector<14x8xf32> to vector<14x8x1xf32>
    %329 = arith.addf %320, %328 : vector<14x8x1xf32>
    %330 = vector.extract_strided_slice %319 {offsets = [1, 0, 0], sizes = [14, 8, 32], strides = [1, 1, 1]} : vector<16x8x32xf32> to vector<14x8x32xf32>
    %c1_166 = arith.constant 1 : index
    %c0_167 = arith.constant 0 : index
    %331 = vector.load %arg10[%c1_166, %c0_167] : memref<3x32xf32, #tpu.memory_space<vmem>>, vector<1x32xf32>
    %332 = vector.shape_cast %331 : vector<1x32xf32> to vector<32xf32>
    %333 = vector.shape_cast %332 : vector<32xf32> to vector<1x1x32xf32>
    %334 = vector.broadcast %333 : vector<1x1x32xf32> to vector<14x8x32xf32>
    %335 = arith.mulf %330, %334 : vector<14x8x32xf32>
    %cst_168 = arith.constant dense<0.000000e+00> : vector<14x8xf32>
    %336 = vector.multi_reduction <add>, %335, %cst_168 [2] : vector<14x8x32xf32> to vector<14x8xf32>
    %337 = vector.shape_cast %336 : vector<14x8xf32> to vector<14x8x1xf32>
    %338 = arith.addf %329, %337 : vector<14x8x1xf32>
    %339 = vector.extract_strided_slice %319 {offsets = [2, 0, 0], sizes = [14, 8, 32], strides = [1, 1, 1]} : vector<16x8x32xf32> to vector<14x8x32xf32>
    %c2_169 = arith.constant 2 : index
    %c0_170 = arith.constant 0 : index
    %340 = vector.load %arg10[%c2_169, %c0_170] : memref<3x32xf32, #tpu.memory_space<vmem>>, vector<1x32xf32>
    %341 = vector.shape_cast %340 : vector<1x32xf32> to vector<32xf32>
    %342 = vector.shape_cast %341 : vector<32xf32> to vector<1x1x32xf32>
    %343 = vector.broadcast %342 : vector<1x1x32xf32> to vector<14x8x32xf32>
    %344 = arith.mulf %339, %343 : vector<14x8x32xf32>
    %cst_171 = arith.constant dense<0.000000e+00> : vector<14x8xf32>
    %345 = vector.multi_reduction <add>, %344, %cst_171 [2] : vector<14x8x32xf32> to vector<14x8xf32>
    %346 = vector.shape_cast %345 : vector<14x8xf32> to vector<14x8x1xf32>
    %347 = arith.addf %338, %346 : vector<14x8x1xf32>
    %c0_172 = arith.constant 0 : index
    %c0_173 = arith.constant 0 : index
    %348 = vector.load %arg11[%c0_172, %c0_173] : memref<1x1xf32, #tpu.memory_space<vmem>>, vector<1x1xf32>
    %349 = vector.extract %348[0, 0] : f32 from vector<1x1xf32>
    %350 = vector.broadcast %349 : f32 to vector<14x8x1xf32>
    %351 = arith.addf %347, %350 : vector<14x8x1xf32>
    %352 = math.tanh %351 : vector<14x8x1xf32>
    %cst_174 = arith.constant 0.000000e+00 : f32
    %353 = vector.broadcast %cst_174 : f32 to vector<2x8x1xf32>
    %354 = tpu.concatenate %353, %352 in 0 : vector<2x8x1xf32>, vector<14x8x1xf32> -> vector<16x8x1xf32>
    %c0_175 = arith.constant 0 : index
    %c0_176 = arith.constant 0 : index
    %c0_177 = arith.constant 0 : index
    %c0_178 = arith.constant 0 : index
    %355 = vector.load %arg12[%c0_175, %c0_176, %c0_177, %c0_178] : memref<1x16x8x1xf32, #tpu.memory_space<vmem>>, vector<1x16x8x1xf32>
    %356 = vector.shape_cast %355 : vector<1x16x8x1xf32> to vector<16x8x1xf32>
    %357 = vector.shape_cast %354 : vector<16x8x1xf32> to vector<1x16x8x1xf32>
    tpu.vector_store %arg12[%c0_175, %c0_176, %c0_177, %c0_178], %357 {strides = array<i32>} : memref<1x16x8x1xf32, #tpu.memory_space<vmem>>, vector<1x16x8x1xf32>,
    return
  }
  func.func @transform_0(%arg0: i32) -> (i32, i32, i32, i32) {
    %c0_i32 = arith.constant 0 : i32
    %c0_i32_0 = arith.constant 0 : i32
    %c0_i32_1 = arith.constant 0 : i32
    %c0_i32_2 = arith.constant 0 : i32
    return %arg0, %c0_i32, %c0_i32_0, %c0_i32_1 : i32, i32, i32, i32
  }
  func.func @transform_1(%arg0: i32) -> (i32, i32) {
    %c0_i32 = arith.constant 0 : i32
    %c0_i32_0 = arith.constant 0 : i32
    %c0_i32_1 = arith.constant 0 : i32
    return %c0_i32, %c0_i32_0 : i32, i32
  }
  func.func @transform_2(%arg0: i32) -> (i32, i32) {
    %c0_i32 = arith.constant 0 : i32
    %c0_i32_0 = arith.constant 0 : i32
    %c0_i32_1 = arith.constant 0 : i32
    return %c0_i32, %c0_i32_0 : i32, i32
  }
  func.func @transform_3(%arg0: i32) -> (i32, i32, i32) {
    %c0_i32 = arith.constant 0 : i32
    %c0_i32_0 = arith.constant 0 : i32
    %c0_i32_1 = arith.constant 0 : i32
    %c0_i32_2 = arith.constant 0 : i32
    return %c0_i32, %c0_i32_0, %c0_i32_1 : i32, i32, i32
  }
  func.func @transform_4(%arg0: i32) -> (i32, i32) {
    %c0_i32 = arith.constant 0 : i32
    %c0_i32_0 = arith.constant 0 : i32
    %c0_i32_1 = arith.constant 0 : i32
    return %c0_i32, %c0_i32_0 : i32, i32
  }
  func.func @transform_5(%arg0: i32) -> (i32, i32, i32) {
    %c0_i32 = arith.constant 0 : i32
    %c0_i32_0 = arith.constant 0 : i32
    %c0_i32_1 = arith.constant 0 : i32
    %c0_i32_2 = arith.constant 0 : i32
    return %c0_i32, %c0_i32_0, %c0_i32_1 : i32, i32, i32
  }
  func.func @transform_6(%arg0: i32) -> (i32, i32) {
    %c0_i32 = arith.constant 0 : i32
    %c0_i32_0 = arith.constant 0 : i32
    %c0_i32_1 = arith.constant 0 : i32
    return %c0_i32, %c0_i32_0 : i32, i32
  }
  func.func @transform_7(%arg0: i32) -> (i32, i32, i32) {
    %c0_i32 = arith.constant 0 : i32
    %c0_i32_0 = arith.constant 0 : i32
    %c0_i32_1 = arith.constant 0 : i32
    %c0_i32_2 = arith.constant 0 : i32
    return %c0_i32, %c0_i32_0, %c0_i32_1 : i32, i32, i32
  }
  func.func @transform_8(%arg0: i32) -> (i32, i32) {
    %c0_i32 = arith.constant 0 : i32
    %c0_i32_0 = arith.constant 0 : i32
    %c0_i32_1 = arith.constant 0 : i32
    return %c0_i32, %c0_i32_0 : i32, i32
  }
  func.func @transform_9(%arg0: i32) -> (i32, i32) {
    %c0_i32 = arith.constant 0 : i32
    %c0_i32_0 = arith.constant 0 : i32
    %c0_i32_1 = arith.constant 0 : i32
    return %c0_i32, %c0_i32_0 : i32, i32
  }
  func.func @transform_10(%arg0: i32) -> (i32, i32) {
    %c0_i32 = arith.constant 0 : i32
    %c0_i32_0 = arith.constant 0 : i32
    %c0_i32_1 = arith.constant 0 : i32
    return %c0_i32, %c0_i32_0 : i32, i32
  }
  func.func @transform_11(%arg0: i32) -> (i32, i32, i32, i32) {
    %c0_i32 = arith.constant 0 : i32
    %c0_i32_0 = arith.constant 0 : i32
    %c0_i32_1 = arith.constant 0 : i32
    %c0_i32_2 = arith.constant 0 : i32
    return %arg0, %c0_i32, %c0_i32_0, %c0_i32_1 : i32, i32, i32, i32
  }
}

</mosaic_0001>

<bundles_post_ra>
// kernel: tpu_custom_call.1
= control target key start
LH: loop header
LB: loop body
LE: loop exit
PB: predicated region body
PF: predicated region fallthrough
CT: control target
= control target key end

     0   :  { %s6432_s0 = inlined_call_operand.vmem [shape: f32[2,16,8,1], index: 0, kind: input, shape index: {}]   ;;  %s6433_s1 = inlined_call_operand.vmem [shape: f32[11,32], index: 1, kind: input, shape index: {}]   ;;  %s6434_s2 = inlined_call_operand.vmem [shape: f32[1,32], index: 2, kind: input, shape index: {}]   ;;  %s6435_s3 = inlined_call_operand.hbm [shape: f32[11,32,32], index: 3, kind: input, shape index: {}]   ;;  %s6436_s4 = inlined_call_operand.vmem [shape: f32[1,32], index: 4, kind: input, shape index: {}]   ;;  %s6437_s5 = inlined_call_operand.hbm [shape: f32[11,32,32], index: 5, kind: input, shape index: {}]   ;;  %s6438_s6 = inlined_call_operand.vmem [shape: f32[1,32], index: 6, kind: input, shape index: {}]   ;;  %s6439_s7 = inlined_call_operand.hbm [shape: f32[11,32,32], index: 7, kind: input, shape index: {}]   ;;  %s6440_s8 = inlined_call_operand.vmem [shape: f32[1,32], index: 8, kind: input, shape index: {}]   ;;  %s6441_s9 = inlined_call_operand.vmem [shape: f32[3,32], index: 9, kind: input, shape index: {}]   ;;  %s6442_s10 = inlined_call_operand.<no memory space> [shape: f32[1,1], index: 10, kind: input, shape index: {}]   ;;  %s6443_s11 = inlined_call_operand.vmem [shape: f32[2,16,8,1], index: 11, kind: output, shape index: {}]  }
   0x1   :  { %v16_v0 = vstv %s6442_s10 }
   0x2   :  { %17 = vst [vmem:[#allocation2] sm:$0x1] %v16_v0 }
   0x3   :  { %18 = vsyncpa [#allocation4], 0 }
   0x4   :  { %19 = vsyncpa [#allocation6], 0  ;;  %s5806_s19 = smov 0  }
   0x5 LB: > { %s5812_s20 = sadd.s32 4294967295, %s5734_s19   ;;  %p4536_p0 = scmp.ge.s32.totalorder %s5734_s19, 1  ;;  %s5734_s19 = sphi %s5806_s19, %s25_s19  }
   0x6   : > { %p292_p1 = scmp.lt.s32.totalorder %s5734_s19, 3  ;;  %p5557_p2 = scmp.eq.s32.totalorder %s5812_s20, 0 }
   0x7   : > { %s5736_s21 = smov [#allocation5]   ;;  %s5737_s23 = smov [#allocation3]  }
   0x8   : > { %p5817_p3 = pnand %p4536_p0, %p292_p1  ;;  %s326_s22 = sshll.u32 %s5736_s21, 4  ;;  %s327_s22 = int_to_ptr.vmem [resolvable:$true] %s326_s22 }
   0x9   : > { %s310_s24 = sshll.u32 %s5737_s23, 4  ;;  %s5738_s26 = smov [#allocation7]   ;;  %s311_s24 = int_to_ptr.vmem [resolvable:$true] %s310_s24 }
   0xa   : > { %p5547_p4 = pneg %p5817_p3  ;;  %s342_s27 = sshll.u32 %s5738_s26, 4  ;;  %s5829_s27 = int_to_ptr.vmem [resolvable:$true] %s342_s27 }
   0xb   : > { %s5653_s28 = scalar_lea.vmem %s327_s22, 5632  ;;  %p5661_p10 = scmp.lt.s32.totalorder %s327_s22, %s327_s22 }
   0xc   : > { %p5825_p5 = pnand %p5557_p2, %p5547_p4  ;;  %p5654_p7 = scmp.ne.s32.totalorder %s327_s22, %s5653_s28 }
   0xd   : > { %p5662_p11 = scmp.lt.s32.totalorder %s5653_s28, %s5653_s28 }
   0xe   : > { %p5644_p6 = pneg %p5825_p5 }
   0xf   : > { %p5663_p12 = por %p5662_p11, %p5661_p10 }
  0x10   : > { %p5656_p8 = pnand %p5654_p7, %p5644_p6 }
  0x12   : > { %p5657_p9 = pneg %p5656_p8 }
  0x14   : > { %p5664_p13 = pnand %p5663_p12, %p5657_p9 }
  0x16   : > { %5667 = shalt.err (!%p5664_p13)
}
  0x17   : > { %s5739_s29 = smov 128   ;;  %s5740_s30 = smov 8  }
  0x18   : > { %5553 = dma.hbm_to_vmem [thread:$0]  (!%p5825_p5), %s6437_s5, 5632, %s327_s22, [#allocation6], %s5739_s29, %s5739_s29, %s5740_s30  }
  0x19   : > { %s5679_s14 = scalar_lea.vmem %s311_s24, 5632  ;;  %p5687_p7 = scmp.lt.s32.totalorder %s311_s24, %s311_s24 }
  0x1a   : > { %p5680_p0 = scmp.ne.s32.totalorder %s311_s24, %s5679_s14  ;;  %p5688_p8 = scmp.lt.s32.totalorder %s5679_s14, %s5679_s14 }
  0x1c   : > { %p5682_p1 = pnand %p5680_p0, %p5644_p6  ;;  %p5689_p10 = por %p5688_p8, %p5687_p7 }
  0x1e   : > { %p5683_p4 = pneg %p5682_p1 }
  0x20   : > { %p5690_p9 = pnand %p5689_p10, %p5683_p4 }
  0x22   : > { %5693 = shalt.err (!%p5690_p9)
}
  0x23   : > { %5550 = dma.hbm_to_vmem [thread:$0]  (!%p5825_p5), %s6435_s3, 5632, %s311_s24, [#allocation4], %s5739_s29, %s5739_s29, %s5740_s30  }
  0x24   : > { %s5705_s17 = scalar_lea.vmem %s5829_s27, 5632  ;;  %p5713_p0 = scmp.lt.s32.totalorder %s5829_s27, %s5829_s27 }
  0x25   : > { %p5706_p11 = scmp.ne.s32.totalorder %s5829_s27, %s5705_s17  ;;  %p5714_p1 = scmp.lt.s32.totalorder %s5705_s17, %s5705_s17 }
  0x27   : > { %p5708_p12 = pnand %p5706_p11, %p5644_p6  ;;  %p5715_p4 = por %p5714_p1, %p5713_p0 }
  0x29   : > { %p5709_p13 = pneg %p5708_p12 }
  0x2b   : > { %p5716_p7 = pnand %p5715_p4, %p5709_p13 }
  0x2d   : > { %5719 = shalt.err (!%p5716_p7)
}
  0x2e   : > { %5556 = dma.hbm_to_vmem [thread:$0]  (!%p5825_p5), %s6439_s7, 5632, %s5829_s27, [#allocation6], %s5739_s29, %s5739_s29, %s5740_s30  }
  0x2f   : > { %375 = sbr.rel (%p5817_p3) target bundleno = 1114 (0x45a), region = 64 }
  0x34   : > { %5725 = dma.done.wait (%p5557_p2), [#allocation4], 5632  }
  0x35   : > { %5727 = vsyncadd (%p5557_p2), [#allocation4], 4294961664 }
  0x36   : > { %5729 = dma.done.wait (%p5557_p2), [#allocation6], 11264  }
  0x37   : > { %5731 = vsyncadd (%p5557_p2), [#allocation6], 4294956032  ;;  %p423_p6 = scmp.lt.s32.totalorder %s5812_s20, 1  ;;  %v5741_v1 = vmov 0   ;;  %v5742_v2 = vmov 0.0   ;;  %v743_v7 = vld [vmem:[#allocation3 + $0x38] sm:$0xff] }
  0x38   : > { %5579 = vset.pattern.permute.xlu1 %v5741_v1  ;;  %5578 = vset.pattern.permute.xlu0 %v5741_v1  ;;  %v742_v8 = vld [vmem:[#allocation3 + $0x30] sm:$0xff]  ;;  %v741_v11 = vld [vmem:[#allocation3 + $0x28] sm:$0xff]  ;;  %v740_v14 = vld [vmem:[#allocation3 + $0x20] sm:$0xff]  ;;  %vm744_vm0 = vcmask 261120   ;;  %vm4431_vm1 = vcmask 7168  }
  0x39   : > { %s6447_s20 = smov (!%p423_p6, %s5812_s20), 1  ;;  %4978 = vmatprep.mubr.f32.mxu1 %v5742_v2  ;;  %4972 = vmatprep.mubr.f32.mxu0 %v5742_v2  ;;  %v738_v15 = vld [vmem:[#allocation3 + $0x18] sm:$0xff]  ;;  %v737_v18 = vld [vmem:[#allocation3 + $0x10] sm:$0xff]  ;;  %v736_v22 = vld [vmem:[#allocation3 + $0x8] sm:$0xff] }
  0x3a   : > { %s4632_s10 = sshll.u32 %s6447_s20, 7  ;;  %5525 = vmatprep.subr.mxu1 %v743_v7  ;;  %4964 = vmatprep.subr.mxu0 %v743_v7  ;;  %v942_v19 = vld [vmem:[#allocation3 + $0x58] sm:$0xff]  ;;  %v941_v23 = vld [vmem:[#allocation3 + $0x50] sm:$0xff]  ;;  %v735_v24 = vld [vmem:[#allocation3] sm:$0xff] }
  0x3b   : > { %s5884_s24 = scalar_lea.vmem %s6432_s0, %s4632_s10  ;;  %5529 = vmatpush3.msra.mxu1 %v743_v7  ;;  %4965 = vmatpush3.msra.mxu0 %v743_v7  ;;  %v940_v27 = vld [vmem:[#allocation3 + $0x48] sm:$0xff]  ;;  %v939_v30 = vld [vmem:[#allocation3 + $0x40] sm:$0xff]  ;;  %v1048_v31 = vld [vmem:[#allocation3 + $0x78] sm:$0xff]  ;;  %s6375_s30 = scalar_lea.vmem %s6443_s11, %s4632_s10 }
  0x3c   : > { %v435_v3 = vld [vmem:[%s5884_s24 + $0x10] sm:$0xff]  ;;  %v433_v4 = vld [vmem:[%s5884_s24] sm:$0xff]  ;;  %v436_v5 = vld [vmem:[%s5884_s24 + $0x18] sm:$0xff]  ;;  %5526 = vmatprep.subr.mxu1 %v742_v8  ;;  %4966 = vmatprep.subr.mxu0 %v742_v8  ;;  %4432 = vst.msk [vmem:[%s6375_s30] sm:$0xff] %vm4431_vm1, %v5742_v2 }
  0x3d   : > { %462 = vperm.xlu1 %5579, %v435_v3   ;;  %452 = vperm.xlu0 %5578, %v433_v4   ;;  %v434_v6 = vld [vmem:[%s5884_s24 + $0x8] sm:$0xff]  ;;  %v437_v10 = vld [vmem:[%s5884_s24 + $0x20] sm:$0xff]  ;;  %v440_v12 = vld [vmem:[%s5884_s24 + $0x38] sm:$0xff]  ;;  %4433 = vst.msk [vmem:[%s6375_s30 + $0x8] sm:$0xff] %vm4431_vm1, %v5742_v2 }
  0x3e   : > { %v438_v9 = vld [vmem:[%s5884_s24 + $0x28] sm:$0xff]  ;;  %v439_v13 = vld [vmem:[%s5884_s24 + $0x30] sm:$0xff]  ;;  %5530 = vmatpush3.msra.mxu1 %v742_v8  ;;  %4967 = vmatpush3.msra.mxu0 %v742_v8  ;;  %v441_v17 = vld [vmem:[%s5884_s24 + $0x40] sm:$0xff] }
  0x3f   : > { %5527 = vmatprep.subr.mxu1 %v741_v11  ;;  %4968 = vmatprep.subr.mxu0 %v741_v11  ;;  %v442_v16 = vld [vmem:[%s5884_s24 + $0x48] sm:$0xff]  ;;  %v444_v20 = vld [vmem:[%s5884_s24 + $0x58] sm:$0xff]  ;;  %v443_v21 = vld [vmem:[%s5884_s24 + $0x50] sm:$0xff] }
  0x40   : > { %5531 = vmatpush3.msra.mxu1 %v741_v11  ;;  %4969 = vmatpush3.msra.mxu0 %v741_v11  ;;  %v446_v25 = vld [vmem:[%s5884_s24 + $0x68] sm:$0xff]  ;;  %v445_v26 = vld [vmem:[%s5884_s24 + $0x60] sm:$0xff]  ;;  %v448_v28 = vld [vmem:[%s5884_s24 + $0x78] sm:$0xff] }
  0x41   : > { %467 = vperm.xlu1 %5579, %v436_v5   ;;  %457 = vperm.xlu0 %5578, %v434_v6   ;;  %v447_v29 = vld [vmem:[%s5884_s24 + $0x70] sm:$0xff]  ;;  %v1154_v32 = vld [vmem:[#allocation3 + $0x98] sm:$0xff]  ;;  %v1045_v36 = vld [vmem:[#allocation3 + $0x60] sm:$0xff] }
  0x42   : > { %5528 = vmatprep.subr.mxu1 %v740_v14  ;;  %4970 = vmatprep.subr.mxu0 %v740_v14  ;;  %v1047_v33 = vld [vmem:[#allocation3 + $0x70] sm:$0xff]  ;;  %v1046_v34 = vld [vmem:[#allocation3 + $0x68] sm:$0xff]  ;;  %v1151_v38 = vld [vmem:[#allocation3 + $0x80] sm:$0xff] }
  0x43   : > { %5532 = vmatpush3.msra.mxu1 %v740_v14  ;;  %4971 = vmatpush3.msra.mxu0 %v740_v14  ;;  %v1153_v35 = vld [vmem:[#allocation3 + $0x90] sm:$0xff]  ;;  %v1152_v37 = vld [vmem:[#allocation3 + $0x88] sm:$0xff]  ;;  %v1260_v39 = vld [vmem:[#allocation3 + $0xb8] sm:$0xff] }
  0x44   : > { %4981 = vmatprep.subr.mxu1 %v738_v15  ;;  %4979 = vmatmul.mubr.f32.vlgmr.msra.gmra.mxu1 %v5742_v2  ;;  %v1259_v40 = vld [vmem:[#allocation3 + $0xb0] sm:$0xff]  ;;  %v1369_v41 = vld [vmem:[#allocation3 + $0xd8] sm:$0xff]  ;;  %v1258_v42 = vld [vmem:[#allocation3 + $0xa8] sm:$0xff] }
  0x45   : > { %477 = vperm.xlu1 %5579, %v438_v9   ;;  %472 = vperm.xlu0 %5578, %v437_v10   ;;  %v1368_v43 = vld [vmem:[#allocation3 + $0xd0] sm:$0xff]  ;;  %v1257_v44 = vld [vmem:[#allocation3 + $0xa0] sm:$0xff]  ;;  %v1367_v45 = vld [vmem:[#allocation3 + $0xc8] sm:$0xff] }
  0x46   : > { %4982 = vmatpush3.msra.mxu1 %v738_v15  ;;  %4973 = vmatmul.mubr.f32.vlgmr.msra.gmra.mxu0 %v5742_v2  ;;  %v1366_v46 = vld [vmem:[#allocation3 + $0xc0] sm:$0xff]  ;;  %v1478_v47 = vld [vmem:[#allocation3 + $0xf8] sm:$0xff]  ;;  %v1477_v49 = vld [vmem:[#allocation3 + $0xf0] sm:$0xff] }
  0x47   : > { %4983 = vmatprep.subr.mxu1 %v737_v18  ;;  %4998 = vmatprep.subr.mxu0 %v942_v19  ;;  %v1587_v48 = vld [vmem:[#allocation3 + $0x118] sm:$0xff]  ;;  %v1586_v50 = vld [vmem:[#allocation3 + $0x110] sm:$0xff]  ;;  %v1476_v51 = vld [vmem:[#allocation3 + $0xe8] sm:$0xff] }
  0x48   : > { %4984 = vmatpush3.msra.mxu1 %v737_v18  ;;  %4999 = vmatpush3.msra.mxu0 %v942_v19  ;;  %v1585_v52 = vld [vmem:[#allocation3 + $0x108] sm:$0xff]  ;;  %v1475_v53 = vld [vmem:[#allocation3 + $0xe0] sm:$0xff]  ;;  %v5939_v55 = vld [vmem:[#allocation3 + $0x138] sm:$0xff] }
  0x49   : > { %521 = vperm.xlu1 %5579, %v440_v12   ;;  %499 = vperm.xlu0 %5578, %v439_v13   ;;  %v1584_v54 = vld [vmem:[#allocation3 + $0x100] sm:$0xff]  ;;  %v5941_v56 = vld [vmem:[#allocation3 + $0x158] sm:$0xff] }
  0x4a   : > { %4985 = vmatprep.subr.mxu1 %v736_v22  ;;  %5000 = vmatprep.subr.mxu0 %v941_v23  ;;  %v4550_v59 = vld [vmem:[%s6433_s1 + $0x1] ss:$0 sm:$0xff]  ;;  %v4549_v60 = vld [vmem:[%s6433_s1] ss:$0 sm:$0xff]  ;;  %v5954_v0 = vld [vmem:[%s6433_s1 + $0x2] ss:$0 sm:$0xff] }
  0x4b   : > { %4975 = vmatprep.mubr.f32.mxu0 %v5742_v2  ;;  %4986 = vmatpush3.msra.mxu1 %v736_v22  ;;  %v5959_v6 = vld [vmem:[%s6433_s1 + $0x3] ss:$0 sm:$0xff]  ;;  %v5966_v14 = vld [vmem:[%s6433_s1 + $0x4] ss:$0 sm:$0xff] }
  0x4c   : > { %5001 = vmatpush3.msra.mxu0 %v941_v23  ;;  %4987 = vmatprep.subr.mxu1 %v735_v24 }
  0x4d   : > { %565 = vperm.xlu1 %5579, %v442_v16   ;;  %543 = vperm.xlu0 %5578, %v441_v17  }
  0x4e   : > { %4976 = vmatmul.mubr.f32.gmra.mxu0 %v5742_v2  ;;  %5002 = vmatprep.subr.mxu0 %v940_v27 }
  0x4f   : > { %4988 = vmatpush3.msra.mxu1 %v735_v24  ;;  %4989 = vmatprep.mubr.f32.mxu1 %v5742_v2 }
  0x50   : > { %5003 = vmatpush3.msra.mxu0 %v940_v27  ;;  %4990 = vmatmul.mubr.f32.vlgmr.msra.gmra.mxu1 %v5742_v2 }
  0x51   : > { %609 = vperm.xlu1 %5579, %v444_v20   ;;  %587 = vperm.xlu0 %5578, %v443_v21   ;;  %v5972_v20 = vld [vmem:[%s6433_s1 + $0x5] ss:$0 sm:$0xff] }
  0x52   : > { %5004 = vmatprep.subr.mxu0 %v939_v30  ;;  %5006 = vmatprep.mubr.f32.mxu0 %v5742_v2 }
  0x53   : > { %5005 = vmatpush3.msra.mxu0 %v939_v30  ;;  %4992 = vmatprep.mubr.f32.mxu1 %v5742_v2 }
  0x54   : > { %5007 = vmatmul.mubr.f32.vlgmr.msra.gmra.mxu0 %v5742_v2  ;;  %4993 = vmatmul.mubr.f32.gmra.mxu1 %v5742_v2 }
  0x55   : > { %653 = vperm.xlu1 %5579, %v446_v25   ;;  %631 = vperm.xlu0 %5578, %v445_v26  }
  0x56   : > { %5015 = vmatprep.subr.mxu1 %v1048_v31  ;;  %5009 = vmatprep.mubr.f32.mxu0 %v5742_v2 }
  0x57   : > { %5016 = vmatpush3.msra.mxu1 %v1048_v31  ;;  %5032 = vmatprep.subr.mxu0 %v1154_v32 }
  0x58   : > { %5017 = vmatprep.subr.mxu1 %v1047_v33  ;;  %4995 = vmatprep.mubr.f32.mxu1 %v5742_v2 }
  0x59   : > { %697 = vperm.xlu1 %5579, %v448_v28   ;;  %675 = vperm.xlu0 %5578, %v447_v29  }
  0x5a   : > { %5010 = vmatmul.mubr.f32.gmra.mxu0 %v5742_v2  ;;  %5018 = vmatpush3.msra.mxu1 %v1047_v33 }
  0x5b   : > { %5033 = vmatpush3.msra.mxu0 %v1154_v32  ;;  %4996 = vmatmul.mubr.f32.gmra.mxu1 %v5742_v2 }
  0x5c   : > { %5019 = vmatprep.subr.mxu1 %v1046_v34  ;;  %5034 = vmatprep.subr.mxu0 %v1153_v35 }
  0x5d   : > { %5012 = vmatprep.mubr.f32.mxu0 %v5742_v2  ;;  %5020 = vmatpush3.msra.mxu1 %v1046_v34 }
  0x5e   : > { %5035 = vmatpush3.msra.mxu0 %v1153_v35  ;;  %5021 = vmatprep.subr.mxu1 %v1045_v36 }
  0x5f   : > { %5013 = vmatmul.mubr.f32.gmra.mxu0 %v5742_v2  ;;  %5036 = vmatprep.subr.mxu0 %v1152_v37 }
  0x60   : > { %5022 = vmatpush3.msra.mxu1 %v1045_v36  ;;  %5023 = vmatprep.mubr.f32.mxu1 %v5742_v2 }
  0x61   : > { %5037 = vmatpush3.msra.mxu0 %v1152_v37  ;;  %5024 = vmatmul.mubr.f32.vlgmr.msra.gmra.mxu1 %v5742_v2 }
  0x62   : > { %5038 = vmatprep.subr.mxu0 %v1151_v38  ;;  %5040 = vmatprep.mubr.f32.mxu0 %v5742_v2 }
  0x63   : > { %5039 = vmatpush3.msra.mxu0 %v1151_v38  ;;  %5026 = vmatprep.mubr.f32.mxu1 %v5742_v2 }
  0x64   : > { %5041 = vmatmul.mubr.f32.vlgmr.msra.gmra.mxu0 %v5742_v2  ;;  %5049 = vmatprep.subr.mxu1 %v1260_v39 }
  0x65   : > { %5027 = vmatmul.mubr.f32.gmra.mxu1 %v5742_v2  ;;  %5043 = vmatprep.mubr.f32.mxu0 %v5742_v2 }
  0x66   : > { %5029 = vmatprep.mubr.f32.mxu1 %v5742_v2  ;;  %5050 = vmatpush3.msra.mxu1 %v1260_v39 }
  0x67   : > { %5051 = vmatprep.subr.mxu1 %v1259_v40  ;;  %5066 = vmatprep.subr.mxu0 %v1369_v41 }
  0x68   : > { %5044 = vmatmul.mubr.f32.gmra.mxu0 %v5742_v2  ;;  %5052 = vmatpush3.msra.mxu1 %v1259_v40 }
  0x69   : > { %5030 = vmatmul.mubr.f32.gmra.mxu1 %v5742_v2  ;;  %5046 = vmatprep.mubr.f32.mxu0 %v5742_v2 }
  0x6a   : > { %5067 = vmatpush3.msra.mxu0 %v1369_v41  ;;  %5053 = vmatprep.subr.mxu1 %v1258_v42  ;;  %v5984_v41 = vld [vmem:[%s6433_s1 + $0x6] ss:$0 sm:$0xff] }
  0x6b   : > { %5068 = vmatprep.subr.mxu0 %v1368_v43  ;;  %5054 = vmatpush3.msra.mxu1 %v1258_v42 }
  0x6c   : > { %5047 = vmatmul.mubr.f32.gmra.mxu0 %v5742_v2  ;;  %5055 = vmatprep.subr.mxu1 %v1257_v44 }
  0x6d   : > { %5069 = vmatpush3.msra.mxu0 %v1368_v43  ;;  %5056 = vmatpush3.msra.mxu1 %v1257_v44 }
  0x6e   : > { %5070 = vmatprep.subr.mxu0 %v1367_v45  ;;  %5057 = vmatprep.mubr.f32.mxu1 %v5742_v2 }
  0x6f   : > { %5071 = vmatpush3.msra.mxu0 %v1367_v45  ;;  %5058 = vmatmul.mubr.f32.vlgmr.msra.gmra.mxu1 %v5742_v2  ;;  %v5989_v45 = vld [vmem:[%s6433_s1 + $0x7] ss:$0 sm:$0xff] }
  0x70   : > { %5072 = vmatprep.subr.mxu0 %v1366_v46  ;;  %5074 = vmatprep.mubr.f32.mxu0 %v5742_v2 }
  0x71   : > { %5073 = vmatpush3.msra.mxu0 %v1366_v46  ;;  %5060 = vmatprep.mubr.f32.mxu1 %v5742_v2 }
  0x72   : > { %5075 = vmatmul.mubr.f32.vlgmr.msra.gmra.mxu0 %v5742_v2  ;;  %5083 = vmatprep.subr.mxu1 %v1478_v47 }
  0x73   : > { %5061 = vmatmul.mubr.f32.gmra.mxu1 %v5742_v2  ;;  %5077 = vmatprep.mubr.f32.mxu0 %v5742_v2 }
  0x74   : > { %5084 = vmatpush3.msra.mxu1 %v1478_v47  ;;  %5100 = vmatprep.subr.mxu0 %v1587_v48 }
  0x75   : > { %5085 = vmatprep.subr.mxu1 %v1477_v49  ;;  %5101 = vmatpush3.msra.mxu0 %v1587_v48 }
  0x76   : > { %5078 = vmatmul.mubr.f32.gmra.mxu0 %v5742_v2  ;;  %5086 = vmatpush3.msra.mxu1 %v1477_v49 }
  0x77   : > { %5102 = vmatprep.subr.mxu0 %v1586_v50  ;;  %5087 = vmatprep.subr.mxu1 %v1476_v51 }
  0x78   : > { %5103 = vmatpush3.msra.mxu0 %v1586_v50  ;;  %5088 = vmatpush3.msra.mxu1 %v1476_v51 }
  0x79   : > { %5063 = vmatprep.mubr.f32.mxu1 %v5742_v2  ;;  %5104 = vmatprep.subr.mxu0 %v1585_v52 }
  0x7a   : > { %5089 = vmatprep.subr.mxu1 %v1475_v53  ;;  %5105 = vmatpush3.msra.mxu0 %v1585_v52 }
  0x7b   : > { %5090 = vmatpush3.msra.mxu1 %v1475_v53  ;;  %5106 = vmatprep.subr.mxu0 %v1584_v54 }
  0x7c   : > { %5107 = vmatpush3.msra.mxu0 %v1584_v54  ;;  %5117 = vmatprep.subr.mxu1 %v5939_v55 }
  0x7d   : > { %5134 = vmatprep.subr.mxu0 %v5941_v56 }
  0xb8   : > { %v463_v57 = vpop.permute.xlu1 %462  ;;  %v453_v58 = vpop.permute.xlu0 %452 }
  0xb9   : > { %v507_v61 = vmul.f32 %v4550_v59, %v463_v57  ;;  %v484_v1 = vmul.f32 %v4549_v60, %v453_v58  ;;  %v486_v5 = vmul.f32 %v4549_v60, %v463_v57  ;;  %v528_v8 = vmul.f32 %v5954_v0, %v463_v57 }
  0xbc   : > { %v468_v62 = vpop.permute.xlu1 %467  ;;  %v458_v63 = vpop.permute.xlu0 %457 }
  0xbd   : > { %v485_v3 = vmul.f32 %v4549_v60, %v458_v63  ;;  %v506_v4 = vmul.f32 %v4550_v59, %v458_v63  ;;  %v508_v7 = vmul.f32 %v4550_v59, %v468_v62  ;;  %v529_v9 = vmul.f32 %v5954_v0, %v468_v62 }
  0xbe   : > { %v487_v15 = vmul.f32 %v4549_v60, %v468_v62  ;;  %v550_v16 = vmul.f32 %v5959_v6, %v468_v62 }
  0xbf   : > { %v512_v10 = vadd.f32 %v506_v4, %v484_v1  ;;  %v513_v11 = vadd.f32 %v507_v61, %v485_v3  ;;  %v514_v19 = vadd.f32 %v508_v7, %v486_v5  ;;  %v6002_v61 = vld [vmem:[%s6433_s1 + $0x8] ss:$0 sm:$0xff] }
  0xc0   : > { %v478_v12 = vpop.permute.xlu1 %477  ;;  %v473_v13 = vpop.permute.xlu0 %472 }
  0xc1   : > { %v534_v17 = vadd.f32 %v528_v8, %v512_v10  ;;  %v535_v18 = vadd.f32 %v529_v9, %v513_v11  ;;  %v509_v21 = vmul.f32 %v4550_v59, %v473_v13  ;;  %v530_v22 = vmul.f32 %v5954_v0, %v473_v13 }
  0xc2   : > { %v551_v23 = vmul.f32 %v5959_v6, %v473_v13  ;;  %v531_v25 = vmul.f32 %v5954_v0, %v478_v12  ;;  %v552_v26 = vmul.f32 %v5959_v6, %v478_v12  ;;  %v572_v27 = vmul.f32 %v5966_v14, %v473_v13 }
  0xc3   : > { %v556_v24 = vadd.f32 %v550_v16, %v534_v17  ;;  %v573_v29 = vmul.f32 %v5966_v14, %v478_v12  ;;  %v515_v30 = vadd.f32 %v509_v21, %v487_v15  ;;  %v536_v31 = vadd.f32 %v530_v22, %v514_v19 }
  0xc4   : > { %v500_v28 = vpop.permute.xlu0 %499  ;;  %v557_v32 = vadd.f32 %v551_v23, %v535_v18  ;;  %v522_v33 = vpop.permute.xlu1 %521  ;;  %v510_v34 = vmul.f32 %v4550_v59, %v478_v12  ;;  %v594_v35 = vmul.f32 %v5972_v20, %v478_v12  ;;  %v488_v36 = vmul.f32 %v4549_v60, %v473_v13  ;;  %v6011_v13 = vld [vmem:[%s6433_s1 + $0x9] ss:$0 sm:$0xff] }
  0xc5   : > { %v578_v37 = vadd.f32 %v572_v27, %v556_v24  ;;  %v537_v38 = vadd.f32 %v531_v25, %v515_v30  ;;  %v558_v39 = vadd.f32 %v552_v26, %v536_v31  ;;  %v489_v42 = vmul.f32 %v4549_v60, %v478_v12 }
  0xc6   : > { %v579_v40 = vadd.f32 %v573_v29, %v557_v32  ;;  %v511_v44 = vmul.f32 %v4550_v59, %v500_v28  ;;  %v532_v46 = vmul.f32 %v5954_v0, %v500_v28  ;;  %v553_v47 = vmul.f32 %v5959_v6, %v500_v28 }
  0xc7   : > { %v600_v43 = vadd.f32 %v594_v35, %v578_v37  ;;  %v574_v48 = vmul.f32 %v5966_v14, %v500_v28  ;;  %v595_v49 = vmul.f32 %v5972_v20, %v500_v28  ;;  %v516_v51 = vadd.f32 %v510_v34, %v488_v36 }
  0xc8   : > { %v544_v50 = vpop.permute.xlu0 %543  ;;  %v575_v52 = vmul.f32 %v5966_v14, %v522_v33  ;;  %v596_v53 = vmul.f32 %v5972_v20, %v522_v33  ;;  %v616_v54 = vmul.f32 %v5984_v41, %v500_v28  ;;  %v617_v57 = vmul.f32 %v5984_v41, %v522_v33  ;;  %v566_v62 = vpop.permute.xlu1 %565  ;;  %v6023_v28 = vld [vmem:[%s6433_s1 + $0xa] ss:$0 sm:$0xff] }
  0xc9   : > { %v559_v58 = vadd.f32 %v553_v47, %v537_v38  ;;  %v580_v59 = vadd.f32 %v574_v48, %v558_v39  ;;  %v601_v60 = vadd.f32 %v595_v49, %v579_v40  ;;  %v638_v63 = vmul.f32 %v5989_v45, %v522_v33 }
  0xca   : > { %v517_v1 = vadd.f32 %v511_v44, %v489_v42  ;;  %v538_v3 = vadd.f32 %v532_v46, %v516_v51  ;;  %v622_v4 = vadd.f32 %v616_v54, %v600_v43  ;;  %v533_v5 = vmul.f32 %v5954_v0, %v522_v33  ;;  %v6037_v44 = vld [vmem:[%s6434_s2] ss:$0 sm:$0xff] }
  0xcb   : > { %v554_v7 = vmul.f32 %v5959_v6, %v522_v33  ;;  %v581_v8 = vadd.f32 %v575_v52, %v559_v58  ;;  %v661_v9 = vmul.f32 %v6002_v61, %v566_v62  ;;  %v602_v10 = vadd.f32 %v596_v53, %v580_v59 }
  0xcc   : > { %v623_v11 = vadd.f32 %v617_v57, %v601_v60  ;;  %v644_v12 = vadd.f32 %v638_v63, %v622_v4  ;;  %v597_v15 = vmul.f32 %v5972_v20, %v544_v50  ;;  %v618_v16 = vmul.f32 %v5984_v41, %v544_v50  ;;  %v588_v18 = vpop.permute.xlu0 %587  ;;  %v610_v32 = vpop.permute.xlu1 %609 }
  0xcd   : > { %v639_v17 = vmul.f32 %v5989_v45, %v544_v50  ;;  %v660_v0 = vmul.f32 %v6002_v61, %v544_v50  ;;  %v539_v19 = vadd.f32 %v533_v5, %v517_v1  ;;  %v560_v21 = vadd.f32 %v554_v7, %v538_v3 }
  0xce   : > { %v555_v22 = vmul.f32 %v5959_v6, %v544_v50  ;;  %v576_v23 = vmul.f32 %v5966_v14, %v544_v50  ;;  %v603_v24 = vadd.f32 %v597_v15, %v581_v8  ;;  %v682_v27 = vmul.f32 %v6011_v13, %v566_v62 }
  0xcf   : > { %v645_v25 = vadd.f32 %v639_v17, %v623_v11  ;;  %v666_v26 = vadd.f32 %v660_v0, %v644_v12  ;;  %v577_v29 = vmul.f32 %v5966_v14, %v566_v62  ;;  %v598_v30 = vmul.f32 %v5972_v20, %v566_v62 }
  0xd0   : > { %v624_v31 = vadd.f32 %v618_v16, %v602_v10  ;;  %v619_v6 = vmul.f32 %v5984_v41, %v566_v62  ;;  %v640_v33 = vmul.f32 %v5989_v45, %v566_v62  ;;  %v641_v36 = vmul.f32 %v5989_v45, %v588_v18  ;;  %v632_v46 = vpop.permute.xlu0 %631  ;;  %v654_v10 = vpop.permute.xlu1 %653 }
  0xd1   : > { %v667_v34 = vadd.f32 %v661_v9, %v645_v25  ;;  %v688_v35 = vadd.f32 %v682_v27, %v666_v26  ;;  %v662_v37 = vmul.f32 %v6002_v61, %v588_v18  ;;  %v683_v38 = vmul.f32 %v6011_v13, %v588_v18 }
  0xd2   : > { %v704_v39 = vmul.f32 %v6023_v28, %v588_v18  ;;  %v561_v40 = vadd.f32 %v555_v22, %v539_v19  ;;  %v582_v14 = vadd.f32 %v576_v23, %v560_v21  ;;  %v663_v42 = vmul.f32 %v6002_v61, %v610_v32 }
  0xd3   : > { %v625_v43 = vadd.f32 %v619_v6, %v603_v24  ;;  %v705_v47 = vmul.f32 %v6023_v28, %v610_v32  ;;  %v689_v48 = vadd.f32 %v683_v38, %v667_v34  ;;  %v646_v50 = vadd.f32 %v640_v33, %v624_v31  ;;  %v1694_v38 = vld [vmem:[#allocation3 + $0x128] sm:$0xff] }
  0xd4   : > { %v710_v49 = vadd.f32 %v704_v39, %v688_v35  ;;  %v684_v51 = vmul.f32 %v6011_v13, %v610_v32  ;;  %v599_v52 = vmul.f32 %v5972_v20, %v588_v18  ;;  %v620_v53 = vmul.f32 %v5984_v41, %v588_v18  ;;  %v676_v23 = vpop.permute.xlu0 %675 }
  0xd5   : > { %v647_v54 = vadd.f32 %v641_v36, %v625_v43  ;;  %v711_v57 = vadd.f32 %v705_v47, %v689_v48  ;;  %v668_v58 = vadd.f32 %v662_v37, %v646_v50  ;;  %v685_v60 = vmul.f32 %v6011_v13, %v632_v46  ;;  %v1804_v36 = vld [vmem:[#allocation3 + $0x150] sm:$0xff]  ;;  %v1934_v47 = vld [vmem:[#allocation5 + $0x20] sm:$0xff] }
  0xd6   : > { %v723_v59 = vadd.f32 %v6037_v44, %v710_v49  ;;  %v706_v63 = vmul.f32 %v6023_v28, %v632_v46  ;;  %v583_v1 = vadd.f32 %v577_v29, %v561_v40  ;;  %v604_v3 = vadd.f32 %v598_v30, %v582_v14  ;;  %v1693_v40 = vld [vmem:[#allocation3 + $0x120] sm:$0xff]  ;;  %v1936_v43 = vld [vmem:[#allocation5 + $0x30] sm:$0xff]  ;;  %v2132_v49 = vld [vmem:[#allocation5 + $0x58] sm:$0xff] }
  0xd7   : > { %v669_v62 = vadd.f32 %v663_v42, %v647_v54  ;;  %v690_v4 = vadd.f32 %v684_v51, %v668_v58  ;;  %v724_v5 = vadd.f32 %v6037_v44, %v711_v57  ;;  %v621_v20 = vmul.f32 %v5984_v41, %v610_v32  ;;  %v1937_v42 = vld [vmem:[#allocation5 + $0x38] sm:$0xff]  ;;  %v1931_v51 = vld [vmem:[#allocation5 + $0x10] sm:$0xff]  ;;  %v1929_v54 = vld [vmem:[#allocation5] sm:$0xff] }
  0xd8   : > { %5580 = vtanh.f32 %v723_v59  ;;  %v605_v7 = vadd.f32 %v599_v52, %v583_v1  ;;  %v626_v8 = vadd.f32 %v620_v53, %v604_v3  ;;  %v642_v9 = vmul.f32 %v5989_v45, %v610_v32  ;;  %v698_v32 = vpop.permute.xlu1 %697  ;;  %v1930_v52 = vld [vmem:[#allocation5 + $0x8] sm:$0xff]  ;;  %v2131_v53 = vld [vmem:[#allocation5 + $0x50] sm:$0xff]  ;;  %v2129_v58 = vld [vmem:[#allocation5 + $0x40] sm:$0xff] }
  0xd9   : > { %5582 = vtanh.f32 %v724_v5  ;;  %v643_v11 = vmul.f32 %v5989_v45, %v632_v46  ;;  %v691_v12 = vadd.f32 %v685_v60, %v669_v62  ;;  %v712_v15 = vadd.f32 %v706_v63, %v690_v4  ;;  %v2130_v57 = vld [vmem:[#allocation5 + $0x48] sm:$0xff]  ;;  %v2238_v59 = vld [vmem:[#allocation5 + $0x78] sm:$0xff]  ;;  %v2237_v62 = vld [vmem:[#allocation5 + $0x70] sm:$0xff] }
  0xda   : > { %v627_v16 = vadd.f32 %v621_v20, %v605_v7  ;;  %v664_v17 = vmul.f32 %v6002_v61, %v632_v46  ;;  %v648_v0 = vadd.f32 %v642_v9, %v626_v8  ;;  %v707_v18 = vmul.f32 %v6023_v28, %v654_v10  ;;  %v1935_v46 = vld [vmem:[#allocation5 + $0x28] sm:$0xff]  ;;  %v2344_v60 = vld [vmem:[#allocation5 + $0x98] sm:$0xff]  ;;  %v2343_v1 = vld [vmem:[#allocation5 + $0x90] sm:$0xff] }
  0xdb   : > { %v725_v21 = vadd.f32 %v6037_v44, %v712_v15  ;;  %v665_v24 = vmul.f32 %v6002_v61, %v654_v10  ;;  %v686_v25 = vmul.f32 %v6011_v13, %v654_v10  ;;  %v687_v27 = vmul.f32 %v6011_v13, %v676_v23  ;;  %v1695_v13 = vld [vmem:[#allocation3 + $0x130] sm:$0xff]  ;;  %v2236_v63 = vld [vmem:[#allocation5 + $0x68] sm:$0xff]  ;;  %v2235_v3 = vld [vmem:[#allocation5 + $0x60] sm:$0xff] }
  0xdc   : > { %v713_v19 = vadd.f32 %v707_v18, %v691_v12  ;;  %v649_v41 = vadd.f32 %v643_v11, %v627_v16  ;;  %v670_v22 = vadd.f32 %v664_v17, %v648_v0  ;;  %v708_v30 = vmul.f32 %v6023_v28, %v676_v23  ;;  %v2342_v4 = vld [vmem:[#allocation5 + $0x88] sm:$0xff]  ;;  %v2341_v5 = vld [vmem:[#allocation5 + $0x80] sm:$0xff]  ;;  %v2450_v20 = vld [vmem:[#allocation5 + $0xb8] sm:$0xff] }
  0xdd   : > { %5584 = vtanh.f32 %v725_v21  ;;  %v709_v34 = vmul.f32 %v6023_v28, %v698_v32  ;;  %v2559_v7 = vld [vmem:[#allocation5 + $0xd8] sm:$0xff]  ;;  %v2449_v8 = vld [vmem:[#allocation5 + $0xb0] sm:$0xff]  ;;  %v2448_v9 = vld [vmem:[#allocation5 + $0xa8] sm:$0xff] }
  0xde   : > { %v726_v45 = vadd.f32 %v6037_v44, %v713_v19  ;;  %v671_v26 = vadd.f32 %v665_v24, %v649_v41  ;;  %v692_v29 = vadd.f32 %v686_v25, %v670_v22  ;;  %v2558_v10 = vld [vmem:[#allocation5 + $0xd0] sm:$0xff]  ;;  %v2447_v11 = vld [vmem:[#allocation5 + $0xa0] sm:$0xff]  ;;  %v2557_v12 = vld [vmem:[#allocation5 + $0xc8] sm:$0xff] }
  0xdf   : > { %v2556_v15 = vld [vmem:[#allocation5 + $0xc0] sm:$0xff]  ;;  %v2668_v16 = vld [vmem:[#allocation5 + $0xf8] sm:$0xff]  ;;  %v2667_v0 = vld [vmem:[#allocation5 + $0xf0] sm:$0xff] }
  0xe0   : > { %5586 = vtanh.f32 %v726_v45  ;;  %v693_v61 = vadd.f32 %v687_v27, %v671_v26  ;;  %v714_v33 = vadd.f32 %v708_v30, %v692_v29  ;;  %v2777_v17 = vld [vmem:[#allocation5 + $0x118] sm:$0xff]  ;;  %v2776_v18 = vld [vmem:[#allocation5 + $0x110] sm:$0xff]  ;;  %v2666_v19 = vld [vmem:[#allocation5 + $0xe8] sm:$0xff] }
  0xe1   : > { %v2775_v21 = vld [vmem:[#allocation5 + $0x108] sm:$0xff]  ;;  %v2665_v41 = vld [vmem:[#allocation5 + $0xe0] sm:$0xff]  ;;  %v6129_v23 = vld [vmem:[#allocation5 + $0x138] sm:$0xff] }
  0xe2   : > { %v715_v35 = vadd.f32 %v709_v34, %v693_v61  ;;  %v727_v37 = vadd.f32 %v6037_v44, %v714_v33  ;;  %v2774_v22 = vld [vmem:[#allocation5 + $0x100] sm:$0xff]  ;;  %v6132_v24 = vld [vmem:[#allocation5 + $0x158] sm:$0xff] }
  0xe4   : > { %v728_v28 = vadd.f32 %v6037_v44, %v715_v35  ;;  %5588 = vtanh.f32 %v727_v37  ;;  %v1932_v44 = vld [vmem:[#allocation5 + $0x18] sm:$0xff] }
  0xe5   : > { %v5581_v31 = vpop.eup %5580 }
  0xe6   : > { %5064 = vmatmul.mubr.msk.f32.gmra.mxu1 %vm744_vm0, %v5581_v31  ;;  %5080 = vmatprep.mubr.msk.f32.mxu0 %vm744_vm0, %v5581_v31  ;;  %v5583_v6 = vpop.eup %5582  ;;  %5590 = vtanh.f32 %v728_v28 }
  0xe7   : > { %5091 = vmatprep.mubr.f32.mxu1 %v5742_v2  ;;  %5081 = vmatmul.mubr.msk.f32.gmra.mxu0 %vm744_vm0, %v5583_v6 }
  0xe8   : > { %5108 = vmatprep.mubr.f32.mxu0 %v5742_v2 }
  0xea   : > { %5092 = vmatmul.mubr.f32.vlgmr.msra.gmra.mxu1 %v5742_v2  ;;  %v5585_v39 = vpop.eup %5584 }
  0xeb   : > { %5118 = vmatpush3.msra.mxu1 %v5939_v55  ;;  %5094 = vmatprep.mubr.f32.mxu1 %v5742_v2  ;;  %v1803_v55 = vld [vmem:[#allocation3 + $0x148] sm:$0xff] }
  0xec   : > { %5109 = vmatmul.mubr.f32.vlgmr.msra.gmra.mxu0 %v5742_v2  ;;  %5119 = vmatprep.subr.mxu1 %v1695_v13 }
  0xed   : > { %5111 = vmatprep.mubr.msk.f32.mxu0 %vm744_vm0, %v5581_v31  ;;  %5135 = vmatpush3.msra.mxu0 %v5941_v56  ;;  %v1802_v56 = vld [vmem:[#allocation3 + $0x140] sm:$0xff]  ;;  %v5587_v14 = vpop.eup %5586 }
  0xee   : > { %5120 = vmatpush3.msra.mxu1 %v1695_v13  ;;  %5136 = vmatprep.subr.mxu0 %v1804_v36 }
  0xef   : > { %5095 = vmatmul.mubr.msk.f32.gmra.mxu1 %vm744_vm0, %v5581_v31  ;;  %5121 = vmatprep.subr.mxu1 %v1694_v38 }
  0xf0   : > { %5097 = vmatprep.mubr.msk.f32.mxu1 %vm744_vm0, %v5583_v6  ;;  %5112 = vmatmul.mubr.msk.f32.gmra.mxu0 %vm744_vm0, %v5583_v6 }
  0xf1   : > { %5137 = vmatpush3.msra.mxu0 %v1804_v36  ;;  %5114 = vmatprep.mubr.msk.f32.mxu0 %vm744_vm0, %v5585_v39  ;;  %v5589_v48 = vpop.eup %5588 }
  0xf2   : > { %5122 = vmatpush3.msra.mxu1 %v1694_v38  ;;  %5138 = vmatprep.subr.mxu0 %v1803_v55 }
  0xf3   : > { %5098 = vmatmul.mubr.msk.f32.gmra.mxu1 %vm744_vm0, %v5585_v39  ;;  %5123 = vmatprep.subr.mxu1 %v1693_v40  ;;  %v5591_v50 = vpop.eup %5590 }
  0xf4   : > { %5139 = vmatpush3.msra.mxu0 %v1803_v55  ;;  %5124 = vmatpush3.msra.mxu1 %v1693_v40 }
  0xf5   : > { %5115 = vmatmul.mubr.msk.f32.gmra.mxu0 %vm744_vm0, %v5587_v14  ;;  %5140 = vmatprep.subr.mxu0 %v1802_v56 }
  0xf6   : > { %5142 = vmatprep.mubr.msk.f32.mxu0 %vm744_vm0, %v5581_v31  ;;  %5125 = vmatprep.mubr.f32.mxu1 %v5742_v2 }
  0xf7   : > { %5141 = vmatpush3.msra.mxu0 %v1802_v56  ;;  %5126 = vmatmul.mubr.msk.f32.vlgmr.msra.gmra.mxu1 %vm744_vm0, %v5581_v31 }
  0xf8   : > { %5128 = vmatprep.mubr.msk.f32.mxu1 %vm744_vm0, %v5583_v6  ;;  %5151 = vmatprep.subr.mxu1 %v1937_v42 }
  0xf9   : > { %5143 = vmatmul.mubr.msk.f32.vlgmr.msra.gmra.mxu0 %vm744_vm0, %v5583_v6  ;;  %5152 = vmatpush3.msra.mxu1 %v1937_v42 }
  0xfa   : > { %5145 = vmatprep.mubr.msk.f32.mxu0 %vm744_vm0, %v5585_v39  ;;  %5153 = vmatprep.subr.mxu1 %v1936_v43 }
  0xfb   : > { %5129 = vmatmul.mubr.msk.f32.gmra.mxu1 %vm744_vm0, %v5585_v39  ;;  %5168 = vmatprep.subr.mxu0 %v1932_v44 }
  0xfc   : > { %5131 = vmatprep.mubr.msk.f32.mxu1 %vm744_vm0, %v5587_v14  ;;  %5154 = vmatpush3.msra.mxu1 %v1936_v43 }
  0xfd   : > { %5146 = vmatmul.mubr.msk.f32.gmra.mxu0 %vm744_vm0, %v5587_v14  ;;  %5155 = vmatprep.subr.mxu1 %v1935_v46 }
  0xfe   : > { %5148 = vmatprep.mubr.msk.f32.mxu0 %vm744_vm0, %v5589_v48  ;;  %5156 = vmatpush3.msra.mxu1 %v1935_v46 }
  0xff   : > { %5132 = vmatmul.mubr.msk.f32.gmra.mxu1 %vm744_vm0, %v5589_v48  ;;  %5157 = vmatprep.subr.mxu1 %v1934_v47 }
 0x100   : > { %5158 = vmatpush3.msra.mxu1 %v1934_v47  ;;  %5159 = vmatprep.mubr.f32.mxu1 %v5742_v2 }
 0x101   : > { %5149 = vmatmul.mubr.msk.f32.gmra.mxu0 %vm744_vm0, %v5591_v50  ;;  %5185 = vmatprep.subr.mxu1 %v2132_v49 }
 0x102   : > { %5169 = vmatpush3.msra.mxu0 %v1932_v44  ;;  %5176 = vmatprep.mubr.f32.mxu0 %v5742_v2 }
 0x103   : > { %5160 = vmatmul.mubr.f32.vlgmr.msra.gmra.mxu1 %v5742_v2  ;;  %5170 = vmatprep.subr.mxu0 %v1931_v51 }
 0x104   : > { %5162 = vmatprep.mubr.f32.mxu1 %v5742_v2  ;;  %5171 = vmatpush3.msra.mxu0 %v1931_v51  ;;  %v6135_v26 = vpop.f32.mrf.mxu1 }
 0x105   : > { %5186 = vmatpush3.msra.mxu1 %v2132_v49  ;;  %5172 = vmatprep.subr.mxu0 %v1930_v52 }
 0x106   : > { %5187 = vmatprep.subr.mxu1 %v2131_v53  ;;  %5173 = vmatpush3.msra.mxu0 %v1930_v52  ;;  %v4974_v25 = vpop.f32.mrf.mxu0  ;;  %v6137_v29 = vpop.f32.mrf.mxu1 }
 0x107   : > { %5163 = vmatmul.mubr.f32.gmra.mxu1 %v5742_v2  ;;  %5174 = vmatprep.subr.mxu0 %v1929_v54 }
 0x108   : > { %5165 = vmatprep.mubr.f32.mxu1 %v5742_v2  ;;  %5188 = vmatpush3.msra.mxu1 %v2131_v53  ;;  %v814_v45 = vpop.f32.mrf.mxu0 }
 0x109   : > { %5189 = vmatprep.subr.mxu1 %v2130_v57  ;;  %5175 = vmatpush3.msra.mxu0 %v1929_v54 }
 0x10a   : > { %5190 = vmatpush3.msra.mxu1 %v2130_v57  ;;  %5177 = vmatmul.mubr.f32.vlgmr.msra.gmra.mxu0 %v5742_v2 }
 0x10b   : > { %5166 = vmatmul.mubr.f32.gmra.mxu1 %v5742_v2  ;;  %5191 = vmatprep.subr.mxu1 %v2129_v58 }
 0x10c   : > { %5192 = vmatpush3.msra.mxu1 %v2129_v58  ;;  %5193 = vmatprep.mubr.f32.mxu1 %v5742_v2 }
 0x10d   : > { %5179 = vmatprep.mubr.f32.mxu0 %v5742_v2  ;;  %5202 = vmatprep.subr.mxu0 %v2238_v59 }
 0x10e   : > { %5180 = vmatmul.mubr.f32.gmra.mxu0 %v5742_v2  ;;  %5219 = vmatprep.subr.mxu1 %v2344_v60  ;;  %v4977_v27 = vpop.f32.mrf.mxu0 }
 0x10f   : > { %5194 = vmatmul.mubr.f32.vlgmr.msra.gmra.mxu1 %v5742_v2  ;;  %5203 = vmatpush3.msra.mxu0 %v2238_v59 }
 0x110   : > { %5196 = vmatprep.mubr.f32.mxu1 %v5742_v2  ;;  %5204 = vmatprep.subr.mxu0 %v2237_v62  ;;  %v824_v30 = vpop.f32.mrf.mxu0  ;;  %v4991_v31 = vpop.f32.mrf.mxu1 }
 0x111   : > { %5182 = vmatprep.mubr.f32.mxu0 %v5742_v2  ;;  %5205 = vmatpush3.msra.mxu0 %v2237_v62  ;;  %v915_v52 = vadd.f32 %v4991_v31, %v4974_v25 }
 0x112   : > { %5220 = vmatpush3.msra.mxu1 %v2344_v60  ;;  %5183 = vmatmul.mubr.f32.gmra.mxu0 %v5742_v2  ;;  %v909_v6 = vpop.f32.mrf.mxu1 }
 0x113   : > { %5197 = vmatmul.mubr.f32.gmra.mxu1 %v5742_v2  ;;  %5206 = vmatprep.subr.mxu0 %v2236_v63  ;;  %v910_v54 = vadd.f32 %v909_v6, %v814_v45 }
 0x114   : > { %5221 = vmatprep.subr.mxu1 %v2343_v1  ;;  %5199 = vmatprep.mubr.f32.mxu1 %v5742_v2  ;;  %v5008_v32 = vpop.f32.mrf.mxu0  ;;  %v4994_v33 = vpop.f32.mrf.mxu1 }
 0x115   : > { %5207 = vmatpush3.msra.mxu0 %v2236_v63  ;;  %5222 = vmatpush3.msra.mxu1 %v2343_v1  ;;  %v1039_v58 = vadd.f32 %v5008_v32, %v915_v52 }
 0x116   : > { %5208 = vmatprep.subr.mxu0 %v2235_v3  ;;  %5223 = vmatprep.subr.mxu1 %v2342_v4  ;;  %v1009_v61 = vpop.f32.mrf.mxu0  ;;  %v919_v13 = vpop.f32.mrf.mxu1 }
 0x117   : > { %5200 = vmatmul.mubr.f32.gmra.mxu1 %v5742_v2  ;;  %5209 = vmatpush3.msra.mxu0 %v2235_v3  ;;  %v1038_v60 = vadd.f32 %v1009_v61, %v910_v54  ;;  %v920_v63 = vadd.f32 %v919_v13, %v824_v30 }
 0x118   : > { %5210 = vmatprep.mubr.f32.mxu0 %v5742_v2  ;;  %5224 = vmatpush3.msra.mxu1 %v2342_v4 }
 0x119   : > { %5211 = vmatmul.mubr.f32.vlgmr.msra.gmra.mxu0 %v5742_v2  ;;  %5225 = vmatprep.subr.mxu1 %v2341_v5 }
 0x11a   : > { %5226 = vmatpush3.msra.mxu1 %v2341_v5  ;;  %5227 = vmatprep.mubr.f32.mxu1 %v5742_v2  ;;  %v5011_v34 = vpop.f32.mrf.mxu0 }
 0x11b   : > { %5228 = vmatmul.mubr.f32.vlgmr.msra.gmra.mxu1 %v5742_v2  ;;  %5213 = vmatprep.mubr.f32.mxu0 %v5742_v2  ;;  %v4997_v36 = vpop.f32.mrf.mxu1 }
 0x11c   : > { %5236 = vmatprep.subr.mxu0 %v2450_v20  ;;  %5230 = vmatprep.mubr.f32.mxu1 %v5742_v2  ;;  %v1019_v35 = vpop.f32.mrf.mxu0 }
 0x11d   : > { %5214 = vmatmul.mubr.f32.gmra.mxu0 %v5742_v2  ;;  %5253 = vmatprep.subr.mxu1 %v2559_v7  ;;  %v929_v38 = vpop.f32.mrf.mxu1 }
 0x11e   : > { %5237 = vmatpush3.msra.mxu0 %v2450_v20  ;;  %5216 = vmatprep.mubr.f32.mxu0 %v5742_v2  ;;  %v930_v6 = vadd.f32 %v929_v38, %v6137_v29 }
 0x11f   : > { %5231 = vmatmul.mubr.f32.gmra.mxu1 %v5742_v2  ;;  %5238 = vmatprep.subr.mxu0 %v2449_v8  ;;  %v6139_v37 = vpop.f32.mrf.mxu0 }
 0x120   : > { %5239 = vmatpush3.msra.mxu0 %v2449_v8  ;;  %5254 = vmatpush3.msra.mxu1 %v2559_v7  ;;  %v925_v7 = vadd.f32 %v4994_v33, %v4977_v27  ;;  %v1040_v8 = vadd.f32 %v1019_v35, %v920_v63 }
 0x121   : > { %5217 = vmatmul.mubr.f32.gmra.mxu0 %v5742_v2  ;;  %5240 = vmatprep.subr.mxu0 %v2448_v9  ;;  %v1029_v28 = vpop.f32.mrf.mxu0  ;;  %v5025_v55 = vpop.f32.mrf.mxu1 }
 0x122   : > { %5255 = vmatprep.subr.mxu1 %v2558_v10  ;;  %5233 = vmatprep.mubr.f32.mxu1 %v5742_v2  ;;  %v1145_v1 = vadd.f32 %v5025_v55, %v1039_v58 }
 0x123   : > { %5241 = vmatpush3.msra.mxu0 %v2448_v9  ;;  %5256 = vmatpush3.msra.mxu1 %v2558_v10  ;;  %v1115_v40 = vpop.f32.mrf.mxu1 }
 0x124   : > { %5234 = vmatmul.mubr.f32.gmra.mxu1 %v5742_v2  ;;  %5244 = vmatprep.mubr.f32.mxu0 %v5742_v2  ;;  %v5042_v39 = vpop.f32.mrf.mxu0  ;;  %v1144_v4 = vadd.f32 %v1115_v40, %v1038_v60  ;;  %v935_v40 = vadd.f32 %v4997_v36, %v6135_v26  ;;  %v6159_v26 = vld [vmem:[%s6436_s4] ss:$0 sm:$0xff] }
 0x125   : > { %5261 = vmatprep.mubr.f32.mxu1 %v5742_v2  ;;  %5242 = vmatprep.subr.mxu0 %v2447_v11  ;;  %v5028_v14 = vpop.f32.mrf.mxu1  ;;  %v1251_v9 = vadd.f32 %v5042_v39, %v1145_v1 }
 0x126   : > { %5257 = vmatprep.subr.mxu1 %v2557_v12  ;;  %5243 = vmatpush3.msra.mxu0 %v2447_v11  ;;  %v1221_v56 = vpop.f32.mrf.mxu0  ;;  %v1043_v29 = vadd.f32 %v6139_v37, %v935_v40  ;;  %v2884_v40 = vld [vmem:[#allocation5 + $0x128] sm:$0xff] }
 0x127   : > { %5258 = vmatpush3.msra.mxu1 %v2557_v12  ;;  %5245 = vmatmul.mubr.f32.vlgmr.msra.gmra.mxu0 %v5742_v2  ;;  %v1125_v43 = vpop.f32.mrf.mxu1  ;;  %v1250_v12 = vadd.f32 %v1221_v56, %v1144_v4 }
 0x128   : > { %5259 = vmatprep.subr.mxu1 %v2556_v15  ;;  %5247 = vmatprep.mubr.f32.mxu0 %v5742_v2  ;;  %v5045_v42 = vpop.f32.mrf.mxu0 }
 0x129   : > { %5260 = vmatpush3.msra.mxu1 %v2556_v15  ;;  %5270 = vmatprep.subr.mxu0 %v2668_v16  ;;  %v6141_v46 = vpop.f32.mrf.mxu1 }
 0x12a   : > { %5262 = vmatmul.mubr.f32.vlgmr.msra.gmra.mxu1 %v5742_v2  ;;  %5287 = vmatprep.subr.mxu1 %v2777_v17  ;;  %v1231_v44 = vpop.f32.mrf.mxu0  ;;  %v1149_v4 = vadd.f32 %v6141_v46, %v1043_v29  ;;  %v3322_v29 = vld [vmem:[#allocation7 + $0x58] sm:$0xff] }
 0x12b   : > { %5264 = vmatprep.mubr.f32.mxu1 %v5742_v2  ;;  %5248 = vmatmul.mubr.f32.gmra.mxu0 %v5742_v2  ;;  %v1135_v48 = vpop.f32.mrf.mxu1 }
 0x12c   : > { %5250 = vmatprep.mubr.f32.mxu0 %v5742_v2  ;;  %5271 = vmatpush3.msra.mxu0 %v2668_v16  ;;  %v6143_v47 = vpop.f32.mrf.mxu0 }
 0x12d   : > { %5288 = vmatpush3.msra.mxu1 %v2777_v17  ;;  %5272 = vmatprep.subr.mxu0 %v2667_v0  ;;  %v1041_v17 = vadd.f32 %v5011_v34, %v925_v7 }
 0x12e   : > { %5265 = vmatmul.mubr.f32.gmra.mxu1 %v5742_v2  ;;  %5289 = vmatprep.subr.mxu1 %v2776_v18  ;;  %v6145_v49 = vpop.f32.mrf.mxu0 }
 0x12f   : > { %5273 = vmatpush3.msra.mxu0 %v2667_v0  ;;  %5290 = vmatpush3.msra.mxu1 %v2776_v18  ;;  %v5059_v50 = vpop.f32.mrf.mxu1  ;;  %v1146_v0 = vadd.f32 %v1125_v43, %v1040_v8  ;;  %v1147_v25 = vadd.f32 %v5028_v14, %v1041_v17 }
 0x130   : > { %5274 = vmatprep.subr.mxu0 %v2666_v19  ;;  %5291 = vmatprep.subr.mxu1 %v2775_v21  ;;  %v1360_v18 = vadd.f32 %v5059_v50, %v1251_v9  ;;  %v1042_v50 = vadd.f32 %v1029_v28, %v930_v6 }
 0x131   : > { %5275 = vmatpush3.msra.mxu0 %v2666_v19  ;;  %5292 = vmatpush3.msra.mxu1 %v2775_v21  ;;  %v1330_v53 = vpop.f32.mrf.mxu1  ;;  %v1252_v45 = vadd.f32 %v1231_v44, %v1146_v0  ;;  %v1253_v35 = vadd.f32 %v5045_v42, %v1147_v25 }
 0x132   : > { %5276 = vmatprep.subr.mxu0 %v2665_v41  ;;  %5293 = vmatprep.subr.mxu1 %v2774_v22  ;;  %v5076_v51 = vpop.f32.mrf.mxu0  ;;  %v1148_v60 = vadd.f32 %v1135_v48, %v1042_v50  ;;  %v2883_v50 = vld [vmem:[#allocation5 + $0x120] sm:$0xff] }
 0x133   : > { %5277 = vmatpush3.msra.mxu0 %v2665_v41  ;;  %5294 = vmatpush3.msra.mxu1 %v2774_v22  ;;  %v5062_v59 = vpop.f32.mrf.mxu1  ;;  %v1359_v41 = vadd.f32 %v1330_v53, %v1250_v12  ;;  %v1469_v27 = vadd.f32 %v5076_v51, %v1360_v18 }
 0x134   : > { %5304 = vmatprep.subr.mxu0 %v6129_v23  ;;  %5321 = vmatprep.subr.mxu1 %v6132_v24  ;;  %v1439_v57 = vpop.f32.mrf.mxu0  ;;  %v1362_v44 = vadd.f32 %v5062_v59, %v1253_v35  ;;  %v1254_v48 = vadd.f32 %v6145_v49, %v1148_v60  ;;  %v2885_v35 = vld [vmem:[#allocation5 + $0x130] sm:$0xff] }
 0x135   : > { %v1340_v3 = vpop.f32.mrf.mxu1  ;;  %v1468_v61 = vadd.f32 %v1439_v57, %v1359_v41  ;;  %v3321_v60 = vld [vmem:[#allocation7 + $0x50] sm:$0xff] }
 0x136   : > { %v5079_v62 = vpop.f32.mrf.mxu0  ;;  %v1361_v55 = vadd.f32 %v1340_v3, %v1252_v45 }
 0x137   : > { %v1471_v28 = vadd.f32 %v5079_v62, %v1362_v44  ;;  %v1255_v62 = vadd.f32 %v6143_v47, %v1149_v4  ;;  %v3127_v44 = vld [vmem:[#allocation7 + $0x38] sm:$0xff]  ;;  %v3533_v4 = vld [vmem:[#allocation7 + $0x90] sm:$0xff] }
 0x138   : > { %v1449_v5 = vpop.f32.mrf.mxu0 }
 0x139   : > { %v1470_v52 = vadd.f32 %v1449_v5, %v1361_v55 }
 0x1a6   : > { %v6147_v20 = vpop.f32.mrf.mxu1 }
 0x1a7   : > { %v6149_v10 = vpop.f32.mrf.mxu0  ;;  %v1364_v46 = vadd.f32 %v6147_v20, %v1255_v62  ;;  %v3746_v62 = vld [vmem:[#allocation7 + $0xc0] sm:$0xff] }
 0x1a8   : > { %v1350_v11 = vpop.f32.mrf.mxu1 }
 0x1a9   : > { %v6151_v15 = vpop.f32.mrf.mxu0  ;;  %v1363_v17 = vadd.f32 %v1350_v11, %v1254_v48  ;;  %v1473_v49 = vadd.f32 %v6149_v10, %v1364_v46  ;;  %v3639_v48 = vld [vmem:[#allocation7 + $0xb0] sm:$0xff]  ;;  %v3967_v46 = vld [vmem:[#allocation7 + $0x118] sm:$0xff] }
 0x1aa   : > { %v5093_v16 = vpop.f32.mrf.mxu1 }
 0x1ab   : > { %v1578_v33 = vadd.f32 %v5093_v16, %v1469_v27  ;;  %v1472_v41 = vadd.f32 %v6151_v15, %v1363_v17  ;;  %v3637_v17 = vld [vmem:[#allocation7 + $0xa0] sm:$0xff] }
 0x1ac   : > { %v5110_v19 = vpop.f32.mrf.mxu0  ;;  %v1548_v21 = vpop.f32.mrf.mxu1 }
 0x1ad   : > { %v1577_v39 = vadd.f32 %v1548_v21, %v1468_v61  ;;  %v1687_v14 = vadd.f32 %v5110_v19, %v1578_v33 }
 0x1ae   : > { %v1657_v22 = vpop.f32.mrf.mxu0 }
 0x1af   : > { %v5096_v30 = vpop.f32.mrf.mxu1  ;;  %v1686_v54 = vadd.f32 %v1657_v22, %v1577_v39 }
 0x1b0   : > { %v5113_v31 = vpop.f32.mrf.mxu0  ;;  %v1580_v5 = vadd.f32 %v5096_v30, %v1471_v28  ;;  %v3428_v28 = vld [vmem:[#allocation7 + $0x78] sm:$0xff] }
 0x1b1   : > { %v1558_v32 = vpop.f32.mrf.mxu1 }
 0x1b2   : > { %v1667_v13 = vpop.f32.mrf.mxu0  ;;  %v1579_v38 = vadd.f32 %v1558_v32, %v1470_v52  ;;  %v1689_v18 = vadd.f32 %v5113_v31, %v1580_v5  ;;  %v3126_v52 = vld [vmem:[#allocation7 + $0x30] sm:$0xff]  ;;  %v3425_v5 = vld [vmem:[#allocation7 + $0x60] sm:$0xff] }
 0x1b3   : > { %v5099_v34 = vpop.f32.mrf.mxu1 }
 0x1b4   : > { %v1688_v7 = vadd.f32 %v1667_v13, %v1579_v38  ;;  %v1582_v11 = vadd.f32 %v5099_v34, %v1473_v49  ;;  %v2994_v34 = vld [vmem:[#allocation5 + $0x150] sm:$0xff]  ;;  %v3964_v49 = vld [vmem:[#allocation7 + $0x100] sm:$0xff] }
 0x1b5   : > { %v5116_v56 = vpop.f32.mrf.mxu0  ;;  %v1568_v43 = vpop.f32.mrf.mxu1 }
 0x1b6   : > { %v1581_v25 = vadd.f32 %v1568_v43, %v1472_v41  ;;  %v1691_v61 = vadd.f32 %v5116_v56, %v1582_v11  ;;  %v3856_v41 = vld [vmem:[#allocation7 + $0xe8] sm:$0xff]  ;;  %v6244_v11 = vld [vmem:[#allocation7 + $0x158] sm:$0xff] }
 0x1b7   : > { %v1677_v51 = vpop.f32.mrf.mxu0  ;;  %v5127_v53 = vpop.f32.mrf.mxu1 }
 0x1b8   : > { %v1796_v58 = vadd.f32 %v5127_v53, %v1687_v14  ;;  %v1690_v6 = vadd.f32 %v1677_v51, %v1581_v25  ;;  %v3122_v51 = vld [vmem:[#allocation7 + $0x18] sm:$0xff]  ;;  %v3125_v53 = vld [vmem:[#allocation7 + $0x28] sm:$0xff]  ;;  %v3855_v25 = vld [vmem:[#allocation7 + $0xe0] sm:$0xff] }
 0x1b9   : > { %v5144_v57 = vpop.f32.mrf.mxu0  ;;  %v1766_v42 = vpop.f32.mrf.mxu1 }
 0x1ba   : > { %v1905_v63 = vadd.f32 %v5144_v57, %v1796_v58  ;;  %v1795_v36 = vadd.f32 %v1766_v42, %v1686_v54  ;;  %v3124_v54 = vld [vmem:[#allocation7 + $0x20] sm:$0xff]  ;;  %v3121_v57 = vld [vmem:[#allocation7 + $0x10] sm:$0xff]  ;;  %v3120_v42 = vld [vmem:[#allocation7 + $0x8] sm:$0xff] }
 0x1bb   : > { %v1875_v59 = vpop.f32.mrf.mxu0  ;;  %v5130_v1 = vpop.f32.mrf.mxu1 }
 0x1bc   : > { %v1904_v3 = vadd.f32 %v1875_v59, %v1795_v36  ;;  %v1918_v37 = vadd.f32 %v6159_v26, %v1905_v63  ;;  %v1798_v19 = vadd.f32 %v5130_v1, %v1689_v18  ;;  %v3119_v63 = vld [vmem:[#allocation7] sm:$0xff]  ;;  %v3534_v59 = vld [vmem:[#allocation7 + $0x98] sm:$0xff]  ;;  %v3427_v1 = vld [vmem:[#allocation7 + $0x70] sm:$0xff] }
 0x1bd   : > { %v5147_v8 = vpop.f32.mrf.mxu0  ;;  %v1776_v9 = vpop.f32.mrf.mxu1  ;;  %v3319_v36 = vld [vmem:[#allocation7 + $0x40] sm:$0xff]  ;;  %v3858_v18 = vld [vmem:[#allocation7 + $0xf8] sm:$0xff] }
 0x1be   : > { %v1917_v12 = vadd.f32 %v6159_v26, %v1904_v3  ;;  %v1797_v16 = vadd.f32 %v1776_v9, %v1688_v7  ;;  %v1907_v45 = vadd.f32 %v5147_v8, %v1798_v19  ;;  %v3426_v3 = vld [vmem:[#allocation7 + $0x68] sm:$0xff]  ;;  %v3640_v8 = vld [vmem:[#allocation7 + $0xb8] sm:$0xff]  ;;  %v3857_v19 = vld [vmem:[#allocation7 + $0xf0] sm:$0xff] }
 0x1bf   : > { %v1885_v0 = vpop.f32.mrf.mxu0  ;;  %v5133_v22 = vpop.f32.mrf.mxu1  ;;  %v3532_v7 = vld [vmem:[#allocation7 + $0x88] sm:$0xff]  ;;  %v3749_v9 = vld [vmem:[#allocation7 + $0xd8] sm:$0xff] }
 0x1c0   : > { %5592 = vtanh.f32 %v1917_v12  ;;  %v1906_v21 = vadd.f32 %v1885_v0, %v1797_v16  ;;  %v1920_v47 = vadd.f32 %v6159_v26, %v1907_v45  ;;  %v1800_v10 = vadd.f32 %v5133_v22, %v1691_v61  ;;  %v3638_v12 = vld [vmem:[#allocation7 + $0xa8] sm:$0xff]  ;;  %v3748_v16 = vld [vmem:[#allocation7 + $0xd0] sm:$0xff]  ;;  %v6241_v45 = vld [vmem:[#allocation7 + $0x138] sm:$0xff] }
 0x1c1   : > { %5594 = vtanh.f32 %v1918_v37  ;;  %v5150_v27 = vpop.f32.mrf.mxu0  ;;  %v1786_v32 = vpop.f32.mrf.mxu1  ;;  %v3531_v37 = vld [vmem:[#allocation7 + $0x80] sm:$0xff]  ;;  %v3747_v0 = vld [vmem:[#allocation7 + $0xc8] sm:$0xff] }
 0x1c2   : > { %v1919_v30 = vadd.f32 %v6159_v26, %v1906_v21  ;;  %v1799_v31 = vadd.f32 %v1786_v32, %v1690_v6  ;;  %v1909_v55 = vadd.f32 %v5150_v27, %v1800_v10  ;;  %v3966_v21 = vld [vmem:[#allocation7 + $0x110] sm:$0xff]  ;;  %v3965_v22 = vld [vmem:[#allocation7 + $0x108] sm:$0xff] }
 0x1c3   : > { %v1895_v33 = vpop.f32.mrf.mxu0 }
 0x1c4   : > { %5596 = vtanh.f32 %v1919_v30  ;;  %v1908_v15 = vadd.f32 %v1895_v33, %v1799_v31  ;;  %v1922_v56 = vadd.f32 %v6159_v26, %v1909_v55  ;;  %v5161_v30 = vpop.f32.mrf.mxu1 }
 0x1c5   : > { %5598 = vtanh.f32 %v1920_v47 }
 0x1c6   : > { %v1921_v39 = vadd.f32 %v6159_v26, %v1908_v15  ;;  %v3320_v26 = vld [vmem:[#allocation7 + $0x48] sm:$0xff]  ;;  %v2004_v27 = vpop.f32.mrf.mxu1 }
 0x1c8   : > { %5600 = vtanh.f32 %v1921_v39  ;;  %v5164_v32 = vpop.f32.mrf.mxu1 }
 0x1c9   : > { %5602 = vtanh.f32 %v1922_v56 }
 0x1ca   : > { %v2014_v6 = vpop.f32.mrf.mxu1 }
 0x1cc   : > { %v6247_v47 = vpop.f32.mrf.mxu1 }
 0x1cd   : > { %v5593_v20 = vpop.eup %5592 }
 0x1ce   : > { %v5595_v13 = vpop.eup %5594  ;;  %5251 = vmatmul.mubr.msk.f32.gmra.mxu0 %vm744_vm0, %v5593_v20  ;;  %5267 = vmatprep.mubr.msk.f32.mxu1 %vm744_vm0, %v5593_v20  ;;  %v6249_v31 = vpop.f32.mrf.mxu1 }
 0x1cf   : > { %5268 = vmatmul.mubr.msk.f32.gmra.mxu1 %vm744_vm0, %v5595_v13  ;;  %5278 = vmatprep.mubr.f32.mxu0 %v5742_v2 }
 0x1d0   : > { %5295 = vmatprep.mubr.f32.mxu1 %v5742_v2  ;;  %v5195_v61 = vpop.f32.mrf.mxu1 }
 0x1d1   : > { %v5597_v43 = vpop.eup %5596 }
 0x1d2   : > { %5279 = vmatmul.mubr.f32.vlgmr.msra.gmra.mxu0 %v5742_v2  ;;  %v5599_v14 = vpop.eup %5598 }
 0x1d3   : > { %5305 = vmatpush3.msra.mxu0 %v6129_v23  ;;  %5296 = vmatmul.mubr.f32.vlgmr.msra.gmra.mxu1 %v5742_v2  ;;  %v2993_v23 = vld [vmem:[#allocation5 + $0x148] sm:$0xff] }
 0x1d4   : > { %5298 = vmatprep.mubr.msk.f32.mxu1 %vm744_vm0, %v5593_v20  ;;  %5306 = vmatprep.subr.mxu0 %v2885_v35 }
 0x1d5   : > { %5322 = vmatpush3.msra.mxu1 %v6132_v24  ;;  %5281 = vmatprep.mubr.f32.mxu0 %v5742_v2  ;;  %v2992_v24 = vld [vmem:[#allocation5 + $0x140] sm:$0xff]  ;;  %v5601_v58 = vpop.eup %5600 }
 0x1d6   : > { %5307 = vmatpush3.msra.mxu0 %v2885_v35  ;;  %5323 = vmatprep.subr.mxu1 %v2994_v34  ;;  %v5603_v38 = vpop.eup %5602 }
 0x1d7   : > { %5282 = vmatmul.mubr.msk.f32.gmra.mxu0 %vm744_vm0, %v5593_v20  ;;  %5299 = vmatmul.mubr.msk.f32.gmra.mxu1 %vm744_vm0, %v5595_v13 }
 0x1d8   : > { %5284 = vmatprep.mubr.msk.f32.mxu0 %vm744_vm0, %v5595_v13  ;;  %5308 = vmatprep.subr.mxu0 %v2884_v40 }
 0x1d9   : > { %5324 = vmatpush3.msra.mxu1 %v2994_v34  ;;  %5301 = vmatprep.mubr.msk.f32.mxu1 %vm744_vm0, %v5597_v43 }
 0x1da   : > { %5309 = vmatpush3.msra.mxu0 %v2884_v40  ;;  %5325 = vmatprep.subr.mxu1 %v2993_v23 }
 0x1db   : > { %5285 = vmatmul.mubr.msk.f32.gmra.mxu0 %vm744_vm0, %v5597_v43  ;;  %5310 = vmatprep.subr.mxu0 %v2883_v50 }
 0x1dc   : > { %5326 = vmatpush3.msra.mxu1 %v2993_v23  ;;  %5311 = vmatpush3.msra.mxu0 %v2883_v50 }
 0x1dd   : > { %5302 = vmatmul.mubr.msk.f32.gmra.mxu1 %vm744_vm0, %v5599_v14  ;;  %5327 = vmatprep.subr.mxu1 %v2992_v24 }
 0x1de   : > { %5329 = vmatprep.mubr.msk.f32.mxu1 %vm744_vm0, %v5593_v20  ;;  %5312 = vmatprep.mubr.f32.mxu0 %v5742_v2 }
 0x1df   : > { %5328 = vmatpush3.msra.mxu1 %v2992_v24  ;;  %5313 = vmatmul.mubr.msk.f32.vlgmr.msra.gmra.mxu0 %vm744_vm0, %v5593_v20  ;;  %v5178_v20 = vpop.f32.mrf.mxu0 }
 0x1e0   : > { %5315 = vmatprep.mubr.msk.f32.mxu0 %vm744_vm0, %v5595_v13  ;;  %5338 = vmatprep.subr.mxu0 %v3127_v44 }
 0x1e1   : > { %5330 = vmatmul.mubr.msk.f32.vlgmr.msra.gmra.mxu1 %vm744_vm0, %v5595_v13  ;;  %5339 = vmatpush3.msra.mxu0 %v3127_v44  ;;  %v2099_v33 = vpop.f32.mrf.mxu0  ;;  %v2199_v13 = vpop.f32.mrf.mxu1 }
 0x1e2   : > { %5332 = vmatprep.mubr.msk.f32.mxu1 %vm744_vm0, %v5597_v43  ;;  %5340 = vmatprep.subr.mxu0 %v3126_v52 }
 0x1e3   : > { %5316 = vmatmul.mubr.msk.f32.gmra.mxu0 %vm744_vm0, %v5597_v43  ;;  %5355 = vmatprep.subr.mxu1 %v3122_v51  ;;  %v5181_v10 = vpop.f32.mrf.mxu0  ;;  %v5198_v15 = vpop.f32.mrf.mxu1 }
 0x1e4   : > { %5318 = vmatprep.mubr.msk.f32.mxu0 %vm744_vm0, %v5599_v14  ;;  %5341 = vmatpush3.msra.mxu0 %v3126_v52 }
 0x1e5   : > { %5333 = vmatmul.mubr.msk.f32.gmra.mxu1 %vm744_vm0, %v5599_v14  ;;  %5342 = vmatprep.subr.mxu0 %v3125_v53  ;;  %v2109_v35 = vpop.f32.mrf.mxu0  ;;  %v2209_v55 = vpop.f32.mrf.mxu1 }
 0x1e6   : > { %5335 = vmatprep.mubr.msk.f32.mxu1 %vm744_vm0, %v5601_v58  ;;  %5343 = vmatpush3.msra.mxu0 %v3125_v53 }
 0x1e7   : > { %5319 = vmatmul.mubr.msk.f32.gmra.mxu0 %vm744_vm0, %v5601_v58  ;;  %5344 = vmatprep.subr.mxu0 %v3124_v54  ;;  %v5184_v34 = vpop.f32.mrf.mxu0  ;;  %v6251_v39 = vpop.f32.mrf.mxu1 }
 0x1e8   : > { %5345 = vmatpush3.msra.mxu0 %v3124_v54  ;;  %5346 = vmatprep.mubr.f32.mxu0 %v5742_v2 }
 0x1e9   : > { %5336 = vmatmul.mubr.msk.f32.gmra.mxu1 %vm744_vm0, %v5603_v38  ;;  %5372 = vmatprep.subr.mxu0 %v3322_v29  ;;  %v2119_v40 = vpop.f32.mrf.mxu0  ;;  %v2219_v56 = vpop.f32.mrf.mxu1 }
 0x1ea   : > { %5356 = vmatpush3.msra.mxu1 %v3122_v51  ;;  %5363 = vmatprep.mubr.f32.mxu1 %v5742_v2 }
 0x1eb   : > { %5347 = vmatmul.mubr.f32.vlgmr.msra.gmra.mxu0 %v5742_v2  ;;  %5357 = vmatprep.subr.mxu1 %v3121_v57  ;;  %v5212_v23 = vpop.f32.mrf.mxu0  ;;  %v5229_v43 = vpop.f32.mrf.mxu1 }
 0x1ec   : > { %5349 = vmatprep.mubr.f32.mxu0 %v5742_v2  ;;  %5358 = vmatpush3.msra.mxu1 %v3121_v57 }
 0x1ed   : > { %5373 = vmatpush3.msra.mxu0 %v3322_v29  ;;  %5359 = vmatprep.subr.mxu1 %v3120_v42  ;;  %v2305_v50 = vpop.f32.mrf.mxu0  ;;  %v2411_v24 = vpop.f32.mrf.mxu1 }
 0x1ee   : > { %5374 = vmatprep.subr.mxu0 %v3321_v60  ;;  %5360 = vmatpush3.msra.mxu1 %v3120_v42  ;;  %v2105_v42 = vadd.f32 %v5178_v20, %v5161_v30 }
 0x1ef   : > { %5350 = vmatmul.mubr.f32.gmra.mxu0 %v5742_v2  ;;  %5361 = vmatprep.subr.mxu1 %v3119_v63  ;;  %v5215_v14 = vpop.f32.mrf.mxu0  ;;  %v5232_v44 = vpop.f32.mrf.mxu1 }
 0x1f0   : > { %5352 = vmatprep.mubr.f32.mxu0 %v5742_v2  ;;  %5375 = vmatpush3.msra.mxu0 %v3321_v60 }
 0x1f1   : > { %5376 = vmatprep.subr.mxu0 %v3320_v26  ;;  %5362 = vmatpush3.msra.mxu1 %v3119_v63  ;;  %v2315_v52 = vpop.f32.mrf.mxu0  ;;  %v2421_v51 = vpop.f32.mrf.mxu1 }
 0x1f2   : > { %5377 = vmatpush3.msra.mxu0 %v3320_v26  ;;  %5364 = vmatmul.mubr.f32.vlgmr.msra.gmra.mxu1 %v5742_v2  ;;  %v2100_v26 = vadd.f32 %v2099_v33, %v2004_v27 }
 0x1f3   : > { %5353 = vmatmul.mubr.f32.gmra.mxu0 %v5742_v2  ;;  %5378 = vmatprep.subr.mxu0 %v3319_v36  ;;  %v6253_v53 = vpop.f32.mrf.mxu0  ;;  %v6255_v54 = vpop.f32.mrf.mxu1 }
 0x1f4   : > { %5379 = vmatpush3.msra.mxu0 %v3319_v36  ;;  %5380 = vmatprep.mubr.f32.mxu0 %v5742_v2  ;;  %v2229_v36 = vadd.f32 %v5195_v61, %v2105_v42 }
 0x1f5   : > { %5366 = vmatprep.mubr.f32.mxu1 %v5742_v2  ;;  %5389 = vmatprep.subr.mxu1 %v3428_v28  ;;  %v2325_v58 = vpop.f32.mrf.mxu0  ;;  %v6257_v29 = vpop.f32.mrf.mxu1 }
 0x1f6   : > { %5367 = vmatmul.mubr.f32.gmra.mxu1 %v5742_v2  ;;  %5406 = vmatprep.subr.mxu0 %v3534_v59 }
 0x1f7   : > { %5381 = vmatmul.mubr.f32.vlgmr.msra.gmra.mxu0 %v5742_v2  ;;  %5390 = vmatpush3.msra.mxu1 %v3428_v28  ;;  %v5246_v38 = vpop.f32.mrf.mxu0  ;;  %v5263_v57 = vpop.f32.mrf.mxu1 }
 0x1f8   : > { %5383 = vmatprep.mubr.f32.mxu0 %v5742_v2  ;;  %5391 = vmatprep.subr.mxu1 %v3427_v1 }
 0x1f9   : > { %5369 = vmatprep.mubr.f32.mxu1 %v5742_v2  ;;  %5392 = vmatpush3.msra.mxu1 %v3427_v1  ;;  %v2520_v60 = vpop.f32.mrf.mxu0  ;;  %v2629_v63 = vpop.f32.mrf.mxu1  ;;  %v2228_v1 = vadd.f32 %v2199_v13, %v2100_v26  ;;  %v2120_v13 = vadd.f32 %v2119_v40, %v6249_v31 }
 0x1fa   : > { %5407 = vmatpush3.msra.mxu0 %v3534_v59  ;;  %5370 = vmatmul.mubr.f32.gmra.mxu1 %v5742_v2 }
 0x1fb   : > { %5384 = vmatmul.mubr.f32.gmra.mxu0 %v5742_v2  ;;  %5393 = vmatprep.subr.mxu1 %v3426_v3  ;;  %v5249_v28 = vpop.f32.mrf.mxu0  ;;  %v5266_v59 = vpop.f32.mrf.mxu1 }
 0x1fc   : > { %5408 = vmatprep.subr.mxu0 %v3533_v4  ;;  %5386 = vmatprep.mubr.f32.mxu0 %v5742_v2 }
 0x1fd   : > { %5394 = vmatpush3.msra.mxu1 %v3426_v3  ;;  %5409 = vmatpush3.msra.mxu0 %v3533_v4  ;;  %v2110_v3 = vadd.f32 %v2109_v35, %v2014_v6  ;;  %v2335_v4 = vadd.f32 %v5212_v23, %v2229_v36 }
 0x1fe   : > { %5395 = vmatprep.subr.mxu1 %v3425_v5  ;;  %5410 = vmatprep.subr.mxu0 %v3532_v7 }
 0x1ff   : > { %5387 = vmatmul.mubr.f32.gmra.mxu0 %v5742_v2  ;;  %5396 = vmatpush3.msra.mxu1 %v3425_v5  ;;  %v2530_v5 = vpop.f32.mrf.mxu0 }
 0x200   : > { %5397 = vmatprep.mubr.f32.mxu1 %v5742_v2  ;;  %5411 = vmatpush3.msra.mxu0 %v3532_v7  ;;  %v2639_v7 = vpop.f32.mrf.mxu1 }
 0x201   : > { %5398 = vmatmul.mubr.f32.vlgmr.msra.gmra.mxu1 %v5742_v2  ;;  %5412 = vmatprep.subr.mxu0 %v3531_v37 }
 0x202   : > { %5413 = vmatpush3.msra.mxu0 %v3531_v37  ;;  %5414 = vmatprep.mubr.f32.mxu0 %v5742_v2  ;;  %v2334_v37 = vadd.f32 %v2305_v50, %v2228_v1  ;;  %v2125_v50 = vadd.f32 %v5184_v34, %v6247_v47  ;;  %v6271_v47 = vld [vmem:[%s6438_s6] ss:$0 sm:$0xff] }
 0x203   : > { %5415 = vmatmul.mubr.f32.vlgmr.msra.gmra.mxu0 %v5742_v2  ;;  %5400 = vmatprep.mubr.f32.mxu1 %v5742_v2 }
 0x204   : > { %5423 = vmatprep.subr.mxu1 %v3640_v8  ;;  %5417 = vmatprep.mubr.f32.mxu0 %v5742_v2  ;;  %v2233_v31 = vadd.f32 %v6251_v39, %v2125_v50  ;;  %v4074_v50 = vld [vmem:[#allocation7 + $0x128] sm:$0xff] }
 0x205   : > { %5401 = vmatmul.mubr.f32.gmra.mxu1 %v5742_v2  ;;  %5440 = vmatprep.subr.mxu0 %v3749_v9 }
 0x206   : > { %5424 = vmatpush3.msra.mxu1 %v3640_v8  ;;  %5403 = vmatprep.mubr.f32.mxu1 %v5742_v2 }
 0x207   : > { %5418 = vmatmul.mubr.f32.gmra.mxu0 %v5742_v2  ;;  %5425 = vmatprep.subr.mxu1 %v3639_v48 }
 0x208   : > { %5426 = vmatpush3.msra.mxu1 %v3639_v48  ;;  %5441 = vmatpush3.msra.mxu0 %v3749_v9  ;;  %v2115_v9 = vadd.f32 %v5181_v10, %v5164_v32  ;;  %v2230_v48 = vadd.f32 %v2209_v55, %v2110_v3 }
 0x209   : > { %5404 = vmatmul.mubr.f32.gmra.mxu1 %v5742_v2  ;;  %5427 = vmatprep.subr.mxu1 %v3638_v12 }
 0x20a   : > { %5442 = vmatprep.subr.mxu0 %v3748_v16  ;;  %5420 = vmatprep.mubr.f32.mxu0 %v5742_v2 }
 0x20b   : > { %5428 = vmatpush3.msra.mxu1 %v3638_v12  ;;  %5443 = vmatpush3.msra.mxu0 %v3748_v16  ;;  %v2441_v16 = vadd.f32 %v5229_v43, %v2335_v4 }
 0x20c   : > { %5421 = vmatmul.mubr.f32.gmra.mxu0 %v5742_v2  ;;  %5431 = vmatprep.mubr.f32.mxu1 %v5742_v2 }
 0x20d   : > { %5448 = vmatprep.mubr.f32.mxu0 %v5742_v2  ;;  %5429 = vmatprep.subr.mxu1 %v3637_v17 }
 0x20e   : > { %5444 = vmatprep.subr.mxu0 %v3747_v0  ;;  %5430 = vmatpush3.msra.mxu1 %v3637_v17 }
 0x20f   : > { %5445 = vmatpush3.msra.mxu0 %v3747_v0  ;;  %5432 = vmatmul.mubr.f32.vlgmr.msra.gmra.mxu1 %v5742_v2 }
 0x210   : > { %5446 = vmatprep.subr.mxu0 %v3746_v62  ;;  %5434 = vmatprep.mubr.f32.mxu1 %v5742_v2 }
 0x211   : > { %5447 = vmatpush3.msra.mxu0 %v3746_v62  ;;  %5457 = vmatprep.subr.mxu1 %v3858_v18  ;;  %v2440_v62 = vadd.f32 %v2411_v24, %v2334_v37 }
 0x212   : > { %5449 = vmatmul.mubr.f32.vlgmr.msra.gmra.mxu0 %v5742_v2  ;;  %5474 = vmatprep.subr.mxu0 %v3967_v46 }
 0x213   : > { %5451 = vmatprep.mubr.f32.mxu0 %v5742_v2  ;;  %5435 = vmatmul.mubr.f32.gmra.mxu1 %v5742_v2 }
 0x214   : > { %5437 = vmatprep.mubr.f32.mxu1 %v5742_v2  ;;  %5458 = vmatpush3.msra.mxu1 %v3858_v18 }
 0x215   : > { %5475 = vmatpush3.msra.mxu0 %v3967_v46  ;;  %5459 = vmatprep.subr.mxu1 %v3857_v19  ;;  %v2231_v46 = vadd.f32 %v5198_v15, %v2115_v9 }
 0x216   : > { %5452 = vmatmul.mubr.f32.gmra.mxu0 %v5742_v2  ;;  %5476 = vmatprep.subr.mxu0 %v3966_v21 }
 0x217   : > { %5460 = vmatpush3.msra.mxu1 %v3857_v19  ;;  %5477 = vmatpush3.msra.mxu0 %v3966_v21  ;;  %v2336_v19 = vadd.f32 %v2315_v52, %v2230_v48  ;;  %v2337_v30 = vadd.f32 %v5215_v14, %v2231_v46 }
 0x218   : > { %5461 = vmatprep.subr.mxu1 %v3856_v41  ;;  %5478 = vmatprep.subr.mxu0 %v3965_v22 }
 0x219   : > { %5462 = vmatpush3.msra.mxu1 %v3856_v41  ;;  %5479 = vmatpush3.msra.mxu0 %v3965_v22  ;;  %v2550_v41 = vadd.f32 %v5246_v38, %v2441_v16  ;;  %v2442_v27 = vadd.f32 %v2421_v51, %v2336_v19  ;;  %v2443_v55 = vadd.f32 %v5232_v44, %v2337_v30 }
 0x21a   : > { %5463 = vmatprep.subr.mxu1 %v3855_v25  ;;  %5480 = vmatprep.subr.mxu0 %v3964_v49  ;;  %v2232_v38 = vadd.f32 %v2219_v56, %v2120_v13 }
 0x21b   : > { %5464 = vmatpush3.msra.mxu1 %v3855_v25  ;;  %5481 = vmatpush3.msra.mxu0 %v3964_v49  ;;  %v2549_v49 = vadd.f32 %v2520_v60, %v2440_v62  ;;  %v2659_v20 = vadd.f32 %v5263_v57, %v2550_v41  ;;  %v2551_v23 = vadd.f32 %v2530_v5, %v2442_v27 }
 0x21c   : > { %5491 = vmatprep.subr.mxu1 %v6241_v45  ;;  %5508 = vmatprep.subr.mxu0 %v6244_v11  ;;  %v2552_v51 = vadd.f32 %v5249_v28, %v2443_v55  ;;  %v2338_v1 = vadd.f32 %v2325_v58, %v2232_v38  ;;  %v4075_v55 = vld [vmem:[#allocation7 + $0x130] sm:$0xff]  ;;  %v4073_v38 = vld [vmem:[#allocation7 + $0x120] sm:$0xff] }
 0x21d   : > { %v2658_v10 = vadd.f32 %v2629_v63, %v2549_v49  ;;  %v2660_v42 = vadd.f32 %v2639_v7, %v2551_v23  ;;  %v2339_v7 = vadd.f32 %v6253_v53, %v2233_v31 }
 0x21e   : > { %v2661_v56 = vadd.f32 %v5266_v59, %v2552_v51  ;;  %v2444_v58 = vadd.f32 %v6257_v29, %v2338_v1 }
 0x21f   : > { %v2445_v59 = vadd.f32 %v6255_v54, %v2339_v7 }
 0x28e   : > { %v6259_v8 = vpop.f32.mrf.mxu0 }
 0x28f   : > { %v6261_v12 = vpop.f32.mrf.mxu1  ;;  %v2554_v53 = vadd.f32 %v6259_v8, %v2445_v59 }
 0x290   : > { %v2540_v17 = vpop.f32.mrf.mxu0 }
 0x291   : > { %v6263_v0 = vpop.f32.mrf.mxu1  ;;  %v2553_v46 = vadd.f32 %v2540_v17, %v2444_v58  ;;  %v2663_v29 = vadd.f32 %v6261_v12, %v2554_v53 }
 0x292   : > { %v5280_v18 = vpop.f32.mrf.mxu0 }
 0x293   : > { %v5297_v21 = vpop.f32.mrf.mxu1  ;;  %v2768_v35 = vadd.f32 %v5280_v18, %v2659_v20 }
 0x294   : > { %v2738_v22 = vpop.f32.mrf.mxu0 }
 0x295   : > { %v2847_v25 = vpop.f32.mrf.mxu1  ;;  %v2767_v43 = vadd.f32 %v2738_v22, %v2658_v10  ;;  %v2877_v14 = vadd.f32 %v5297_v21, %v2768_v35 }
 0x297   : > { %v5283_v6 = vpop.f32.mrf.mxu0  ;;  %v5300_v32 = vpop.f32.mrf.mxu1  ;;  %v2876_v26 = vadd.f32 %v2847_v25, %v2767_v43  ;;  %v2662_v25 = vadd.f32 %v6263_v0, %v2553_v46 }
 0x298   : > { %v2770_v37 = vadd.f32 %v5283_v6, %v2661_v56 }
 0x299   : > { %v2748_v61 = vpop.f32.mrf.mxu0  ;;  %v2857_v33 = vpop.f32.mrf.mxu1 }
 0x29a   : > { %v2769_v40 = vadd.f32 %v2748_v61, %v2660_v42  ;;  %v2879_v21 = vadd.f32 %v5300_v32, %v2770_v37 }
 0x29b   : > { %v5286_v15 = vpop.f32.mrf.mxu0 }
 0x29c   : > { %v2878_v9 = vadd.f32 %v2857_v33, %v2769_v40  ;;  %v2772_v17 = vadd.f32 %v5286_v15, %v2663_v29  ;;  %v4184_v15 = vld [vmem:[#allocation7 + $0x150] sm:$0xff]  ;;  %v6330_v40 = vld [vmem:[%s6441_s9 + $0x2] ss:$0 sm:$0xff] }
 0x29d   : > { %v5303_v24 = vpop.f32.mrf.mxu1  ;;  %v2758_v52 = vpop.f32.mrf.mxu0 }
 0x29e   : > { %v2771_v30 = vadd.f32 %v2758_v52, %v2662_v25  ;;  %v2881_v13 = vadd.f32 %v5303_v24, %v2772_v17 }
 0x29f   : > { %v2867_v60 = vpop.f32.mrf.mxu1  ;;  %v5314_v57 = vpop.f32.mrf.mxu0 }
 0x2a0   : > { %v2986_v36 = vadd.f32 %v5314_v57, %v2877_v14  ;;  %v2880_v33 = vadd.f32 %v2867_v60, %v2771_v30  ;;  %v6317_v60 = vld [vmem:[%s6441_s9] ss:$0 sm:$0xff] }
 0x2a1   : > { %v5331_v63 = vpop.f32.mrf.mxu1  ;;  %v2956_v44 = vpop.f32.mrf.mxu0  ;;  %v4314_v57 = vmul.f32 0.0, %v6317_v60 }
 0x2a2   : > { %v3095_v3 = vadd.f32 %v5331_v63, %v2986_v36  ;;  %v2985_v34 = vadd.f32 %v2956_v44, %v2876_v26  ;;  %v6324_v36 = vld [vmem:[%s6441_s9 + $0x1] ss:$0 sm:$0xff]  ;;  %v4379_v63 = vmul.f32 0.0, %v6330_v40 }
 0x2a3   : > { %v3065_v28 = vpop.f32.mrf.mxu1  ;;  %v5317_v4 = vpop.f32.mrf.mxu0  ;;  %v4319_v26 = vsel %vm744_vm0, %v4314_v57, 0.0  ;;  %v4344_v31 = vmul.f32 0.0, %v6324_v36 }
 0x2a4   : > { %v3094_v5 = vadd.f32 %v3065_v28, %v2985_v34  ;;  %v3108_v39 = vadd.f32 %v6271_v47, %v3095_v3  ;;  %v2988_v41 = vadd.f32 %v5317_v4, %v2879_v21  ;;  %4320 = vadd.xlane.f32.xlu0 %v4319_v26  ;;  %v4386_v1 = vsel %vm744_vm0, %v4379_v63, 0.0 }
 0x2a5   : > { %v5334_v48 = vpop.f32.mrf.mxu1  ;;  %v2966_v16 = vpop.f32.mrf.mxu0  ;;  %v4350_v44 = vsel %vm744_vm0, %v4344_v31, 0.0 }
 0x2a6   : > { %v3107_v62 = vadd.f32 %v6271_v47, %v3094_v5  ;;  %v2987_v18 = vadd.f32 %v2966_v16, %v2878_v9  ;;  %v3097_v27 = vadd.f32 %v5334_v48, %v2988_v41 }
 0x2a7   : > { %v3075_v19 = vpop.f32.mrf.mxu1  ;;  %v5320_v49 = vpop.f32.mrf.mxu0 }
 0x2a8   : > { %5604 = vtanh.f32 %v3107_v62  ;;  %v3096_v22 = vadd.f32 %v3075_v19, %v2987_v18  ;;  %v3110_v54 = vadd.f32 %v6271_v47, %v3097_v27  ;;  %v2990_v12 = vadd.f32 %v5320_v49, %v2881_v13  ;;  %4351 = vadd.xlane.f32.xlu0 %v4350_v44 }
 0x2a9   : > { %5606 = vtanh.f32 %v3108_v39  ;;  %v5337_v20 = vpop.f32.mrf.mxu1  ;;  %v2976_v61 = vpop.f32.mrf.mxu0  ;;  %v4414_v39 = vld [vmem:[#allocation2] sm:$0x1] }
 0x2aa   : > { %v3109_v6 = vadd.f32 %v6271_v47, %v3096_v22  ;;  %v2989_v32 = vadd.f32 %v2976_v61, %v2880_v33  ;;  %v3099_v23 = vadd.f32 %v5337_v20, %v2990_v12  ;;  %5533 = vpush %v4414_v39 }
 0x2ab   : > { %v3085_v10 = vpop.f32.mrf.mxu1  ;;  %v5348_v3 = vpop.f32.mrf.mxu0 }
 0x2ac   : > { %5608 = vtanh.f32 %v3109_v6  ;;  %v3098_v0 = vadd.f32 %v3085_v10, %v2989_v32  ;;  %v3112_v24 = vadd.f32 %v6271_v47, %v3099_v23  ;;  %4387 = vadd.xlane.f32.xlu0 %v4386_v1 }
 0x2ad   : > { %5610 = vtanh.f32 %v3110_v54 }
 0x2ae   : > { %v3111_v43 = vadd.f32 %v6271_v47, %v3098_v0  ;;  %v3194_v47 = vpop.f32.mrf.mxu0 }
 0x2b0   : > { %5612 = vtanh.f32 %v3111_v43  ;;  %v5351_v34 = vpop.f32.mrf.mxu0 }
 0x2b1   : > { %5614 = vtanh.f32 %v3112_v24 }
 0x2b2   : > { %v3204_v56 = vpop.f32.mrf.mxu0  ;;  %v5365_v5 = vpop.f32.mrf.mxu1 }
 0x2b3   : > { %v3295_v54 = vadd.f32 %v5365_v5, %v5348_v3 }
 0x2b4   : > { %v5354_v28 = vpop.f32.mrf.mxu0  ;;  %v3289_v37 = vpop.f32.mrf.mxu1 }
 0x2b5   : > { %v5605_v8 = vpop.eup %5604  ;;  %v3290_v13 = vadd.f32 %v3289_v37, %v3194_v47 }
 0x2b6   : > { %v5607_v35 = vpop.eup %5606  ;;  %5438 = vmatmul.mubr.msk.f32.gmra.mxu1 %vm744_vm0, %v5605_v8  ;;  %5454 = vmatprep.mubr.msk.f32.mxu0 %vm744_vm0, %v5605_v8  ;;  %v3214_v4 = vpop.f32.mrf.mxu0 }
 0x2b7   : > { %5455 = vmatmul.mubr.msk.f32.gmra.mxu0 %vm744_vm0, %v5607_v35  ;;  %5465 = vmatprep.mubr.f32.mxu1 %v5742_v2  ;;  %v5368_v48 = vpop.f32.mrf.mxu1 }
 0x2b8   : > { %5482 = vmatprep.mubr.f32.mxu0 %v5742_v2  ;;  %v5382_v7 = vpop.f32.mrf.mxu0 }
 0x2b9   : > { %v5609_v52 = vpop.eup %5608  ;;  %v3299_v58 = vpop.f32.mrf.mxu1  ;;  %v3419_v10 = vadd.f32 %v5382_v7, %v3295_v54 }
 0x2ba   : > { %5466 = vmatmul.mubr.f32.vlgmr.msra.gmra.mxu1 %v5742_v2  ;;  %v5611_v14 = vpop.eup %5610  ;;  %v3389_v9 = vpop.f32.mrf.mxu0  ;;  %v3300_v23 = vadd.f32 %v3299_v58, %v3204_v56 }
 0x2bb   : > { %5492 = vmatpush3.msra.mxu1 %v6241_v45  ;;  %5483 = vmatmul.mubr.f32.vlgmr.msra.gmra.mxu0 %v5742_v2  ;;  %v4183_v45 = vld [vmem:[#allocation7 + $0x148] sm:$0xff]  ;;  %v5371_v18 = vpop.f32.mrf.mxu1 }
 0x2bc   : > { %5485 = vmatprep.mubr.msk.f32.mxu0 %vm744_vm0, %v5605_v8  ;;  %5493 = vmatprep.subr.mxu1 %v4075_v55  ;;  %v5385_v16 = vpop.f32.mrf.mxu0  ;;  %v3315_v63 = vadd.f32 %v5371_v18, %v5354_v28 }
 0x2bd   : > { %5509 = vmatpush3.msra.mxu0 %v6244_v11  ;;  %5468 = vmatprep.mubr.f32.mxu1 %v5742_v2  ;;  %v4182_v11 = vld [vmem:[#allocation7 + $0x140] sm:$0xff]  ;;  %v5613_v51 = vpop.eup %5612  ;;  %v3309_v19 = vpop.f32.mrf.mxu1 }
 0x2be   : > { %5494 = vmatpush3.msra.mxu1 %v4075_v55  ;;  %5510 = vmatprep.subr.mxu0 %v4184_v15  ;;  %v5615_v42 = vpop.eup %5614  ;;  %v3399_v62 = vpop.f32.mrf.mxu0  ;;  %v3418_v55 = vadd.f32 %v3389_v9, %v3290_v13  ;;  %v3310_v56 = vadd.f32 %v3309_v19, %v3214_v4 }
 0x2bf   : > { %5469 = vmatmul.mubr.msk.f32.gmra.mxu1 %vm744_vm0, %v5605_v8  ;;  %5486 = vmatmul.mubr.msk.f32.gmra.mxu0 %vm744_vm0, %v5607_v35 }
 0x2c0   : > { %5471 = vmatprep.mubr.msk.f32.mxu1 %vm744_vm0, %v5607_v35  ;;  %5495 = vmatprep.subr.mxu1 %v4074_v50  ;;  %v5388_v46 = vpop.f32.mrf.mxu0 }
 0x2c1   : > { %5511 = vmatpush3.msra.mxu0 %v4184_v15  ;;  %5488 = vmatprep.mubr.msk.f32.mxu0 %vm744_vm0, %v5609_v52  ;;  %v5399_v21 = vpop.f32.mrf.mxu1  ;;  %v3423_v37 = vadd.f32 %v5388_v46, %v3315_v63 }
 0x2c2   : > { %5496 = vmatpush3.msra.mxu1 %v4074_v50  ;;  %5512 = vmatprep.subr.mxu0 %v4183_v45  ;;  %v3409_v59 = vpop.f32.mrf.mxu0  ;;  %v3525_v43 = vadd.f32 %v5399_v21, %v3419_v10 }
 0x2c3   : > { %5472 = vmatmul.mubr.msk.f32.gmra.mxu1 %vm744_vm0, %v5609_v52  ;;  %5497 = vmatprep.subr.mxu1 %v4073_v38  ;;  %v3495_v41 = vpop.f32.mrf.mxu1 }
 0x2c4   : > { %5513 = vmatpush3.msra.mxu0 %v4183_v45  ;;  %5498 = vmatpush3.msra.mxu1 %v4073_v38  ;;  %v5416_v53 = vpop.f32.mrf.mxu0  ;;  %v3524_v45 = vadd.f32 %v3495_v41, %v3418_v55 }
 0x2c5   : > { %5489 = vmatmul.mubr.msk.f32.gmra.mxu0 %vm744_vm0, %v5611_v14  ;;  %5514 = vmatprep.subr.mxu0 %v4182_v11  ;;  %v5402_v25 = vpop.f32.mrf.mxu1 }
 0x2c6   : > { %5516 = vmatprep.mubr.msk.f32.mxu0 %vm744_vm0, %v5605_v8  ;;  %5499 = vmatprep.mubr.f32.mxu1 %v5742_v2  ;;  %v3601_v22 = vpop.f32.mrf.mxu0 }
 0x2c7   : > { %5515 = vmatpush3.msra.mxu0 %v4182_v11  ;;  %5500 = vmatmul.mubr.msk.f32.vlgmr.msra.gmra.mxu1 %vm744_vm0, %v5605_v8  ;;  %v3505_v30 = vpop.f32.mrf.mxu1  ;;  %v3420_v11 = vadd.f32 %v3399_v62, %v3300_v23  ;;  %v3630_v26 = vadd.f32 %v3601_v22, %v3524_v45  ;;  %v3422_v62 = vadd.f32 %v3409_v59, %v3310_v56 }
 0x2c8   : > { %5502 = vmatprep.mubr.msk.f32.mxu1 %vm744_vm0, %v5607_v35  ;;  %v5419_v49 = vpop.f32.mrf.mxu0 }
 0x2c9   : > { %5517 = vmatmul.mubr.msk.f32.vlgmr.msra.gmra.mxu0 %vm744_vm0, %v5607_v35  ;;  %v5405_v27 = vpop.f32.mrf.mxu1  ;;  %v3305_v35 = vadd.f32 %v5368_v48, %v5351_v34  ;;  %v3526_v1 = vadd.f32 %v3505_v30, %v3420_v11 }
 0x2ca   : > { %5519 = vmatprep.mubr.msk.f32.mxu0 %vm744_vm0, %v5609_v52  ;;  %v3611_v29 = vpop.f32.mrf.mxu0  ;;  %v3529_v28 = vadd.f32 %v5405_v27, %v3423_v37  ;;  %v4626_v27 = vld [vmem:[%s6440_s8] ss:$0 sm:$0xff] }
 0x2cb   : > { %5503 = vmatmul.mubr.msk.f32.gmra.mxu1 %vm744_vm0, %v5609_v52  ;;  %v3515_v17 = vpop.f32.mrf.mxu1  ;;  %v3421_v15 = vadd.f32 %v5385_v16, %v3305_v35  ;;  %v3632_v48 = vadd.f32 %v3611_v29, %v3526_v1 }
 0x2cc   : > { %5505 = vmatprep.mubr.msk.f32.mxu1 %vm744_vm0, %v5611_v14  ;;  %v5422_v6 = vpop.f32.mrf.mxu0 }
 0x2cd   : > { %5520 = vmatmul.mubr.msk.f32.gmra.mxu0 %vm744_vm0, %v5611_v14  ;;  %v3631_v14 = vadd.f32 %v5416_v53, %v3525_v43 }
 0x2ce   : > { %5522 = vmatprep.mubr.msk.f32.mxu0 %vm744_vm0, %v5613_v51  ;;  %v6335_v20 = vpop.f32.mrf.mxu0 }
 0x2cf   : > { %5506 = vmatmul.mubr.msk.f32.gmra.mxu1 %vm744_vm0, %v5613_v51  ;;  %v5433_v61 = vpop.f32.mrf.mxu1  ;;  %v3527_v51 = vadd.f32 %v5402_v25, %v3421_v15 }
 0x2d0   : > { %v3740_v47 = vadd.f32 %v5433_v61, %v3631_v14  ;;  %v3528_v61 = vadd.f32 %v3515_v17, %v3422_v62 }
 0x2d1   : > { %5523 = vmatmul.mubr.msk.f32.gmra.mxu0 %vm744_vm0, %v5615_v42  ;;  %v3710_v32 = vpop.f32.mrf.mxu1  ;;  %v3633_v3 = vadd.f32 %v5419_v49, %v3527_v51 }
 0x2d2   : > { %v5450_v33 = vpop.f32.mrf.mxu0  ;;  %v3739_v7 = vadd.f32 %v3710_v32, %v3630_v26  ;;  %v3635_v32 = vadd.f32 %v5422_v6, %v3529_v28  ;;  %v3634_v35 = vadd.f32 %v6335_v20, %v3528_v61 }
 0x2d3   : > { %v5436_v12 = vpop.f32.mrf.mxu1  ;;  %v3849_v16 = vadd.f32 %v5450_v33, %v3740_v47 }
 0x2d4   : > { %v3819_v8 = vpop.f32.mrf.mxu0  ;;  %v3742_v58 = vadd.f32 %v5436_v12, %v3633_v3 }
 0x2d5   : > { %v3720_v50 = vpop.f32.mrf.mxu1  ;;  %v3848_v41 = vadd.f32 %v3819_v8, %v3739_v7 }
 0x2d6   : > { %v5453_v0 = vpop.f32.mrf.mxu0  ;;  %v3741_v25 = vadd.f32 %v3720_v50, %v3632_v48 }
 0x2d7   : > { %v3851_v49 = vadd.f32 %v5453_v0, %v3742_v58 }
 0x2d8   : > { %v3829_v24 = vpop.f32.mrf.mxu0 }
 0x2d9   : > { %v3850_v33 = vadd.f32 %v3829_v24, %v3741_v25 }
 0x2db   : > { %s5534_s27 = spop %5533 }
 0x32d   : > { %v6347_v61 = vpop.xlane.xlu0 %4320 }
 0x376   : > { %v5439_v52 = vpop.f32.mrf.mxu1 }
 0x377   : > { %v5456_v38 = vpop.f32.mrf.mxu0  ;;  %v3744_v8 = vadd.f32 %v5439_v52, %v3635_v32 }
 0x378   : > { %v3730_v42 = vpop.f32.mrf.mxu1 }
 0x379   : > { %v3839_v57 = vpop.f32.mrf.mxu0  ;;  %v3743_v50 = vadd.f32 %v3730_v42, %v3634_v35  ;;  %v3853_v14 = vadd.f32 %v5456_v38, %v3744_v8 }
 0x37a   : > { %v5467_v31 = vpop.f32.mrf.mxu1 }
 0x37b   : > { %v5484_v44 = vpop.f32.mrf.mxu0  ;;  %v3958_v22 = vadd.f32 %v5467_v31, %v3849_v16  ;;  %v3852_v63 = vadd.f32 %v3839_v57, %v3743_v50 }
 0x37c   : > { %v3928_v34 = vpop.f32.mrf.mxu1 }
 0x37d   : > { %v4037_v5 = vpop.f32.mrf.mxu0  ;;  %v3957_v30 = vadd.f32 %v3928_v34, %v3848_v41  ;;  %v4067_v54 = vadd.f32 %v5484_v44, %v3958_v22 }
 0x37f   : > { %v5470_v9 = vpop.f32.mrf.mxu1  ;;  %v5487_v39 = vpop.f32.mrf.mxu0  ;;  %v4066_v10 = vadd.f32 %v4037_v5, %v3957_v30 }
 0x380   : > { %v3960_v46 = vadd.f32 %v5470_v9, %v3851_v49 }
 0x381   : > { %v3938_v21 = vpop.f32.mrf.mxu1  ;;  %v4047_v53 = vpop.f32.mrf.mxu0 }
 0x382   : > { %v4069_v17 = vadd.f32 %v5487_v39, %v3960_v46  ;;  %v3959_v55 = vadd.f32 %v3938_v21, %v3850_v33 }
 0x383   : > { %v5473_v18 = vpop.f32.mrf.mxu1 }
 0x384   : > { %v4068_v52 = vadd.f32 %v4047_v53, %v3959_v55  ;;  %v3962_v44 = vadd.f32 %v5473_v18, %v3853_v14 }
 0x385   : > { %v5490_v4 = vpop.f32.mrf.mxu0  ;;  %v3948_v19 = vpop.f32.mrf.mxu1 }
 0x386   : > { %v3961_v34 = vadd.f32 %v3948_v19, %v3852_v63  ;;  %v4071_v5 = vadd.f32 %v5490_v4, %v3962_v44 }
 0x387   : > { %v4057_v13 = vpop.f32.mrf.mxu0  ;;  %v5501_v29 = vpop.f32.mrf.mxu1 }
 0x388   : > { %v4176_v59 = vadd.f32 %v5501_v29, %v4067_v54  ;;  %v4070_v9 = vadd.f32 %v4057_v13, %v3961_v34  ;;  %v4352_v13 = vpop.xlane.xlu0 %4351 }
 0x389   : > { %v5518_v12 = vpop.f32.mrf.mxu0  ;;  %v4146_v0 = vpop.f32.mrf.mxu1  ;;  %v6354_v29 = vadd.f32 %v4352_v13, %v6347_v61 }
 0x38a   : > { %v4285_v23 = vadd.f32 %v5518_v12, %v4176_v59  ;;  %v4175_v15 = vadd.f32 %v4146_v0, %v4066_v10  ;;  %v6360_v12 = vstv %s5534_s27 }
 0x38b   : > { %v4255_v43 = vpop.f32.mrf.mxu0  ;;  %v5504_v6 = vpop.f32.mrf.mxu1 }
 0x38c   : > { %v4298_v45 = vadd.f32 %v4626_v27, %v4285_v23  ;;  %v4284_v24 = vadd.f32 %v4255_v43, %v4175_v15  ;;  %v4178_v11 = vadd.f32 %v5504_v6, %v4069_v17  ;;  %v4388_v8 = vpop.xlane.xlu0 %4387 }
 0x38d   : > { %v5521_v51 = vpop.f32.mrf.mxu0  ;;  %v4156_v20 = vpop.f32.mrf.mxu1  ;;  %v4407_v0 = vadd.f32 %v4388_v8, %v6354_v29 }
 0x38e   : > { %5616 = vtanh.f32 %v4298_v45  ;;  %v4297_v26 = vadd.f32 %v4626_v27, %v4284_v24  ;;  %v4287_v31 = vadd.f32 %v5521_v51, %v4178_v11  ;;  %v4177_v1 = vadd.f32 %v4156_v20, %v4068_v52 }
 0x38f   : > { %v4265_v3 = vpop.f32.mrf.mxu0  ;;  %v5507_v47 = vpop.f32.mrf.mxu1  ;;  %v4417_v23 = vadd.f32 %v6360_v12, %v4407_v0 }
 0x390   : > { %5618 = vtanh.f32 %v4297_v26  ;;  %v4300_v56 = vadd.f32 %v4626_v27, %v4287_v31  ;;  %v4286_v42 = vadd.f32 %v4265_v3, %v4177_v1  ;;  %v4180_v38 = vadd.f32 %v5507_v47, %v4071_v5 }
 0x391   : > { %v5524_v7 = vpop.f32.mrf.mxu0  ;;  %v4166_v37 = vpop.f32.mrf.mxu1 }
 0x392   : > { %5620 = vtanh.f32 %v4300_v56  ;;  %v4299_v39 = vadd.f32 %v4626_v27, %v4286_v42  ;;  %v4179_v48 = vadd.f32 %v4166_v37, %v4070_v9  ;;  %v4289_v58 = vadd.f32 %v5524_v7, %v4180_v38 }
 0x393   : > { %v4275_v16 = vpop.f32.mrf.mxu0 }
 0x394   : > { %5622 = vtanh.f32 %v4299_v39  ;;  %v4288_v57 = vadd.f32 %v4275_v16, %v4179_v48  ;;  %v4302_v41 = vadd.f32 %v4626_v27, %v4289_v58 }
 0x396   : > { %v4301_v25 = vadd.f32 %v4626_v27, %v4288_v57  ;;  %5624 = vtanh.f32 %v4302_v41 }
 0x398   : > { %5626 = vtanh.f32 %v4301_v25 }
 0x399   : > { %5628 = vtanh.f32 %v4417_v23 }
 0x39b   : > { %v5617_v62 = vpop.eup %5616 }
 0x39c   : > { %v4316_v21 = vmul.f32 %v5617_v62, %v6317_v60  ;;  %v4346_v18 = vmul.f32 %v5617_v62, %v6324_v36  ;;  %v4381_v19 = vmul.f32 %v5617_v62, %v6330_v40 }
 0x39d   : > { %v5619_v53 = vpop.eup %5618 }
 0x39e   : > { %v4325_v22 = vsel %vm744_vm0, %v4316_v21, 0.0  ;;  %v4315_v28 = vmul.f32 %v5619_v53, %v6317_v60  ;;  %v4345_v30 = vmul.f32 %v5619_v53, %v6324_v36  ;;  %v4356_v4 = vsel %vm744_vm0, %v4346_v18, 0.0 }
 0x39f   : > { %4326 = vadd.xlane.f32.xlu0 %v4325_v22  ;;  %v5621_v54 = vpop.eup %5620  ;;  %v4380_v32 = vmul.f32 %v5619_v53, %v6330_v40  ;;  %v4392_v33 = vsel %vm744_vm0, %v4381_v19, 0.0 }
 0x3a0   : > { %v4322_v49 = vsel %vm744_vm0, %v4315_v28, 0.0  ;;  %v4353_v46 = vsel %vm744_vm0, %v4345_v30, 0.0  ;;  %v4348_v10 = vmul.f32 %v5621_v54, %v6324_v36  ;;  %v4318_v35 = vmul.f32 %v5621_v54, %v6317_v60 }
 0x3a1   : > { %4323 = vadd.xlane.f32.xlu1 %v4322_v49  ;;  %v4389_v59 = vsel %vm744_vm0, %v4380_v32, 0.0  ;;  %v5623_v27 = vpop.eup %5622  ;;  %v4383_v55 = vmul.f32 %v5621_v54, %v6330_v40 }
 0x3a2   : > { %v4362_v17 = vsel %vm744_vm0, %v4348_v10, 0.0  ;;  %v4331_v15 = vsel %vm744_vm0, %v4318_v35, 0.0  ;;  %v4347_v43 = vmul.f32 %v5623_v27, %v6324_v36  ;;  %v4317_v50 = vmul.f32 %v5623_v27, %v6317_v60 }
 0x3a3   : > { %4357 = vadd.xlane.f32.xlu0 %v4356_v4  ;;  %v4398_v6 = vsel %vm744_vm0, %v4383_v55, 0.0  ;;  %v5625_v45 = vpop.eup %5624  ;;  %v4382_v11 = vmul.f32 %v5623_v27, %v6330_v40 }
 0x3a4   : > { %v4359_v24 = vsel %vm744_vm0, %v4347_v43, 0.0  ;;  %v4328_v14 = vsel %vm744_vm0, %v4317_v50, 0.0  ;;  %v4385_v51 = vmul.f32 %v5625_v45, %v6330_v40 }
 0x3a5   : > { %4354 = vadd.xlane.f32.xlu1 %v4353_v46  ;;  %v5627_v60 = vpop.eup %5626  ;;  %v4395_v20 = vsel %vm744_vm0, %v4382_v11, 0.0 }
 0x3a6   : > { %v4349_v52 = vmul.f32 %v5627_v60, %v6324_v36  ;;  %v4404_v2 = vsel %vm744_vm0, %v4385_v51, 0.0  ;;  %v4384_v31 = vmul.f32 %v5627_v60, %v6330_v40  ;;  %v5629_v63 = vpop.eup %5628 }
 0x3a7   : > { %4393 = vadd.xlane.f32.xlu0 %v4392_v33  ;;  %4434 = vst.msk [vmem:[%s6375_s30 + $0x10] sm:$0xff] %vm4431_vm1, %v5629_v63  ;;  %4435 = vst.msk [vmem:[%s6375_s30 + $0x18] sm:$0xff] %vm4431_vm1, %v5629_v63 }
 0x3a8   : > { %v4365_v26 = vsel %vm744_vm0, %v4349_v52, 0.0  ;;  %4436 = vst.msk [vmem:[%s6375_s30 + $0x20] sm:$0xff] %vm4431_vm1, %v5629_v63  ;;  %4437 = vst.msk [vmem:[%s6375_s30 + $0x28] sm:$0xff] %vm4431_vm1, %v5629_v63  ;;  %v4401_v36 = vsel %vm744_vm0, %v4384_v31, 0.0 }
 0x3a9   : > { %4390 = vadd.xlane.f32.xlu1 %v4389_v59  ;;  %4438 = vst.msk [vmem:[%s6375_s30 + $0x30] sm:$0xff] %vm4431_vm1, %v5629_v63  ;;  %4439 = vst.msk [vmem:[%s6375_s30 + $0x38] sm:$0xff] %vm4431_vm1, %v5629_v63 }
 0x3aa   : > { %4440 = vst.msk [vmem:[%s6375_s30 + $0x40] sm:$0xff] %vm4431_vm1, %v5629_v63  ;;  %4441 = vst.msk [vmem:[%s6375_s30 + $0x48] sm:$0xff] %vm4431_vm1, %v5629_v63 }
 0x3ab   : > { %4363 = vadd.xlane.f32.xlu0 %v4362_v17 }
 0x3ad   : > { %4332 = vadd.xlane.f32.xlu1 %v4331_v15 }
 0x3af   : > { %4399 = vadd.xlane.f32.xlu0 %v4398_v6 }
 0x3b1   : > { %4360 = vadd.xlane.f32.xlu1 %v4359_v24 }
 0x3b3   : > { %4329 = vadd.xlane.f32.xlu0 %v4328_v14 }
 0x3b5   : > { %4396 = vadd.xlane.f32.xlu1 %v4395_v20 }
 0x3b7   : > { %4405 = vadd.xlane.f32.xlu0 %v4404_v2 }
 0x3b9   : > { %4366 = vadd.xlane.f32.xlu1 %v4365_v26 }
 0x3bd   : > { %4402 = vadd.xlane.f32.xlu1 %v4401_v36 }
 0x428   : > { %v4327_v40 = vpop.xlane.xlu0 %4326 }
 0x42a   : > { %v4324_v44 = vpop.xlane.xlu1 %4323 }
 0x42c   : > { %v4358_v1 = vpop.xlane.xlu0 %4357 }
 0x42d   : > { %v4370_v58 = vadd.f32 %v4358_v1, %v4324_v44 }
 0x42e   : > { %v4355_v3 = vpop.xlane.xlu1 %4354 }
 0x42f   : > { %v4369_v47 = vadd.f32 %v4355_v3, %v6347_v61 }
 0x430   : > { %v4394_v34 = vpop.xlane.xlu0 %4393 }
 0x431   : > { %v4409_v56 = vadd.f32 %v4394_v34, %v4369_v47 }
 0x432   : > { %v4391_v5 = vpop.xlane.xlu1 %4390 }
 0x433   : > { %v4419_v42 = vadd.f32 %v6360_v12, %v4409_v56  ;;  %v4408_v7 = vadd.f32 %v4391_v5, %v6354_v29 }
 0x434   : > { %v4364_v37 = vpop.xlane.xlu0 %4363 }
 0x435   : > { %5630 = vtanh.f32 %v4419_v42  ;;  %v4418_v9 = vadd.f32 %v6360_v12, %v4408_v7 }
 0x436   : > { %v4333_v38 = vpop.xlane.xlu1 %4332 }
 0x437   : > { %5632 = vtanh.f32 %v4418_v9 }
 0x438   : > { %v4400_v39 = vpop.xlane.xlu0 %4399 }
 0x43a   : > { %v4361_v48 = vpop.xlane.xlu1 %4360 }
 0x43b   : > { %v4371_v16 = vadd.f32 %v4361_v48, %v4327_v40 }
 0x43c   : > { %v4330_v57 = vpop.xlane.xlu0 %4329 }
 0x43d   : > { %v4411_v62 = vadd.f32 %v4400_v39, %v4371_v16  ;;  %v4372_v61 = vadd.f32 %v4364_v37, %v4330_v57 }
 0x43e   : > { %v4397_v21 = vpop.xlane.xlu1 %4396 }
 0x43f   : > { %v4421_v53 = vadd.f32 %v6360_v12, %v4411_v62  ;;  %v4410_v41 = vadd.f32 %v4397_v21, %v4370_v58 }
 0x440   : > { %v4406_v30 = vpop.xlane.xlu0 %4405 }
 0x441   : > { %5634 = vtanh.f32 %v4421_v53  ;;  %v4420_v22 = vadd.f32 %v6360_v12, %v4410_v41 }
 0x442   : > { %v5631_v28 = vpop.eup %5630  ;;  %v4367_v18 = vpop.xlane.xlu1 %4366 }
 0x443   : > { %4443 = vst.msk [vmem:[%s6375_s30 + $0x58] sm:$0xff] %vm4431_vm1, %v5631_v28  ;;  %5636 = vtanh.f32 %v4420_v22  ;;  %v4373_v25 = vadd.f32 %v4367_v18, %v4333_v38 }
 0x444   : > { %v5633_v49 = vpop.eup %5632 }
 0x445   : > { %4442 = vst.msk [vmem:[%s6375_s30 + $0x50] sm:$0xff] %vm4431_vm1, %v5633_v49  ;;  %v4413_v4 = vadd.f32 %v4406_v30, %v4373_v25 }
 0x446   : > { %v4403_v19 = vpop.xlane.xlu1 %4402 }
 0x447   : > { %v4423_v54 = vadd.f32 %v6360_v12, %v4413_v4  ;;  %v4412_v46 = vadd.f32 %v4403_v19, %v4372_v61 }
 0x449   : > { %5638 = vtanh.f32 %v4423_v54  ;;  %v4422_v32 = vadd.f32 %v6360_v12, %v4412_v46 }
 0x44b   : > { %5640 = vtanh.f32 %v4422_v32 }
 0x44e   : > { %v5635_v13 = vpop.eup %5634 }
 0x44f   : > { %4445 = vst.msk [vmem:[%s6375_s30 + $0x68] sm:$0xff] %vm4431_vm1, %v5635_v13 }
 0x450   : > { %v5637_v29 = vpop.eup %5636 }
 0x451   : > { %4444 = vst.msk [vmem:[%s6375_s30 + $0x60] sm:$0xff] %vm4431_vm1, %v5637_v29 }
 0x456   : > { %v5639_v33 = vpop.eup %5638 }
 0x457   : > { %4447 = vst.msk [vmem:[%s6375_s30 + $0x78] sm:$0xff] %vm4431_vm1, %v5639_v33 }
 0x458   : > { %v5641_v10 = vpop.eup %5640 }
 0x459   : > { %4446 = vst.msk [vmem:[%s6375_s30 + $0x70] sm:$0xff] %vm4431_vm1, %v5641_v10 }
 0x45a PF: > { %s25_s19 = sadd.s32 1, %s5734_s19  }
 0x45b   : > { %p22_p2 = scmp.ge.s32.totalorder %s25_s19, 4  }
 0x45d   :  { %24 = sbr.rel (!%p22_p2) target bundleno = 5 (0x5), region = 137 }
 0x462   :  { %4469 = vsyncpa [#allocation4], 1 }
 0x463   :  { %4471 = vsyncpa [#allocation4 + $0x1], 1 }
 0x464   :  { %4472 = vsyncpa [#allocation6], 1 }

</bundles_post_ra>
